<compile_context>
chip_gen: v7x
topology: tpu7x:2x2x1
jax: 0.10.0
libtpu: 0.0.40
codegen_flags: <defaults>
</compile_context>

<pallas_src>
import jax
import jax.numpy as jnp
from jax.experimental import pallas as pl
from jax.experimental.pallas import tpu as pltpu

EPS = 1e-5
CPAD = 128                  # internal channel padding -> exactly one lane tile
MXU_DTYPE = jnp.bfloat16    # matmul operand dtype (f32 accumulation)


def _bn(t, gamma, beta, count, axis):
    """Single-pass training-mode BatchNorm (biased variance), fused scale/shift.

    NOTE: var = E[x^2] - E[x]^2 in f32 is cancellation-prone when |mean| >> std;
    fine at the bf16-level tolerance used here (switch to two-pass if tightened).
    """
    s1 = jnp.sum(t, axis=axis, keepdims=True)
    s2 = jnp.sum(t * t, axis=axis, keepdims=True)
    inv = 1.0 / float(count)
    mean = s1 * inv
    var = s2 * inv - mean * mean
    scale = gamma * jax.lax.rsqrt(var + EPS)
    shift = beta - mean * scale
    return t * scale + shift


def bottleneck_kernel(x_ref, w1_ref, w2_ref, w3_ref,
                      g1_ref, b1_ref, g2_ref, b2_ref, g3_ref, b3_ref,
                      o_ref, pad_ref):
    # x_ref  : (Cin, R)          f32   R = N*H*W (lane-dense trailing dim)
    # w1_ref : (Cin, CPAD)       bf16
    # w2_ref : (9, CPAD, CPAD)   bf16  tap-major: [kh*3+kw, cin, cout]
    # w3_ref : (Cout, CPAD)      bf16
    # g1/b1/g2/b2 : (1, CPAD) f32 ;  g3/b3 : (Cout, 1) f32
    # o_ref  : (Cout, R)         f32   (lane-dense trailing dim)
    # pad_ref: (N, H+2, W+2, CPAD) bf16 VMEM scratch (zero halo + interior)
    Cin, R = x_ref.shape
    Cpad = w1_ref.shape[1]
    Cout = o_ref.shape[0]
    N = pad_ref.shape[0]
    H = pad_ref.shape[1] - 2
    W = pad_ref.shape[2] - 2

    # ---- conv1 (1x1) -> bn1 -> relu --------------------------------------
    # One batched matmul: contract the leading channel axis of x directly.
    t1 = jax.lax.dot_general(
        x_ref[...].astype(MXU_DTYPE), w1_ref[...],
        dimension_numbers=(((0,), (0,)), ((), ())),
        preferred_element_type=jnp.float32)                     # (R, Cpad)
    t1 = jnp.maximum(_bn(t1, g1_ref[...], b1_ref[...], R, 0), 0.0)

    # ---- conv2 (3x3, stride 1, pad 1) prep: halo-only zero fill ------------
    zrow = jnp.zeros((N, 1, W + 2, Cpad), MXU_DTYPE)
    pad_ref[:, 0:1, :, :] = zrow                                 # top row (+corners)
    pad_ref[:, H + 1:H + 2, :, :] = zrow                         # bottom row (+corners)
    zcol = jnp.zeros((N, H, 1, Cpad), MXU_DTYPE)
    pad_ref[:, 1:H + 1, 0:1, :] = zcol                           # left column
    pad_ref[:, 1:H + 1, W + 1:W + 2, :] = zcol                   # right column
    pad_ref[:, 1:H + 1, 1:W + 1, :] = (
        t1.reshape(N, H, W, Cpad).astype(MXU_DTYPE))             # interior

    # ---- conv2: 9 per-tap K=CPAD matmuls accumulated in f32 ----------------
    # (no (R, 9*CPAD) im2col materialization)
    acc = jnp.zeros((R, Cpad), jnp.float32)
    for kh in range(3):
        for kw in range(3):
            patch = pad_ref[:, kh:kh + H, kw:kw + W, :].reshape(R, Cpad)
            acc = acc + jnp.dot(patch, w2_ref[kh * 3 + kw],
                                preferred_element_type=jnp.float32)
    t2 = jnp.maximum(_bn(acc, g2_ref[...], b2_ref[...], R, 0), 0.0)
    t2 = t2.astype(MXU_DTYPE)

    # ---- conv3 (1x1) -> bn3 -> + residual -> relu -------------------------
    # Single matmul producing the output directly in (Cout, R) layout.
    t3 = jax.lax.dot_general(
        w3_ref[...], t2,
        dimension_numbers=(((1,), (1,)), ((), ())),
        preferred_element_type=jnp.float32)                      # (Cout, R)
    t3 = _bn(t3, g3_ref[...], b3_ref[...], R, 1)

    # Identity residual (requires Cin == Cout, stride == 1 -> downsample=None);
    # x_ref already has the (Cout, R) layout, so the add is layout-aligned and
    # the store is a full-lane (unmasked) write.
    o_ref[...] = jnp.maximum(t3 + x_ref[...], 0.0)


def bottleneck_forward(x_nchw, W1, W2, W3, g1, b1, g2, b2, g3, b3):
    """Fused Bottleneck forward.

    x_nchw: (N, Cin, H, W) f32. W1/W2/W3 in PyTorch OIHW layout, BN params 1-D.
    """
    N, Cin, H, W = x_nchw.shape
    P = W1.shape[0]
    Cout = W3.shape[0]
    HW = H * W
    R = N * HW
    assert Cin == Cout, "identity residual requires Cin == Cout (downsample=None)"
    assert P <= CPAD and Cin <= CPAD

    # Kernel-layout (channel-padded, bf16) weights - tiny one-time transforms.
    w1k = jnp.pad(W1[:, :, 0, 0].T, ((0, 0), (0, CPAD - P))).astype(MXU_DTYPE)   # (Cin, CPAD)
    w2k = jnp.pad(jnp.transpose(W2, (2, 3, 1, 0)),
                  ((0, 0), (0, 0), (0, CPAD - P), (0, CPAD - P)))
    w2k = w2k.reshape(9, CPAD, CPAD).astype(MXU_DTYPE)                           # (9, CPAD, CPAD)
    w3k = jnp.pad(W3[:, :, 0, 0], ((0, 0), (0, CPAD - P))).astype(MXU_DTYPE)     # (Cout, CPAD)

    # BN params; gamma AND beta padded with 0 so padded channels stay exactly 0
    # (var=0 on padded lanes would otherwise leak rsqrt(eps)-scaled garbage).
    pad1 = lambda v: jnp.pad(v, (0, CPAD - P)).reshape(1, CPAD).astype(jnp.float32)
    g1k, b1k, g2k, b2k = pad1(g1), pad1(b1), pad1(g2), pad1(b2)
    g3k = g3.reshape(Cout, 1).astype(jnp.float32)
    b3k = b3.reshape(Cout, 1).astype(jnp.float32)

    # Channel-major, lane-dense kernel I/O: (C, N*H*W).  R = 128 here, so every
    # kernel load/store of x / out is an unmasked full-lane access.  The two
    # wrapper transposes move 8 KB each (one-time XLA ops).
    xk = jnp.transpose(x_nchw.reshape(N, Cin, HW), (1, 0, 2)).reshape(Cin, R)

    vmem = pl.BlockSpec(memory_space=pltpu.MemorySpace.VMEM)
    outk = pl.pallas_call(
        bottleneck_kernel,
        out_shape=jax.ShapeDtypeStruct((Cout, R), jnp.float32),
        in_specs=[vmem] * 10,
        out_specs=vmem,
        scratch_shapes=[pltpu.VMEM((N, H + 2, W + 2, CPAD), MXU_DTYPE)],
        compiler_params=pltpu.CompilerParams(vmem_limit_bytes=32 * 1024 * 1024),
    )(xk, w1k, w2k, w3k, g1k, b1k, g2k, b2k, g3k, b3k)

    return jnp.transpose(outk.reshape(Cout, N, H, W), (1, 0, 2, 3))   # (N, Cout, H, W)


# ---------------- pure-JAX reference (correctness check) ----------------
def _ref_bn(t, g, b):
    mean = jnp.mean(t, axis=(0, 2, 3), keepdims=True)
    var = jnp.mean((t - mean) ** 2, axis=(0, 2, 3), keepdims=True)
    return (t - mean) * jax.lax.rsqrt(var + EPS) * g.reshape(1, -1, 1, 1) + b.reshape(1, -1, 1, 1)


def ref_forward(x, W1, W2, W3, g1, b1, g2, b2, g3, b3):
    conv = lambda a, w, pad: jax.lax.conv_general_dilated(
        a, w, (1, 1), pad, dimension_numbers=('NCHW', 'OIHW', 'NCHW'))
    out = jax.nn.relu(_ref_bn(conv(x, W1, 'VALID'), g1, b1))
    out = jax.nn.relu(_ref_bn(conv(out, W2, [(1, 1), (1, 1)]), g2, b2))
    out = _ref_bn(conv(out, W3, 'VALID'), g3, b3)
    return jax.nn.relu(out + x)


if __name__ == "__main__":
    # Bottleneck(inplanes=16, planes=4): expansion 4 -> output channels 16,
    # so the identity residual path is valid (downsample=None, stride=1).
    N, H, W = 2, 8, 8
    inplanes, planes, expansion = 16, 4, 4
    outplanes = planes * expansion

    key = jax.random.PRNGKey(0)
    ks = jax.random.split(key, 10)

    x = jax.random.normal(ks[0], (N, inplanes, H, W), jnp.float32)

    # PyTorch-shaped (OIHW) weights and BN affine params, deterministic init.
    W1 = jax.random.normal(ks[1], (planes, inplanes, 1, 1), jnp.float32) * 0.1
    W2 = jax.random.normal(ks[2], (planes, planes, 3, 3), jnp.float32) * 0.1
    W3 = jax.random.normal(ks[3], (outplanes, planes, 1, 1), jnp.float32) * 0.1
    g1 = jax.random.normal(ks[4], (planes,), jnp.float32) * 0.1 + 1.0
    b1 = jax.random.normal(ks[5], (planes,), jnp.float32) * 0.1
    g2 = jax.random.normal(ks[6], (planes,), jnp.float32) * 0.1 + 1.0
    b2 = jax.random.normal(ks[7], (planes,), jnp.float32) * 0.1
    g3 = jax.random.normal(ks[8], (outplanes,), jnp.float32) * 0.1 + 1.0
    b3 = jax.random.normal(ks[9], (outplanes,), jnp.float32) * 0.1

    out = bottleneck_forward(x, W1, W2, W3, g1, b1, g2, b2, g3, b3)
    out = jax.block_until_ready(out)

    ref = jax.block_until_ready(ref_forward(x, W1, W2, W3, g1, b1, g2, b2, g3, b3))

    assert out.shape == (N, outplanes, H, W)
    # bf16 MXU operands (f32 accumulation / BN math) -> bf16-level tolerance
    # against the full-f32 reference.
    max_err = float(jnp.max(jnp.abs(out - ref)))
    assert bool(jnp.allclose(out, ref, rtol=3e-2, atol=3e-2)), max_err
    print("KERNEL_OK")
</pallas_src>

<mosaic_0001>
module attributes {stable_mosaic.version = 11 : i64} {
  func.func @bottleneck_kernel(%arg0: memref<16x128xf32, #tpu.memory_space<vmem>>, %arg1: memref<16x128xbf16, #tpu.memory_space<vmem>>, %arg2: memref<9x128x128xbf16, #tpu.memory_space<vmem>>, %arg3: memref<16x128xbf16, #tpu.memory_space<vmem>>, %arg4: memref<1x128xf32, #tpu.memory_space<vmem>>, %arg5: memref<1x128xf32, #tpu.memory_space<vmem>>, %arg6: memref<1x128xf32, #tpu.memory_space<vmem>>, %arg7: memref<1x128xf32, #tpu.memory_space<vmem>>, %arg8: memref<16x1xf32, #tpu.memory_space<vmem>>, %arg9: memref<16x1xf32, #tpu.memory_space<vmem>>, %arg10: memref<16x128xf32, #tpu.memory_space<vmem>>, %arg11: memref<2x10x10x128xbf16, #tpu.memory_space<vmem>>) attributes {dimension_semantics = [], scalar_prefetch = 0 : i64, scratch_operands = 1 : i64, tpu.core_type = #tpu.core_type<tc>} {
    %c0 = arith.constant 0 : index
    %c0_0 = arith.constant 0 : index
    %0 = vector.load %arg0[%c0, %c0_0] : memref<16x128xf32, #tpu.memory_space<vmem>>, vector<16x128xf32>
    %1 = arith.truncf %0 : vector<16x128xf32> to vector<16x128xbf16>
    %c0_1 = arith.constant 0 : index
    %c0_2 = arith.constant 0 : index
    %2 = vector.load %arg1[%c0_1, %c0_2] : memref<16x128xbf16, #tpu.memory_space<vmem>>, vector<16x128xbf16>
    %cst = arith.constant dense<0.000000e+00> : vector<128x128xf32>
    %3 = tpu.matmul %1, %2, %cst {dimension_numbers = #tpu.dot_dimension_numbers<[0], [0], [1], [1], [0, 1, 1, 1], [], []>} : vector<16x128xbf16>, vector<16x128xbf16>, vector<128x128xf32> -> vector<128x128xf32>
    %c0_3 = arith.constant 0 : index
    %c0_4 = arith.constant 0 : index
    %4 = vector.load %arg4[%c0_3, %c0_4] : memref<1x128xf32, #tpu.memory_space<vmem>>, vector<1x128xf32>
    %c0_5 = arith.constant 0 : index
    %c0_6 = arith.constant 0 : index
    %5 = vector.load %arg5[%c0_5, %c0_6] : memref<1x128xf32, #tpu.memory_space<vmem>>, vector<1x128xf32>
    %cst_7 = arith.constant dense<0.000000e+00> : vector<128xf32>
    %6 = vector.multi_reduction <add>, %3, %cst_7 [0] : vector<128x128xf32> to vector<128xf32>
    %7 = vector.shape_cast %6 : vector<128xf32> to vector<1x128xf32>
    %8 = arith.mulf %3, %3 : vector<128x128xf32>
    %cst_8 = arith.constant dense<0.000000e+00> : vector<128xf32>
    %9 = vector.multi_reduction <add>, %8, %cst_8 [0] : vector<128x128xf32> to vector<128xf32>
    %10 = vector.shape_cast %9 : vector<128xf32> to vector<1x128xf32>
    %cst_9 = arith.constant 7.812500e-03 : f32
    %11 = vector.broadcast %cst_9 : f32 to vector<1x128xf32>
    %12 = arith.mulf %7, %11 : vector<1x128xf32>
    %cst_10 = arith.constant 7.812500e-03 : f32
    %13 = vector.broadcast %cst_10 : f32 to vector<1x128xf32>
    %14 = arith.mulf %10, %13 : vector<1x128xf32>
    %15 = arith.mulf %12, %12 : vector<1x128xf32>
    %16 = arith.subf %14, %15 : vector<1x128xf32>
    %cst_11 = arith.constant 9.99999974E-6 : f32
    %17 = vector.broadcast %cst_11 : f32 to vector<1x128xf32>
    %18 = arith.addf %16, %17 : vector<1x128xf32>
    %19 = math.rsqrt %18 : vector<1x128xf32>
    %20 = arith.mulf %4, %19 : vector<1x128xf32>
    %21 = arith.mulf %12, %20 : vector<1x128xf32>
    %22 = arith.subf %5, %21 : vector<1x128xf32>
    %23 = vector.broadcast %20 : vector<1x128xf32> to vector<128x128xf32>
    %24 = arith.mulf %3, %23 : vector<128x128xf32>
    %25 = vector.broadcast %22 : vector<1x128xf32> to vector<128x128xf32>
    %26 = arith.addf %24, %25 : vector<128x128xf32>
    %cst_12 = arith.constant 0.000000e+00 : f32
    %27 = vector.broadcast %cst_12 : f32 to vector<128x128xf32>
    %28 = arith.maximumf %26, %27 : vector<128x128xf32>
    %cst_13 = arith.constant 0.000000e+00 : bf16
    %29 = vector.broadcast %cst_13 : bf16 to vector<2x1x10x128xbf16>
    %c0_14 = arith.constant 0 : index
    %c0_15 = arith.constant 0 : index
    %c0_16 = arith.constant 0 : index
    %c0_17 = arith.constant 0 : index
    %30 = vector.load %arg11[%c0_14, %c0_15, %c0_16, %c0_17] : memref<2x10x10x128xbf16, #tpu.memory_space<vmem>>, vector<2x1x10x128xbf16>
    tpu.vector_store %arg11[%c0_14, %c0_15, %c0_16, %c0_17], %29 {strides = array<i32>} : memref<2x10x10x128xbf16, #tpu.memory_space<vmem>>, vector<2x1x10x128xbf16>,
    %c0_18 = arith.constant 0 : index
    %c9 = arith.constant 9 : index
    %c0_19 = arith.constant 0 : index
    %c0_20 = arith.constant 0 : index
    %31 = vector.load %arg11[%c0_18, %c9, %c0_19, %c0_20] : memref<2x10x10x128xbf16, #tpu.memory_space<vmem>>, vector<2x1x10x128xbf16>
    tpu.vector_store %arg11[%c0_18, %c9, %c0_19, %c0_20], %29 {strides = array<i32>} : memref<2x10x10x128xbf16, #tpu.memory_space<vmem>>, vector<2x1x10x128xbf16>,
    %cst_21 = arith.constant 0.000000e+00 : bf16
    %32 = vector.broadcast %cst_21 : bf16 to vector<2x8x1x128xbf16>
    %c0_22 = arith.constant 0 : index
    %c1 = arith.constant 1 : index
    %c0_23 = arith.constant 0 : index
    %c0_24 = arith.constant 0 : index
    %33 = vector.load %arg11[%c0_22, %c1, %c0_23, %c0_24] : memref<2x10x10x128xbf16, #tpu.memory_space<vmem>>, vector<2x8x1x128xbf16>
    tpu.vector_store %arg11[%c0_22, %c1, %c0_23, %c0_24], %32 {strides = array<i32>} : memref<2x10x10x128xbf16, #tpu.memory_space<vmem>>, vector<2x8x1x128xbf16>,
    %c0_25 = arith.constant 0 : index
    %c1_26 = arith.constant 1 : index
    %c9_27 = arith.constant 9 : index
    %c0_28 = arith.constant 0 : index
    %34 = vector.load %arg11[%c0_25, %c1_26, %c9_27, %c0_28] : memref<2x10x10x128xbf16, #tpu.memory_space<vmem>>, vector<2x8x1x128xbf16>
    tpu.vector_store %arg11[%c0_25, %c1_26, %c9_27, %c0_28], %32 {strides = array<i32>} : memref<2x10x10x128xbf16, #tpu.memory_space<vmem>>, vector<2x8x1x128xbf16>,
    %35 = vector.shape_cast %28 : vector<128x128xf32> to vector<2x8x8x128xf32>
    %36 = arith.truncf %35 : vector<2x8x8x128xf32> to vector<2x8x8x128xbf16>
    %c0_29 = arith.constant 0 : index
    %c1_30 = arith.constant 1 : index
    %c1_31 = arith.constant 1 : index
    %c0_32 = arith.constant 0 : index
    %37 = vector.load %arg11[%c0_29, %c1_30, %c1_31, %c0_32] : memref<2x10x10x128xbf16, #tpu.memory_space<vmem>>, vector<2x8x8x128xbf16>
    tpu.vector_store %arg11[%c0_29, %c1_30, %c1_31, %c0_32], %36 {strides = array<i32>} : memref<2x10x10x128xbf16, #tpu.memory_space<vmem>>, vector<2x8x8x128xbf16>,
    %cst_33 = arith.constant 0.000000e+00 : f32
    %38 = vector.broadcast %cst_33 : f32 to vector<128x128xf32>
    %c0_34 = arith.constant 0 : index
    %c0_35 = arith.constant 0 : index
    %c0_36 = arith.constant 0 : index
    %c0_37 = arith.constant 0 : index
    %39 = vector.load %arg11[%c0_34, %c0_35, %c0_36, %c0_37] : memref<2x10x10x128xbf16, #tpu.memory_space<vmem>>, vector<2x8x8x128xbf16>
    %40 = vector.shape_cast %39 : vector<2x8x8x128xbf16> to vector<128x128xbf16>
    %c0_38 = arith.constant 0 : index
    %c0_39 = arith.constant 0 : index
    %c0_40 = arith.constant 0 : index
    %41 = vector.load %arg2[%c0_38, %c0_39, %c0_40] : memref<9x128x128xbf16, #tpu.memory_space<vmem>>, vector<1x128x128xbf16>
    %42 = vector.shape_cast %41 : vector<1x128x128xbf16> to vector<128x128xbf16>
    %cst_41 = arith.constant dense<0.000000e+00> : vector<128x128xf32>
    %43 = tpu.matmul %40, %42, %cst_41 {dimension_numbers = #tpu.dot_dimension_numbers<[1], [0], [0], [1], [0, 0, 1, 1], [], []>} : vector<128x128xbf16>, vector<128x128xbf16>, vector<128x128xf32> -> vector<128x128xf32>
    %44 = arith.addf %38, %43 : vector<128x128xf32>
    %c0_42 = arith.constant 0 : index
    %c0_43 = arith.constant 0 : index
    %c1_44 = arith.constant 1 : index
    %c0_45 = arith.constant 0 : index
    %45 = vector.load %arg11[%c0_42, %c0_43, %c1_44, %c0_45] : memref<2x10x10x128xbf16, #tpu.memory_space<vmem>>, vector<2x8x8x128xbf16>
    %46 = vector.shape_cast %45 : vector<2x8x8x128xbf16> to vector<128x128xbf16>
    %c1_46 = arith.constant 1 : index
    %c0_47 = arith.constant 0 : index
    %c0_48 = arith.constant 0 : index
    %47 = vector.load %arg2[%c1_46, %c0_47, %c0_48] : memref<9x128x128xbf16, #tpu.memory_space<vmem>>, vector<1x128x128xbf16>
    %48 = vector.shape_cast %47 : vector<1x128x128xbf16> to vector<128x128xbf16>
    %cst_49 = arith.constant dense<0.000000e+00> : vector<128x128xf32>
    %49 = tpu.matmul %46, %48, %cst_49 {dimension_numbers = #tpu.dot_dimension_numbers<[1], [0], [0], [1], [0, 0, 1, 1], [], []>} : vector<128x128xbf16>, vector<128x128xbf16>, vector<128x128xf32> -> vector<128x128xf32>
    %50 = arith.addf %44, %49 : vector<128x128xf32>
    %c0_50 = arith.constant 0 : index
    %c0_51 = arith.constant 0 : index
    %c2 = arith.constant 2 : index
    %c0_52 = arith.constant 0 : index
    %51 = vector.load %arg11[%c0_50, %c0_51, %c2, %c0_52] : memref<2x10x10x128xbf16, #tpu.memory_space<vmem>>, vector<2x8x8x128xbf16>
    %52 = vector.shape_cast %51 : vector<2x8x8x128xbf16> to vector<128x128xbf16>
    %c2_53 = arith.constant 2 : index
    %c0_54 = arith.constant 0 : index
    %c0_55 = arith.constant 0 : index
    %53 = vector.load %arg2[%c2_53, %c0_54, %c0_55] : memref<9x128x128xbf16, #tpu.memory_space<vmem>>, vector<1x128x128xbf16>
    %54 = vector.shape_cast %53 : vector<1x128x128xbf16> to vector<128x128xbf16>
    %cst_56 = arith.constant dense<0.000000e+00> : vector<128x128xf32>
    %55 = tpu.matmul %52, %54, %cst_56 {dimension_numbers = #tpu.dot_dimension_numbers<[1], [0], [0], [1], [0, 0, 1, 1], [], []>} : vector<128x128xbf16>, vector<128x128xbf16>, vector<128x128xf32> -> vector<128x128xf32>
    %56 = arith.addf %50, %55 : vector<128x128xf32>
    %c0_57 = arith.constant 0 : index
    %c1_58 = arith.constant 1 : index
    %c0_59 = arith.constant 0 : index
    %c0_60 = arith.constant 0 : index
    %57 = vector.load %arg11[%c0_57, %c1_58, %c0_59, %c0_60] : memref<2x10x10x128xbf16, #tpu.memory_space<vmem>>, vector<2x8x8x128xbf16>
    %58 = vector.shape_cast %57 : vector<2x8x8x128xbf16> to vector<128x128xbf16>
    %c3 = arith.constant 3 : index
    %c0_61 = arith.constant 0 : index
    %c0_62 = arith.constant 0 : index
    %59 = vector.load %arg2[%c3, %c0_61, %c0_62] : memref<9x128x128xbf16, #tpu.memory_space<vmem>>, vector<1x128x128xbf16>
    %60 = vector.shape_cast %59 : vector<1x128x128xbf16> to vector<128x128xbf16>
    %cst_63 = arith.constant dense<0.000000e+00> : vector<128x128xf32>
    %61 = tpu.matmul %58, %60, %cst_63 {dimension_numbers = #tpu.dot_dimension_numbers<[1], [0], [0], [1], [0, 0, 1, 1], [], []>} : vector<128x128xbf16>, vector<128x128xbf16>, vector<128x128xf32> -> vector<128x128xf32>
    %62 = arith.addf %56, %61 : vector<128x128xf32>
    %c0_64 = arith.constant 0 : index
    %c1_65 = arith.constant 1 : index
    %c1_66 = arith.constant 1 : index
    %c0_67 = arith.constant 0 : index
    %63 = vector.load %arg11[%c0_64, %c1_65, %c1_66, %c0_67] : memref<2x10x10x128xbf16, #tpu.memory_space<vmem>>, vector<2x8x8x128xbf16>
    %64 = vector.shape_cast %63 : vector<2x8x8x128xbf16> to vector<128x128xbf16>
    %c4 = arith.constant 4 : index
    %c0_68 = arith.constant 0 : index
    %c0_69 = arith.constant 0 : index
    %65 = vector.load %arg2[%c4, %c0_68, %c0_69] : memref<9x128x128xbf16, #tpu.memory_space<vmem>>, vector<1x128x128xbf16>
    %66 = vector.shape_cast %65 : vector<1x128x128xbf16> to vector<128x128xbf16>
    %cst_70 = arith.constant dense<0.000000e+00> : vector<128x128xf32>
    %67 = tpu.matmul %64, %66, %cst_70 {dimension_numbers = #tpu.dot_dimension_numbers<[1], [0], [0], [1], [0, 0, 1, 1], [], []>} : vector<128x128xbf16>, vector<128x128xbf16>, vector<128x128xf32> -> vector<128x128xf32>
    %68 = arith.addf %62, %67 : vector<128x128xf32>
    %c0_71 = arith.constant 0 : index
    %c1_72 = arith.constant 1 : index
    %c2_73 = arith.constant 2 : index
    %c0_74 = arith.constant 0 : index
    %69 = vector.load %arg11[%c0_71, %c1_72, %c2_73, %c0_74] : memref<2x10x10x128xbf16, #tpu.memory_space<vmem>>, vector<2x8x8x128xbf16>
    %70 = vector.shape_cast %69 : vector<2x8x8x128xbf16> to vector<128x128xbf16>
    %c5 = arith.constant 5 : index
    %c0_75 = arith.constant 0 : index
    %c0_76 = arith.constant 0 : index
    %71 = vector.load %arg2[%c5, %c0_75, %c0_76] : memref<9x128x128xbf16, #tpu.memory_space<vmem>>, vector<1x128x128xbf16>
    %72 = vector.shape_cast %71 : vector<1x128x128xbf16> to vector<128x128xbf16>
    %cst_77 = arith.constant dense<0.000000e+00> : vector<128x128xf32>
    %73 = tpu.matmul %70, %72, %cst_77 {dimension_numbers = #tpu.dot_dimension_numbers<[1], [0], [0], [1], [0, 0, 1, 1], [], []>} : vector<128x128xbf16>, vector<128x128xbf16>, vector<128x128xf32> -> vector<128x128xf32>
    %74 = arith.addf %68, %73 : vector<128x128xf32>
    %c0_78 = arith.constant 0 : index
    %c2_79 = arith.constant 2 : index
    %c0_80 = arith.constant 0 : index
    %c0_81 = arith.constant 0 : index
    %75 = vector.load %arg11[%c0_78, %c2_79, %c0_80, %c0_81] : memref<2x10x10x128xbf16, #tpu.memory_space<vmem>>, vector<2x8x8x128xbf16>
    %76 = vector.shape_cast %75 : vector<2x8x8x128xbf16> to vector<128x128xbf16>
    %c6 = arith.constant 6 : index
    %c0_82 = arith.constant 0 : index
    %c0_83 = arith.constant 0 : index
    %77 = vector.load %arg2[%c6, %c0_82, %c0_83] : memref<9x128x128xbf16, #tpu.memory_space<vmem>>, vector<1x128x128xbf16>
    %78 = vector.shape_cast %77 : vector<1x128x128xbf16> to vector<128x128xbf16>
    %cst_84 = arith.constant dense<0.000000e+00> : vector<128x128xf32>
    %79 = tpu.matmul %76, %78, %cst_84 {dimension_numbers = #tpu.dot_dimension_numbers<[1], [0], [0], [1], [0, 0, 1, 1], [], []>} : vector<128x128xbf16>, vector<128x128xbf16>, vector<128x128xf32> -> vector<128x128xf32>
    %80 = arith.addf %74, %79 : vector<128x128xf32>
    %c0_85 = arith.constant 0 : index
    %c2_86 = arith.constant 2 : index
    %c1_87 = arith.constant 1 : index
    %c0_88 = arith.constant 0 : index
    %81 = vector.load %arg11[%c0_85, %c2_86, %c1_87, %c0_88] : memref<2x10x10x128xbf16, #tpu.memory_space<vmem>>, vector<2x8x8x128xbf16>
    %82 = vector.shape_cast %81 : vector<2x8x8x128xbf16> to vector<128x128xbf16>
    %c7 = arith.constant 7 : index
    %c0_89 = arith.constant 0 : index
    %c0_90 = arith.constant 0 : index
    %83 = vector.load %arg2[%c7, %c0_89, %c0_90] : memref<9x128x128xbf16, #tpu.memory_space<vmem>>, vector<1x128x128xbf16>
    %84 = vector.shape_cast %83 : vector<1x128x128xbf16> to vector<128x128xbf16>
    %cst_91 = arith.constant dense<0.000000e+00> : vector<128x128xf32>
    %85 = tpu.matmul %82, %84, %cst_91 {dimension_numbers = #tpu.dot_dimension_numbers<[1], [0], [0], [1], [0, 0, 1, 1], [], []>} : vector<128x128xbf16>, vector<128x128xbf16>, vector<128x128xf32> -> vector<128x128xf32>
    %86 = arith.addf %80, %85 : vector<128x128xf32>
    %c0_92 = arith.constant 0 : index
    %c2_93 = arith.constant 2 : index
    %c2_94 = arith.constant 2 : index
    %c0_95 = arith.constant 0 : index
    %87 = vector.load %arg11[%c0_92, %c2_93, %c2_94, %c0_95] : memref<2x10x10x128xbf16, #tpu.memory_space<vmem>>, vector<2x8x8x128xbf16>
    %88 = vector.shape_cast %87 : vector<2x8x8x128xbf16> to vector<128x128xbf16>
    %c8 = arith.constant 8 : index
    %c0_96 = arith.constant 0 : index
    %c0_97 = arith.constant 0 : index
    %89 = vector.load %arg2[%c8, %c0_96, %c0_97] : memref<9x128x128xbf16, #tpu.memory_space<vmem>>, vector<1x128x128xbf16>
    %90 = vector.shape_cast %89 : vector<1x128x128xbf16> to vector<128x128xbf16>
    %cst_98 = arith.constant dense<0.000000e+00> : vector<128x128xf32>
    %91 = tpu.matmul %88, %90, %cst_98 {dimension_numbers = #tpu.dot_dimension_numbers<[1], [0], [0], [1], [0, 0, 1, 1], [], []>} : vector<128x128xbf16>, vector<128x128xbf16>, vector<128x128xf32> -> vector<128x128xf32>
    %92 = arith.addf %86, %91 : vector<128x128xf32>
    %c0_99 = arith.constant 0 : index
    %c0_100 = arith.constant 0 : index
    %93 = vector.load %arg6[%c0_99, %c0_100] : memref<1x128xf32, #tpu.memory_space<vmem>>, vector<1x128xf32>
    %c0_101 = arith.constant 0 : index
    %c0_102 = arith.constant 0 : index
    %94 = vector.load %arg7[%c0_101, %c0_102] : memref<1x128xf32, #tpu.memory_space<vmem>>, vector<1x128xf32>
    %cst_103 = arith.constant dense<0.000000e+00> : vector<128xf32>
    %95 = vector.multi_reduction <add>, %92, %cst_103 [0] : vector<128x128xf32> to vector<128xf32>
    %96 = vector.shape_cast %95 : vector<128xf32> to vector<1x128xf32>
    %97 = arith.mulf %92, %92 : vector<128x128xf32>
    %cst_104 = arith.constant dense<0.000000e+00> : vector<128xf32>
    %98 = vector.multi_reduction <add>, %97, %cst_104 [0] : vector<128x128xf32> to vector<128xf32>
    %99 = vector.shape_cast %98 : vector<128xf32> to vector<1x128xf32>
    %cst_105 = arith.constant 7.812500e-03 : f32
    %100 = vector.broadcast %cst_105 : f32 to vector<1x128xf32>
    %101 = arith.mulf %96, %100 : vector<1x128xf32>
    %cst_106 = arith.constant 7.812500e-03 : f32
    %102 = vector.broadcast %cst_106 : f32 to vector<1x128xf32>
    %103 = arith.mulf %99, %102 : vector<1x128xf32>
    %104 = arith.mulf %101, %101 : vector<1x128xf32>
    %105 = arith.subf %103, %104 : vector<1x128xf32>
    %cst_107 = arith.constant 9.99999974E-6 : f32
    %106 = vector.broadcast %cst_107 : f32 to vector<1x128xf32>
    %107 = arith.addf %105, %106 : vector<1x128xf32>
    %108 = math.rsqrt %107 : vector<1x128xf32>
    %109 = arith.mulf %93, %108 : vector<1x128xf32>
    %110 = arith.mulf %101, %109 : vector<1x128xf32>
    %111 = arith.subf %94, %110 : vector<1x128xf32>
    %112 = vector.broadcast %109 : vector<1x128xf32> to vector<128x128xf32>
    %113 = arith.mulf %92, %112 : vector<128x128xf32>
    %114 = vector.broadcast %111 : vector<1x128xf32> to vector<128x128xf32>
    %115 = arith.addf %113, %114 : vector<128x128xf32>
    %cst_108 = arith.constant 0.000000e+00 : f32
    %116 = vector.broadcast %cst_108 : f32 to vector<128x128xf32>
    %117 = arith.maximumf %115, %116 : vector<128x128xf32>
    %118 = arith.truncf %117 : vector<128x128xf32> to vector<128x128xbf16>
    %c0_109 = arith.constant 0 : index
    %c0_110 = arith.constant 0 : index
    %119 = vector.load %arg3[%c0_109, %c0_110] : memref<16x128xbf16, #tpu.memory_space<vmem>>, vector<16x128xbf16>
    %cst_111 = arith.constant dense<0.000000e+00> : vector<16x128xf32>
    %120 = tpu.matmul %119, %118, %cst_111 {dimension_numbers = #tpu.dot_dimension_numbers<[1], [1], [0], [0], [0, 0, 1, 0], [], []>} : vector<16x128xbf16>, vector<128x128xbf16>, vector<16x128xf32> -> vector<16x128xf32>
    %c0_112 = arith.constant 0 : index
    %c0_113 = arith.constant 0 : index
    %121 = vector.load %arg8[%c0_112, %c0_113] : memref<16x1xf32, #tpu.memory_space<vmem>>, vector<16x1xf32>
    %c0_114 = arith.constant 0 : index
    %c0_115 = arith.constant 0 : index
    %122 = vector.load %arg9[%c0_114, %c0_115] : memref<16x1xf32, #tpu.memory_space<vmem>>, vector<16x1xf32>
    %cst_116 = arith.constant dense<0.000000e+00> : vector<16xf32>
    %123 = vector.multi_reduction <add>, %120, %cst_116 [1] : vector<16x128xf32> to vector<16xf32>
    %124 = vector.shape_cast %123 : vector<16xf32> to vector<16x1xf32>
    %125 = arith.mulf %120, %120 : vector<16x128xf32>
    %cst_117 = arith.constant dense<0.000000e+00> : vector<16xf32>
    %126 = vector.multi_reduction <add>, %125, %cst_117 [1] : vector<16x128xf32> to vector<16xf32>
    %127 = vector.shape_cast %126 : vector<16xf32> to vector<16x1xf32>
    %cst_118 = arith.constant 7.812500e-03 : f32
    %128 = vector.broadcast %cst_118 : f32 to vector<16x1xf32>
    %129 = arith.mulf %124, %128 : vector<16x1xf32>
    %cst_119 = arith.constant 7.812500e-03 : f32
    %130 = vector.broadcast %cst_119 : f32 to vector<16x1xf32>
    %131 = arith.mulf %127, %130 : vector<16x1xf32>
    %132 = arith.mulf %129, %129 : vector<16x1xf32>
    %133 = arith.subf %131, %132 : vector<16x1xf32>
    %cst_120 = arith.constant 9.99999974E-6 : f32
    %134 = vector.broadcast %cst_120 : f32 to vector<16x1xf32>
    %135 = arith.addf %133, %134 : vector<16x1xf32>
    %136 = math.rsqrt %135 : vector<16x1xf32>
    %137 = arith.mulf %121, %136 : vector<16x1xf32>
    %138 = arith.mulf %129, %137 : vector<16x1xf32>
    %139 = arith.subf %122, %138 : vector<16x1xf32>
    %140 = vector.broadcast %137 : vector<16x1xf32> to vector<16x128xf32>
    %141 = arith.mulf %120, %140 : vector<16x128xf32>
    %142 = vector.broadcast %139 : vector<16x1xf32> to vector<16x128xf32>
    %143 = arith.addf %141, %142 : vector<16x128xf32>
    %c0_121 = arith.constant 0 : index
    %c0_122 = arith.constant 0 : index
    %144 = vector.load %arg0[%c0_121, %c0_122] : memref<16x128xf32, #tpu.memory_space<vmem>>, vector<16x128xf32>
    %145 = arith.addf %143, %144 : vector<16x128xf32>
    %cst_123 = arith.constant 0.000000e+00 : f32
    %146 = vector.broadcast %cst_123 : f32 to vector<16x128xf32>
    %147 = arith.maximumf %145, %146 : vector<16x128xf32>
    %c0_124 = arith.constant 0 : index
    %c0_125 = arith.constant 0 : index
    %148 = vector.load %arg10[%c0_124, %c0_125] : memref<16x128xf32, #tpu.memory_space<vmem>>, vector<16x128xf32>
    tpu.vector_store %arg10[%c0_124, %c0_125], %147 {strides = array<i32>} : memref<16x128xf32, #tpu.memory_space<vmem>>, vector<16x128xf32>,
    return
  }
}

</mosaic_0001>

<bundles_post_ra>
// kernel: tpu_custom_call.1
= control target key start
LH: loop header
LB: loop body
LE: loop exit
PB: predicated region body
PF: predicated region fallthrough
CT: control target
= control target key end

     0   :  { %15 = vsyncpa [#allocation4], 0  ;;  %s6214_s0 = inlined_call_operand.vmem [shape: f32[16,128], index: 0, kind: input, shape index: {}]   ;;  %s6215_s1 = inlined_call_operand.vmem [shape: bf16[16,128], index: 1, kind: input, shape index: {}]   ;;  %s6216_s2 = inlined_call_operand.hbm [shape: bf16[9,128,128], index: 2, kind: input, shape index: {}]   ;;  %s6217_s3 = inlined_call_operand.vmem [shape: bf16[16,128], index: 3, kind: input, shape index: {}]   ;;  %s6218_s4 = inlined_call_operand.vmem [shape: f32[1,128], index: 4, kind: input, shape index: {}]   ;;  %s6219_s5 = inlined_call_operand.vmem [shape: f32[1,128], index: 5, kind: input, shape index: {}]   ;;  %s6220_s6 = inlined_call_operand.vmem [shape: f32[1,128], index: 6, kind: input, shape index: {}]   ;;  %s6221_s7 = inlined_call_operand.vmem [shape: f32[1,128], index: 7, kind: input, shape index: {}]   ;;  %s6222_s8 = inlined_call_operand.vmem [shape: f32[16,1], index: 8, kind: input, shape index: {}]   ;;  %s6223_s9 = inlined_call_operand.vmem [shape: f32[16,1], index: 9, kind: input, shape index: {}]   ;;  %s6224_s10 = inlined_call_operand.hbm [shape: f32[16,128], index: 10, kind: output, shape index: {}]  }
   0x1   :  { %16 = vsyncpa [#allocation5], 0  ;;  %s5112_s13 = smov [#allocation3]   ;;  %s5064_s17 = scalar_lea.hbm %s6216_s2, 9216 }
   0x2   :  { %s26_s14 = sshll.u32 %s5112_s13, 4  ;;  %p5065_p0 = scmp.ne.s32.totalorder %s6216_s2, %s5064_s17  ;;  %s27_s14 = int_to_ptr.vmem [resolvable:$true] %s26_s14 }
   0x3   :  { %p5068_p1 = scmp.lt.u32.totalorder %s5064_s17, %s6216_s2 }
   0x5   :  { %p5070_p2 = pnand %p5068_p1, %p5065_p0 }
   0x7   :  { %5073 = shalt.err (!%p5070_p2)
}
   0x8   :  { %s5074_s22 = scalar_lea.vmem %s27_s14, 9216  ;;  %p5079_p4 = scmp.lt.s32.totalorder %s27_s14, %s27_s14 }
   0x9   :  { %p5075_p3 = scmp.ne.s32.totalorder %s27_s14, %s5074_s22  ;;  %p5080_p5 = scmp.lt.s32.totalorder %s5074_s22, %s5074_s22 }
   0xb   :  { %p5081_p6 = por %p5080_p5, %p5079_p4 }
   0xd   :  { %p5082_p7 = pnand %p5081_p6, %p5075_p3 }
   0xf   :  { %5085 = shalt.err (!%p5082_p7)
}
  0x10   :  { %s5113_s23 = smov 64   ;;  %s5114_s24 = smov 4  }
  0x11   :  { %32 = dma.hbm_to_vmem [thread:$0]  %s6216_s2, 9216, %s27_s14, [#allocation4], %s5113_s23, %s5113_s23, %s5114_s24  }
  0x12   :  { %5108 = dma.done.wait [#allocation4], 9216  }
  0x13   :  { %5109 = vsyncadd [#allocation4], 4294958080  ;;  %v51_v0 = vld [vmem:[%s6214_s0] sm:$0xff]  ;;  %v52_v1 = vld [vmem:[%s6214_s0 + $0x8] sm:$0xff]  ;;  %vm78_vm0 = vcmask 130048   ;;  %vm339_vm1 = vcmask 1040384  }
  0x14   :  { %v53_v2 = vpack.c.bf16 %v52_v1, %v51_v0  ;;  %v4938_v3 = vld [vmem:[%s6215_s1] sm:$0xff]   ;;  %vm340_vm2 = vsmask.f32 256  ;;  %vm390_vm3 = vsmask.f32 7938  ;;  %v4941_v19 = vld [vmem:[#allocation3 + $0x108] sm:$0xff]  }
  0x15   :  { %4473 = vmatprep.subr.bf16.mxu1 %v4938_v3  ;;  %v4939_v12 = vld [vmem:[#allocation3 + $0x100] sm:$0xff]   ;;  %vm5205_vm4 = vmand %vm339_vm1, %vm340_vm2  ;;  %v4942_v20 = vld [vmem:[#allocation3 + $0x48] sm:$0xff]   ;;  %v5115_v40 = vmov 0   ;;  %vm810_vm6 = vsmask.f32 3328  ;;  %vm664_vm9 = vcmask 1043456  }
  0x16   :  { %56 = vxpose.xlu0.c.b16.start.end [1/1] (short) %v53_v2, 128  ;;  %4474 = vmatpush3.bf16.msra.mxu1 %v4938_v3  ;;  %v4940_v13 = vld [vmem:[#allocation3 + $0x40] sm:$0xff]   ;;  %vm5212_vm5 = vmand %vm339_vm1, %vm390_vm3  ;;  %v342_v22 = vld [vmem:[#allocation2 + $0x8] sm:$0x1]  ;;  %329 = vst [vmem:[#allocation2] sm:$0xf] %v5115_v40  ;;  %vm1472_vm11 = vcmask 1042432  }
  0x17   :  { %4619 = vmatprep.subr.bf16.mxu1 %v4939_v12  ;;  %4491 = vmatprep.subr.bf16.mxu0 %v4940_v13  ;;  %v381_v15 = vld [vmem:[#allocation2 + $0x80] sm:$0x1]  ;;  %v431_v16 = vld [vmem:[#allocation2 + $0x84] sm:$0x1]  ;;  %v392_v23 = vld [vmem:[#allocation2 + $0xc] sm:$0x1] }
  0x18   :  { %4492 = vmatpush3.bf16.msra.mxu0 %v4940_v13  ;;  %v382_v17 = vsel %vm5205_vm4, 0, %v381_v15  ;;  %v432_v21 = vsel %vm5212_vm5, 0, %v431_v16  ;;  %v343_v24 = vsel %vm5205_vm4, 0, %v342_v22  ;;  %v393_v25 = vsel %vm5212_vm5, 0, %v392_v23  ;;  %v345_v26 = vld [vmem:[#allocation2 + $0x10] sm:$0x1]  ;;  %4936 = vset.pattern.permute.xlu1 %v5115_v40  ;;  %vm5439_vm10 = vmand %vm664_vm9, %vm390_vm3 }
  0x19   :  { %383 = vst [vmem:[#allocation2 + $0x80] sm:$0x1] %v382_v17  ;;  %433 = vst [vmem:[#allocation2 + $0x84] sm:$0x1] %v432_v21  ;;  %4493 = vmatprep.subr.bf16.mxu0 %v4942_v20  ;;  %v395_v27 = vld [vmem:[#allocation2 + $0x14] sm:$0x1] }
  0x1a   :  { %344 = vst [vmem:[#allocation2 + $0x8] sm:$0x1] %v343_v24  ;;  %394 = vst [vmem:[#allocation2 + $0xc] sm:$0x1] %v393_v25  ;;  %v346_v28 = vsel %vm5205_vm4, 0, %v345_v26  ;;  %v396_v29 = vsel %vm5212_vm5, 0, %v395_v27 }
  0x1b   :  { %v348_v30 = vld [vmem:[#allocation2 + $0x18] sm:$0x1]  ;;  %v398_v31 = vld [vmem:[#allocation2 + $0x1c] sm:$0x1]  ;;  %v4943_v32 = vld [vmem:[#allocation3 + $0x110] sm:$0xff]   ;;  %vm1473_vm12 = vcmask 1046532  }
  0x1c   :  { %4494 = vmatpush3.bf16.msra.mxu0 %v4942_v20  ;;  %v4944_v33 = vld [vmem:[#allocation3 + $0x50] sm:$0xff]   ;;  %347 = vst [vmem:[#allocation2 + $0x10] sm:$0x1] %v346_v28  ;;  %397 = vst [vmem:[#allocation2 + $0x14] sm:$0x1] %v396_v29  ;;  %v349_v34 = vsel %vm5205_vm4, 0, %v348_v30 }
  0x1d   :  { %v399_v35 = vsel %vm5212_vm5, 0, %v398_v31  ;;  %350 = vst [vmem:[#allocation2 + $0x18] sm:$0x1] %v349_v34  ;;  %4495 = vmatprep.subr.bf16.mxu0 %v4944_v33  ;;  %v4945_v36 = vld [vmem:[#allocation3 + $0x118] sm:$0xff]   ;;  %v4947_v38 = vld [vmem:[#allocation3 + $0x120] sm:$0xff]   ;;  %v4949_v41 = vld [vmem:[#allocation3 + $0x128] sm:$0xff]  }
  0x1e   :  { %400 = vst [vmem:[#allocation2 + $0x1c] sm:$0x1] %v399_v35  ;;  %v4946_v37 = vld [vmem:[#allocation3 + $0x58] sm:$0xff]   ;;  %v4948_v39 = vld [vmem:[#allocation3 + $0x60] sm:$0xff]   ;;  %330 = vst [vmem:[#allocation2 + $0x4] sm:$0x1] %v5115_v40 }
  0x1f   :  { %331 = vst [vmem:[#allocation2 + $0x50] sm:$0xf] %v5115_v40  ;;  %332 = vst [vmem:[#allocation2 + $0x54] sm:$0x1] %v5115_v40  ;;  %v4950_v42 = vld [vmem:[#allocation3 + $0x68] sm:$0xff]   ;;  %4937 = vset.pattern.permute.xlu0 %v5115_v40  ;;  %v4951_v47 = vld [vmem:[#allocation3 + $0x130] sm:$0xff]  }
  0x20   :  { %4496 = vmatpush3.bf16.msra.mxu0 %v4944_v33  ;;  %334 = vst [vmem:[#allocation2 + $0x48] sm:$0xf] %v5115_v40  ;;  %335 = vst [vmem:[#allocation2 + $0x4c] sm:$0x1] %v5115_v40  ;;  %v351_v43 = vld [vmem:[#allocation2 + $0x20] sm:$0x1] }
  0x21   :  { %336 = vst [vmem:[#allocation2 + $0x98] sm:$0xf] %v5115_v40  ;;  %337 = vst [vmem:[#allocation2 + $0x9c] sm:$0x1] %v5115_v40  ;;  %4497 = vmatprep.subr.bf16.mxu0 %v4946_v37  ;;  %v352_v44 = vsel %vm5205_vm4, 0, %v351_v43  ;;  %v4952_v51 = vld [vmem:[#allocation3 + $0x70] sm:$0xff]  }
  0x22   :  { %v401_v45 = vld [vmem:[#allocation2 + $0x24] sm:$0x1]  ;;  %v354_v46 = vld [vmem:[#allocation2 + $0x28] sm:$0x1]  ;;  %353 = vst [vmem:[#allocation2 + $0x20] sm:$0x1] %v352_v44  ;;  %vm5743_vm13 = vmor %vm1472_vm11, %vm1473_vm12 }
  0x23   :  { %v402_v48 = vsel %vm5212_vm5, 0, %v401_v45  ;;  %v355_v49 = vsel %vm5205_vm4, 0, %v354_v46  ;;  %v404_v50 = vld [vmem:[#allocation2 + $0x2c] sm:$0x1]  ;;  %v357_v53 = vld [vmem:[#allocation2 + $0x30] sm:$0x1] }
  0x24   :  { %4498 = vmatpush3.bf16.msra.mxu0 %v4946_v37  ;;  %403 = vst [vmem:[#allocation2 + $0x24] sm:$0x1] %v402_v48  ;;  %356 = vst [vmem:[#allocation2 + $0x28] sm:$0x1] %v355_v49  ;;  %v405_v52 = vsel %vm5212_vm5, 0, %v404_v50  ;;  %v4953_v55 = vld [vmem:[#allocation3 + $0x138] sm:$0xff]  }
  0x25   :  { %4499 = vmatprep.subr.bf16.mxu0 %v4948_v39  ;;  %v407_v54 = vld [vmem:[#allocation2 + $0x34] sm:$0x1]  ;;  %406 = vst [vmem:[#allocation2 + $0x2c] sm:$0x1] %v405_v52  ;;  %v358_v56 = vsel %vm5205_vm4, 0, %v357_v53  ;;  %v4954_v57 = vld [vmem:[#allocation3 + $0x78] sm:$0xff]  }
  0x26   :  { %359 = vst [vmem:[#allocation2 + $0x30] sm:$0x1] %v358_v56  ;;  %v408_v58 = vsel %vm5212_vm5, 0, %v407_v54  ;;  %v360_v59 = vld [vmem:[#allocation2 + $0x38] sm:$0x1]  ;;  %v5246_v63 = vld [vmem:[#allocation3 + $0x140] sm:$0xff]  }
  0x27   :  { %409 = vst [vmem:[#allocation2 + $0x34] sm:$0x1] %v408_v58  ;;  %v410_v60 = vld [vmem:[#allocation2 + $0x3c] sm:$0x1]  ;;  %v361_v61 = vsel %vm5205_vm4, 0, %v360_v59  ;;  %vm5117_vm14 = vmmov 0  }
  0x28   :  { %4500 = vmatpush3.bf16.msra.mxu0 %v4948_v39  ;;  %362 = vst [vmem:[#allocation2 + $0x38] sm:$0x1] %v361_v61  ;;  %v411_v62 = vsel %vm5212_vm5, 0, %v410_v60  ;;  %v363_v0 = vld [vmem:[#allocation2 + $0x40] sm:$0x1] }
  0x29   :  { %4501 = vmatprep.subr.bf16.mxu0 %v4950_v42  ;;  %412 = vst [vmem:[#allocation2 + $0x3c] sm:$0x1] %v411_v62  ;;  %v413_v1 = vld [vmem:[#allocation2 + $0x44] sm:$0x1]  ;;  %v364_v2 = vsel %vm5205_vm4, 0, %v363_v0 }
  0x2a   :  { %v414_v3 = vsel %vm5212_vm5, 0, %v413_v1  ;;  %365 = vst [vmem:[#allocation2 + $0x40] sm:$0x1] %v364_v2  ;;  %v419_v13 = vld [vmem:[#allocation2 + $0x64] sm:$0x1] }
  0x2b   :  { %415 = vst [vmem:[#allocation2 + $0x44] sm:$0x1] %v414_v3  ;;  %v420_v17 = vsel %vm5212_vm5, 0, %v419_v13  ;;  %v422_v24 = vld [vmem:[#allocation2 + $0x6c] sm:$0x1] }
  0x2c   :  { %4502 = vmatpush3.bf16.msra.mxu0 %v4950_v42  ;;  %421 = vst [vmem:[#allocation2 + $0x64] sm:$0x1] %v420_v17  ;;  %v423_v25 = vsel %vm5212_vm5, 0, %v422_v24  ;;  %v375_v33 = vld [vmem:[#allocation2 + $0x70] sm:$0x1] }
  0x2d   :  { %4503 = vmatprep.subr.bf16.mxu0 %v4952_v51  ;;  %424 = vst [vmem:[#allocation2 + $0x6c] sm:$0x1] %v423_v25  ;;  %v425_v34 = vld [vmem:[#allocation2 + $0x74] sm:$0x1]  ;;  %v428_v48 = vld [vmem:[#allocation2 + $0x7c] sm:$0x1] }
  0x2e   :  { %v426_v37 = vsel %vm5212_vm5, 0, %v425_v34  ;;  %v429_v52 = vsel %vm5212_vm5, 0, %v428_v48  ;;  %vm811_vm7 = vsmask.f32 7440 }
  0x2f   :  { %427 = vst [vmem:[#allocation2 + $0x74] sm:$0x1] %v426_v37  ;;  %430 = vst [vmem:[#allocation2 + $0x7c] sm:$0x1] %v429_v52  ;;  %v387_v52 = vld [vmem:[#allocation2 + $0x90] sm:$0x1] }
  0x30   :  { %4504 = vmatpush3.bf16.msra.mxu0 %v4952_v51  ;;  %vm5376_vm8 = vmor %vm810_vm6, %vm811_vm7 }
  0x31   :  { %4505 = vmatprep.subr.bf16.mxu0 %v4954_v57 }
  0x34   :  { %4506 = vmatpush3.bf16.msra.mxu0 %v4954_v57 }
  0x7c   :  { %v64_v4 = vpop.trf.xlu0 }
  0x7d   :  { %4475 = vmatprep.mubr.msk.bf16.mxu1 %vm78_vm0, %v64_v4  ;;  %v5253_v4 = vld [vmem:[#allocation3] sm:$0xff]  }
  0x7e   :  { %4523 = vmatprep.subr.bf16.mxu0 %v5253_v4 }
  0x80   :  { %v65_v5 = vpop.trf.xlu0 }
  0x81   :  { %4476 = vmatmul.mubr.msk.bf16.vlgmr.msra.gmra.mrb[0].mxu1 %vm78_vm0, %v65_v5  ;;  %v366_v5 = vld [vmem:[#allocation2 + $0x58] sm:$0x1] }
  0x82   :  { %4620 = vmatpush3.bf16.msra.mxu1 %v4939_v12  ;;  %v369_v12 = vld [vmem:[#allocation2 + $0x60] sm:$0x1] }
  0x83   :  { %4621 = vmatprep.subr.bf16.mxu1 %v4941_v19  ;;  %v370_v16 = vsel %vm5205_vm4, 0, %v369_v12 }
  0x84   :  { %v66_v6 = vpop.trf.xlu0  ;;  %371 = vst [vmem:[#allocation2 + $0x60] sm:$0x1] %v370_v16 }
  0x85   :  { %4479 = vmatprep.mubr.msk.bf16.mxu1 %vm78_vm0, %v66_v6  ;;  %v416_v6 = vld [vmem:[#allocation2 + $0x5c] sm:$0x1] }
  0x86   :  { %4622 = vmatpush3.bf16.msra.mxu1 %v4941_v19  ;;  %v372_v19 = vld [vmem:[#allocation2 + $0x68] sm:$0x1] }
  0x87   :  { %4623 = vmatprep.subr.bf16.mxu1 %v4943_v32  ;;  %v373_v23 = vsel %vm5205_vm4, 0, %v372_v19 }
  0x88   :  { %v67_v7 = vpop.trf.xlu0  ;;  %374 = vst [vmem:[#allocation2 + $0x68] sm:$0x1] %v373_v23 }
  0x89   :  { %4480 = vmatmul.mubr.msk.bf16.gmra.mrb[4].mxu1 %vm78_vm0, %v67_v7  ;;  %v367_v7 = vsel %vm5205_vm4, 0, %v366_v5 }
  0x8a   :  { %4624 = vmatpush3.bf16.msra.mxu1 %v4943_v32  ;;  %368 = vst [vmem:[#allocation2 + $0x58] sm:$0x1] %v367_v7 }
  0x8b   :  { %4625 = vmatprep.subr.bf16.mxu1 %v4945_v36 }
  0x8c   :  { %v68_v8 = vpop.trf.xlu0 }
  0x8d   :  { %4483 = vmatprep.mubr.msk.bf16.mxu1 %vm78_vm0, %v68_v8  ;;  %v417_v8 = vsel %vm5212_vm5, 0, %v416_v6 }
  0x8e   :  { %4626 = vmatpush3.bf16.msra.mxu1 %v4945_v36  ;;  %418 = vst [vmem:[#allocation2 + $0x5c] sm:$0x1] %v417_v8  ;;  %v376_v36 = vsel %vm5205_vm4, 0, %v375_v33 }
  0x8f   :  { %4627 = vmatprep.subr.bf16.mxu1 %v4947_v38  ;;  %377 = vst [vmem:[#allocation2 + $0x70] sm:$0x1] %v376_v36 }
  0x90   :  { %v69_v9 = vpop.trf.xlu0 }
  0x91   :  { %4484 = vmatmul.mubr.msk.bf16.gmra.mrb[8].mxu1 %vm78_vm0, %v69_v9 }
  0x92   :  { %4628 = vmatpush3.bf16.msra.mxu1 %v4947_v38 }
  0x93   :  { %4629 = vmatprep.subr.bf16.mxu1 %v4949_v41 }
  0x94   :  { %v70_v10 = vpop.trf.xlu0 }
  0x95   :  { %4487 = vmatprep.mubr.msk.bf16.mxu1 %vm78_vm0, %v70_v10 }
  0x96   :  { %4630 = vmatpush3.bf16.msra.mxu1 %v4949_v41 }
  0x97   :  { %4631 = vmatprep.subr.bf16.mxu1 %v4951_v47 }
  0x98   :  { %v71_v11 = vpop.trf.xlu0 }
  0x99   :  { %4488 = vmatmul.mubr.msk.bf16.gmra.mrb[12].mxu1 %vm78_vm0, %v71_v11 }
  0x9a   :  { %4632 = vmatpush3.bf16.msra.mxu1 %v4951_v47  ;;  %v378_v47 = vld [vmem:[#allocation2 + $0x78] sm:$0x1] }
  0x9b   :  { %4633 = vmatprep.subr.bf16.mxu1 %v4953_v55  ;;  %v379_v51 = vsel %vm5205_vm4, 0, %v378_v47 }
  0x9c   :  { %380 = vst [vmem:[#allocation2 + $0x78] sm:$0x1] %v379_v51 }
  0x9e   :  { %4634 = vmatpush3.bf16.msra.mxu1 %v4953_v55 }
  0x9f   :  { %4651 = vmatprep.subr.bf16.mxu1 %v5246_v63 }
 0x154   :  { %v5260_v9 = vpop.f32.mrb[0].mxu1 }
 0x155   :  { %v5262_v10 = vpop.f32.mrb[1].mxu1  ;;  %v225_v26 = vmul.f32 %v5260_v9, %v5260_v9 }
 0x156   :  { %v5264_v11 = vpop.f32.mrb[2].mxu1  ;;  %v223_v20 = vmul.f32 %v5262_v10, %v5262_v10 }
 0x157   :  { %v5266_v15 = vpop.f32.mrb[3].mxu1  ;;  %v226_v29 = vmul.f32 %v5264_v11, %v5264_v11 }
 0x158   :  { %v202_v21 = vadd.f32 %v5266_v15, %v5262_v10  ;;  %v224_v22 = vmul.f32 %v5266_v15, %v5266_v15 }
 0x15a   :  { %v203_v27 = vadd.f32 %v5260_v9, %v202_v21  ;;  %v239_v28 = vadd.f32 %v224_v22, %v223_v20 }
 0x15c   :  { %v240_v30 = vadd.f32 %v239_v28, %v225_v26  ;;  %v5287_v31 = vpop.f32.mrb[4].mxu1  ;;  %v204_v32 = vadd.f32 %v5264_v11, %v203_v27 }
 0x15d   :  { %v5290_v35 = vpop.f32.mrb[5].mxu1  ;;  %v229_v46 = vmul.f32 %v5287_v31, %v5287_v31 }
 0x15e   :  { %v205_v38 = vadd.f32 %v204_v32, %v5290_v35  ;;  %v227_v39 = vmul.f32 %v5290_v35, %v5290_v35  ;;  %v241_v40 = vadd.f32 %v240_v30, %v226_v29  ;;  %v5299_v41 = vpop.f32.mrb[6].mxu1 }
 0x15f   :  { %v5301_v42 = vpop.f32.mrb[7].mxu1  ;;  %v230_v53 = vmul.f32 %v5299_v41, %v5299_v41 }
 0x160   :  { %v242_v43 = vadd.f32 %v241_v40, %v227_v39  ;;  %v206_v44 = vadd.f32 %v205_v38, %v5301_v42  ;;  %v228_v45 = vmul.f32 %v5301_v42, %v5301_v42 }
 0x162   :  { %v207_v49 = vadd.f32 %v5287_v31, %v206_v44  ;;  %v243_v50 = vadd.f32 %v242_v43, %v228_v45  ;;  %v384_v44 = vld [vmem:[#allocation2 + $0x88] sm:$0x1]  ;;  %v434_v45 = vld [vmem:[#allocation2 + $0x8c] sm:$0x1] }
 0x163   :  { %v435_v47 = vsel %vm5212_vm5, 0, %v434_v45 }
 0x164   :  { %v244_v54 = vadd.f32 %v243_v50, %v229_v46  ;;  %v5315_v55 = vpop.f32.mrb[8].mxu1  ;;  %v208_v56 = vadd.f32 %v5299_v41, %v207_v49  ;;  %v385_v46 = vsel %vm5205_vm4, 0, %v384_v44  ;;  %436 = vst [vmem:[#allocation2 + $0x8c] sm:$0x1] %v435_v47 }
 0x165   :  { %v5318_v57 = vpop.f32.mrb[9].mxu1  ;;  %v233_v3 = vmul.f32 %v5315_v55, %v5315_v55  ;;  %386 = vst [vmem:[#allocation2 + $0x88] sm:$0x1] %v385_v46 }
 0x166   :  { %v209_v58 = vadd.f32 %v208_v56, %v5318_v57  ;;  %v231_v59 = vmul.f32 %v5318_v57, %v5318_v57  ;;  %v245_v60 = vadd.f32 %v244_v54, %v230_v53  ;;  %v5323_v61 = vpop.f32.mrb[10].mxu1  ;;  %v437_v53 = vld [vmem:[#allocation2 + $0x94] sm:$0x1] }
 0x167   :  { %v5325_v62 = vpop.f32.mrb[11].mxu1  ;;  %v234_v7 = vmul.f32 %v5323_v61, %v5323_v61 }
 0x168   :  { %v246_v0 = vadd.f32 %v245_v60, %v231_v59  ;;  %v210_v1 = vadd.f32 %v209_v58, %v5325_v62  ;;  %v232_v2 = vmul.f32 %v5325_v62, %v5325_v62  ;;  %v388_v58 = vsel %vm5205_vm4, 0, %v387_v52 }
 0x169   :  { %v438_v59 = vsel %vm5212_vm5, 0, %v437_v53  ;;  %389 = vst [vmem:[#allocation2 + $0x90] sm:$0x1] %v388_v58 }
 0x16a   :  { %v211_v5 = vadd.f32 %v5315_v55, %v210_v1  ;;  %v247_v6 = vadd.f32 %v246_v0, %v232_v2  ;;  %439 = vst [vmem:[#allocation2 + $0x94] sm:$0x1] %v438_v59  ;;  %v762_v2 = vld [vmem:[#allocation2] sm:$0xf] }
 0x16c   :  { %v248_v8 = vadd.f32 %v247_v6, %v233_v3  ;;  %v5335_v12 = vpop.f32.mrb[12].mxu1  ;;  %v212_v13 = vadd.f32 %v5323_v61, %v211_v5  ;;  %v814_v5 = vshrl.u32 %v762_v2, 16  ;;  %v817_v6 = vshll.u32 %v762_v2, 16 }
 0x16d   :  { %v5338_v16 = vpop.f32.mrb[13].mxu1  ;;  %v237_v26 = vmul.f32 %v5335_v12, %v5335_v12 }
 0x16e   :  { %v213_v17 = vadd.f32 %v212_v13, %v5338_v16  ;;  %v235_v19 = vmul.f32 %v5338_v16, %v5338_v16  ;;  %v249_v20 = vadd.f32 %v248_v8, %v234_v7  ;;  %v5343_v21 = vpop.f32.mrb[14].mxu1  ;;  %v270_v7 = vlaneseq  ;;  %v770_v8 = vld [vmem:[#allocation2 + $0x50] sm:$0xf] }
 0x16f   :  { %v5345_v22 = vpop.f32.mrb[15].mxu1  ;;  %v238_v29 = vmul.f32 %v5343_v21, %v5343_v21  ;;  %v816_v13 = vrot.slane %v814_v5, 4 }
 0x170   :  { %v250_v23 = vadd.f32 %v249_v20, %v235_v19  ;;  %v214_v24 = vadd.f32 %v213_v17, %v5345_v22  ;;  %v236_v25 = vmul.f32 %v5345_v22, %v5345_v22  ;;  %v819_v17 = vrot.slane %v817_v6, 5 }
 0x171   :  { %v926_v19 = vshrl.u32 %v770_v8, 16  ;;  %v929_v20 = vshll.u32 %v770_v8, 16 }
 0x172   :  { %v215_v27 = vadd.f32 %v5335_v12, %v214_v24  ;;  %v251_v28 = vadd.f32 %v250_v23, %v236_v25  ;;  %v271_v23 = vshrl.u32 %v270_v7, 7  ;;  %v794_v24 = vld [vmem:[#allocation2 + $0x4] sm:$0x1]  ;;  %v820_v18 = vor.u32 %v819_v17, %v816_v13 }
 0x173   :  { %v823_v25 = vshll.u32 %v794_v24, 16 }
 0x174   :  { %v216_v30 = vadd.f32 %v5343_v21, %v215_v27  ;;  %v252_v32 = vadd.f32 %v251_v28, %v237_v26  ;;  %v200_v26 = vld [vmem:[%s6218_s4] sm:$0x1]  ;;  %v928_v27 = vrot.slane %v926_v19, 4  ;;  %v931_v28 = vrot.slane %v929_v20, 5 }
 0x176   :  { %v217_v33 = vrot.slane %v216_v30, 4  ;;  %v253_v34 = vadd.f32 %v252_v32, %v238_v29  ;;  %v5367_v29 = vsub.s32 0, %v271_v23 }
 0x178   :  { %v218_v36 = vadd.f32 %v217_v33, %v216_v30  ;;  %v254_v37 = vrot.slane %v253_v34, 4  ;;  %6232 = vst [vmem:[#allocation9_spill] sm:$0xff] %v5367_v29  ;;  %v5369_v33 = vrot.slane %v820_v18, 4 }
 0x17a   :  { %v219_v38 = vrot.slane %v218_v36, 2  ;;  %v255_v39 = vadd.f32 %v254_v37, %v253_v34  ;;  %v5371_v34 = vrot.slane %v823_v25, 5 }
 0x17c   :  { %v220_v40 = vadd.f32 %v219_v38, %v218_v36  ;;  %v256_v43 = vrot.slane %v255_v39, 2  ;;  %v201_v36 = vld [vmem:[%s6219_s5] sm:$0x1]  ;;  %v932_v38 = vor.u32 %v931_v28, %v928_v27  ;;  %v826_v45 = vsel %vm5376_vm8, %v5369_v33, %v5371_v34 }
 0x17d   :  { %v744_v28 = vld [vmem:[#allocation2 + $0x80] sm:$0xf] }
 0x17e   :  { %v221_v48 = vrot.slane %v220_v40, 1  ;;  %v257_v49 = vadd.f32 %v256_v43, %v255_v39  ;;  %v5383_v43 = vld [vmem:[#allocation2 + $0x54] sm:$0x1] }
 0x17f   :  { %v935_v46 = vshll.u32 %v5383_v43, 16 }
 0x180   :  { %v222_v50 = vadd.f32 %v221_v48, %v220_v40  ;;  %v258_v51 = vrot.slane %v257_v49, 1 }
 0x182   :  { %v259_v54 = vadd.f32 %v258_v51, %v257_v49  ;;  %v260_v56 = vmul.f32 0.0078125, %v222_v50  ;;  %v5396_v50 = vrot.slane %v932_v38, 4 }
 0x184   :  { %v261_v60 = vmul.f32 0.0078125, %v259_v54  ;;  %v262_v0 = vmul.f32 %v260_v56, %v260_v56 }
 0x186   :  { %v263_v1 = vsub.f32 %v261_v60, %v262_v0 }
 0x188   :  { %v264_v3 = vadd.f32 1e-05, %v263_v1 }
 0x18a   :  { %5036 = vrsqrt.f32 %v264_v3 }
 0x194   :  { %v5037_v30 = vpop.eup %5036 }
 0x195   :  { %v266_v32 = vmul.f32 %v5037_v30, %v200_v26  ;;  %v747_v30 = vld [vmem:[#allocation2 + $0x84] sm:$0x1] }
 0x197   :  { %v267_v39 = vmul.f32 %v266_v32, %v260_v56  ;;  %v5381_v40 = vrot.slane %v266_v32, %v5367_v29  ;;  %v666_v32 = vld [vmem:[#allocation2 + $0x8] sm:$0xf] }
 0x199   :  { %v268_v44 = vsub.f32 %v201_v36, %v267_v39  ;;  %v288_v47 = vmul.f32 %v5381_v40, %v5345_v22  ;;  %v275_v48 = vmul.f32 %v5381_v40, %v5262_v10  ;;  %v276_v49 = vmul.f32 %v5381_v40, %v5266_v15  ;;  %v669_v36 = vld [vmem:[#allocation2 + $0xc] sm:$0x1] }
 0x19a   :  { %v277_v52 = vmul.f32 %v5260_v9, %v5381_v40  ;;  %v278_v53 = vmul.f32 %v5264_v11, %v5381_v40  ;;  %v279_v22 = vmul.f32 %v5381_v40, %v5290_v35  ;;  %v280_v10 = vmul.f32 %v5381_v40, %v5301_v42 }
 0x19b   :  { %v5399_v51 = vrot.slane %v268_v44, %v5367_v29  ;;  %v281_v15 = vmul.f32 %v5287_v31, %v5381_v40  ;;  %v5413_v54 = vmul.f32 %v5299_v41, %v5381_v40  ;;  %v5417_v56 = vmul.f32 %v5381_v40, %v5318_v57 }
 0x19d   :  { %v310_v9 = vadd.f32 %v5399_v51, %v288_v47  ;;  %v297_v11 = vadd.f32 %v5399_v51, %v275_v48  ;;  %v298_v35 = vadd.f32 %v5399_v51, %v276_v49  ;;  %v299_v58 = vadd.f32 %v5399_v51, %v277_v52  ;;  %v672_v52 = vld [vmem:[#allocation2 + $0x10] sm:$0xf] }
 0x19e   :  { %v300_v42 = vadd.f32 %v5399_v51, %v278_v53  ;;  %v301_v31 = vadd.f32 %v5399_v51, %v279_v22  ;;  %v302_v59 = vadd.f32 %v5399_v51, %v280_v10  ;;  %v303_v41 = vadd.f32 %v5399_v51, %v281_v15 }
 0x19f   :  { %v326_v60 = vmax.f32 %v310_v9, 0.0  ;;  %v313_v0 = vmax.f32 %v297_v11, 0.0  ;;  %v314_v57 = vmax.f32 %v298_v35, 0.0  ;;  %v315_v1 = vmax.f32 %v299_v58, 0.0  ;;  %v675_v9 = vld [vmem:[#allocation2 + $0x14] sm:$0x1] }
 0x1a0   :  { %v316_v2 = vmax.f32 %v300_v42, 0.0  ;;  %v317_v3 = vmax.f32 %v301_v31, 0.0  ;;  %v318_v5 = vmax.f32 %v302_v59, 0.0  ;;  %v319_v6 = vmax.f32 %v303_v41, 0.0 }
 0x1a1   :  { %v4308_v7 = vpack.c.bf16 %v326_v60, %v326_v60  ;;  %v4295_v8 = vpack.c.bf16 %v313_v0, %v313_v0  ;;  %v4296_v13 = vpack.c.bf16 %v314_v57, %v314_v57  ;;  %v4297_v17 = vpack.c.bf16 %v315_v1, %v315_v1  ;;  %v678_v60 = vld [vmem:[#allocation2 + $0x18] sm:$0xf]  ;;  %v681_v0 = vld [vmem:[#allocation2 + $0x1c] sm:$0x1] }
 0x1a2   :  { %v5427_v19 = vpack.c.bf16 %v316_v2, %v316_v2  ;;  %v5429_v20 = vpack.c.bf16 %v317_v3, %v317_v3  ;;  %v5431_v23 = vpack.c.bf16 %v318_v5, %v318_v5  ;;  %v5433_v24 = vpack.c.bf16 %v319_v6, %v319_v6 }
 0x1a3   :  { %v609_v18 = vshrl.u32 %v4308_v7, 16  ;;  %v612_v25 = vshll.u32 %v4308_v7, 16  ;;  %v505_v26 = vshrl.u32 %v4295_v8, 16  ;;  %v508_v27 = vshll.u32 %v4295_v8, 16 }
 0x1a4   :  { %v513_v38 = vshrl.u32 %v4296_v13, 16  ;;  %v516_v39 = vshll.u32 %v4296_v13, 16  ;;  %v521_v44 = vshrl.u32 %v4297_v17, 16  ;;  %v524_v47 = vshll.u32 %v4297_v17, 16 }
 0x1a5   :  { %v611_v48 = vrot.slane %v609_v18, 7  ;;  %v507_v49 = vrot.slane %v505_v26, 7  ;;  %v529_v53 = vshrl.u32 %v5427_v19, 16  ;;  %v532_v22 = vshll.u32 %v5427_v19, 16  ;;  %v684_v18 = vld [vmem:[#allocation2 + $0x20] sm:$0xf] }
 0x1a6   :  { %v515_v15 = vrot.slane %v513_v38, 7  ;;  %v523_v11 = vrot.slane %v521_v44, 7  ;;  %v537_v35 = vshrl.u32 %v5429_v20, 16  ;;  %v540_v58 = vshll.u32 %v5429_v20, 16  ;;  %v687_v26 = vld [vmem:[#allocation2 + $0x24] sm:$0x1] }
 0x1a7   :  { %v614_v42 = vor.u32 %v612_v25, %v611_v48  ;;  %v615_v31 = vrot.slane %v611_v48, 4  ;;  %v510_v59 = vor.u32 %v508_v27, %v507_v49  ;;  %v511_v41 = vrot.slane %v507_v49, 4 }
 0x1a8   :  { %v518_v57 = vor.u32 %v516_v39, %v515_v15  ;;  %v519_v1 = vrot.slane %v515_v15, 4  ;;  %v526_v2 = vor.u32 %v524_v47, %v523_v11  ;;  %v527_v3 = vrot.slane %v523_v11, 4 }
 0x1a9   :  { %v745_v5 = vsel %vm5439_vm10, %v614_v42, %v744_v28  ;;  %v748_v6 = vsel %vm5205_vm4, %v615_v31, %v747_v30  ;;  %v667_v7 = vsel %vm5439_vm10, %v510_v59, %v666_v32  ;;  %v670_v8 = vsel %vm5205_vm4, %v511_v41, %v669_v36  ;;  %v690_v32 = vld [vmem:[#allocation2 + $0x28] sm:$0xf]  ;;  %v693_v36 = vld [vmem:[#allocation2 + $0x2c] sm:$0x1]  ;;  %v696_v42 = vld [vmem:[#allocation2 + $0x30] sm:$0xf] }
 0x1aa   :  { %746 = vst [vmem:[#allocation2 + $0x80] sm:$0xf] %v745_v5  ;;  %749 = vst [vmem:[#allocation2 + $0x84] sm:$0x1] %v748_v6  ;;  %v673_v13 = vsel %vm5439_vm10, %v518_v57, %v672_v52  ;;  %v676_v17 = vsel %vm5205_vm4, %v519_v1, %v675_v9  ;;  %v679_v19 = vsel %vm5439_vm10, %v526_v2, %v678_v60  ;;  %v531_v25 = vrot.slane %v529_v53, 7 }
 0x1ab   :  { %668 = vst [vmem:[#allocation2 + $0x8] sm:$0xf] %v667_v7  ;;  %671 = vst [vmem:[#allocation2 + $0xc] sm:$0x1] %v670_v8  ;;  %v682_v20 = vsel %vm5205_vm4, %v527_v3, %v681_v0  ;;  %v539_v27 = vrot.slane %v537_v35, 7  ;;  %v545_v28 = vshrl.u32 %v5431_v23, 16  ;;  %v304_v44 = vadd.f32 %v5399_v51, %v5413_v54 }
 0x1ac   :  { %674 = vst [vmem:[#allocation2 + $0x10] sm:$0xf] %v673_v13  ;;  %677 = vst [vmem:[#allocation2 + $0x14] sm:$0x1] %v676_v17  ;;  %v548_v30 = vshll.u32 %v5431_v23, 16  ;;  %v553_v38 = vshrl.u32 %v5433_v24, 16  ;;  %v305_v47 = vadd.f32 %v5399_v51, %v5417_v56  ;;  %v534_v48 = vor.u32 %v532_v22, %v531_v25 }
 0x1ad   :  { %680 = vst [vmem:[#allocation2 + $0x18] sm:$0xf] %v679_v19  ;;  %683 = vst [vmem:[#allocation2 + $0x1c] sm:$0x1] %v682_v20  ;;  %v556_v39 = vshll.u32 %v5433_v24, 16  ;;  %v535_v49 = vrot.slane %v531_v25, 4  ;;  %v542_v52 = vor.u32 %v540_v58, %v539_v27  ;;  %v284_v41 = vmul.f32 %v5381_v40, %v5325_v62 }
 0x1ae   :  { %v543_v53 = vrot.slane %v539_v27, 4  ;;  %v547_v15 = vrot.slane %v545_v28, 7  ;;  %v5469_v9 = vrot.slane %v553_v38, 7  ;;  %v320_v23 = vmax.f32 %v304_v44, 0.0  ;;  %v699_v31 = vld [vmem:[#allocation2 + $0x34] sm:$0x1] }
 0x1af   :  { %v321_v11 = vmax.f32 %v305_v47, 0.0  ;;  %v685_v35 = vsel %vm5439_vm10, %v534_v48, %v684_v18  ;;  %v688_v24 = vsel %vm5205_vm4, %v535_v49, %v687_v26  ;;  %v691_v54 = vsel %vm5439_vm10, %v542_v52, %v690_v32  ;;  %v702_v2 = vld [vmem:[#allocation2 + $0x38] sm:$0xf] }
 0x1b0   :  { %v694_v56 = vsel %vm5205_vm4, %v543_v53, %v693_v36  ;;  %686 = vst [vmem:[#allocation2 + $0x20] sm:$0xf] %v685_v35  ;;  %689 = vst [vmem:[#allocation2 + $0x24] sm:$0x1] %v688_v24  ;;  %v550_v22 = vor.u32 %v548_v30, %v547_v15  ;;  %v551_v58 = vrot.slane %v547_v15, 4  ;;  %v559_v59 = vrot.slane %v5469_v9, 4 }
 0x1b1   :  { %692 = vst [vmem:[#allocation2 + $0x28] sm:$0xf] %v691_v54  ;;  %695 = vst [vmem:[#allocation2 + $0x2c] sm:$0x1] %v694_v56  ;;  %v558_v1 = vor.u32 %v556_v39, %v5469_v9  ;;  %v5483_v3 = vpack.c.bf16 %v320_v23, %v320_v23  ;;  %v285_v5 = vmul.f32 %v5315_v55, %v5381_v40 }
 0x1b2   :  { %v763_v60 = vld [vmem:[#allocation2 + $0x8] sm:$0xf]  ;;  %v795_v0 = vld [vmem:[#allocation2 + $0xc] sm:$0x1]  ;;  %v5489_v6 = vmul.f32 %v5323_v61, %v5381_v40  ;;  %v5491_v62 = vpack.c.bf16 %v321_v11, %v321_v11  ;;  %v697_v26 = vsel %vm5439_vm10, %v550_v22, %v696_v42  ;;  %v700_v55 = vsel %vm5205_vm4, %v551_v58, %v699_v31 }
 0x1b3   :  { %v1991_v57 = vld [vmem:[#allocation2 + $0x8] sm:$0xf]  ;;  %v828_v7 = vshrl.u32 %v763_v60, 16  ;;  %v831_v8 = vshll.u32 %v763_v60, 16  ;;  %v837_v13 = vshll.u32 %v795_v0, 16  ;;  %v5498_v32 = vadd.f32 %v5399_v51, %v284_v41 }
 0x1b4   :  { %v1992_v17 = vld [vmem:[#allocation2 + $0xc] sm:$0x1]  ;;  %v1993_v19 = vld [vmem:[#allocation2 + $0x10] sm:$0xf]  ;;  %v1994_v20 = vld [vmem:[#allocation2 + $0x14] sm:$0x1]  ;;  %v703_v15 = vsel %vm5439_vm10, %v558_v1, %v702_v2 }
 0x1b5   :  { %v2024_v18 = vshrl.u32 %v1991_v57, 16  ;;  %v2027_v25 = vshll.u32 %v1991_v57, 16  ;;  %v830_v27 = vrot.slane %v828_v7, 4  ;;  %v833_v28 = vrot.slane %v831_v8, 5  ;;  %v764_v30 = vld [vmem:[#allocation2 + $0x10] sm:$0xf] }
 0x1b6   :  { %v2033_v61 = vshll.u32 %v1992_v17, 16  ;;  %698 = vst [vmem:[#allocation2 + $0x30] sm:$0xf] %v697_v26  ;;  %701 = vst [vmem:[#allocation2 + $0x34] sm:$0x1] %v700_v55  ;;  %v2038_v39 = vshrl.u32 %v1993_v19, 16 }
 0x1b7   :  { %v2026_v36 = vrot.slane %v2024_v18, 4  ;;  %v2029_v38 = vrot.slane %v2027_v25, 5  ;;  %v2041_v44 = vshll.u32 %v1993_v19, 16  ;;  %v834_v47 = vor.u32 %v833_v28, %v830_v27  ;;  %v765_v52 = vld [vmem:[#allocation2 + $0x18] sm:$0xf] }
 0x1b8   :  { %v839_v48 = vrot.slane %v837_v13, 5  ;;  %v2047_v49 = vshll.u32 %v1994_v20, 16  ;;  %v796_v53 = vld [vmem:[#allocation2 + $0x14] sm:$0x1]  ;;  %v2040_v11 = vrot.slane %v2038_v39, 4  ;;  %v842_v24 = vshrl.u32 %v764_v30, 16 }
 0x1b9   :  { %v2030_v23 = vor.u32 %v2029_v38, %v2026_v36  ;;  %v2043_v35 = vrot.slane %v2041_v44, 5  ;;  %704 = vst [vmem:[#allocation2 + $0x38] sm:$0xf] %v703_v15  ;;  %v835_v54 = vrot.slane %v834_v47, 4  ;;  %v2035_v56 = vrot.slane %v2033_v61, 5 }
 0x1ba   :  { %v845_v22 = vshll.u32 %v764_v30, 16  ;;  %v851_v58 = vshll.u32 %v796_v53, 16  ;;  %v797_v41 = vld [vmem:[#allocation2 + $0x1c] sm:$0x1]  ;;  %v844_v60 = vrot.slane %v842_v24, 4  ;;  %v856_v0 = vshrl.u32 %v765_v52, 16 }
 0x1bb   :  { %v2031_v42 = vrot.slane %v2030_v23, 4  ;;  %v2044_v31 = vor.u32 %v2043_v35, %v2040_v11  ;;  %v840_v57 = vsel %vm5376_vm8, %v835_v54, %v839_v48  ;;  %v2049_v7 = vrot.slane %v2047_v49, 5  ;;  %v1995_v2 = vld [vmem:[#allocation2 + $0x18] sm:$0xf]  ;;  %v1996_v55 = vld [vmem:[#allocation2 + $0x1c] sm:$0x1] }
 0x1bc   :  { %v847_v8 = vrot.slane %v845_v22, 5  ;;  %v859_v1 = vshll.u32 %v765_v52, 16  ;;  %v4102_v13 = vcombine.low %v826_v45, %v840_v57  ;;  %v858_v20 = vrot.slane %v856_v0, 4  ;;  %v1997_v27 = vld [vmem:[#allocation2 + $0x20] sm:$0xf] }
 0x1bd   :  { %v2036_v17 = vsel %vm5376_vm8, %v2031_v42, %v2035_v56  ;;  %v2045_v19 = vrot.slane %v2044_v31, 4  ;;  %v865_v26 = vshll.u32 %v797_v41, 16  ;;  %v5512_v28 = vadd.f32 %v5399_v51, %v285_v5  ;;  %v1998_v33 = vld [vmem:[#allocation2 + $0x24] sm:$0x1]  ;;  %v766_v47 = vld [vmem:[#allocation2 + $0x20] sm:$0xf] }
 0x1be   :  { %v848_v18 = vor.u32 %v847_v8, %v844_v60  ;;  %v861_v25 = vrot.slane %v859_v1, 5  ;;  %4507 = vmatprep.mubr.bf16.mxu0 %v4102_v13  ;;  %v853_v30 = vrot.slane %v851_v58, 5  ;;  %v2052_v34 = vshrl.u32 %v1995_v2, 16  ;;  %v767_v15 = vld [vmem:[#allocation2 + $0x28] sm:$0xf] }
 0x1bf   :  { %v2050_v61 = vsel %vm5376_vm8, %v2045_v19, %v2049_v7  ;;  %v2055_v45 = vshll.u32 %v1995_v2, 16  ;;  %v867_v44 = vrot.slane %v865_v26, 5  ;;  %v2061_v52 = vshll.u32 %v1996_v55, 16  ;;  %v798_v24 = vld [vmem:[#allocation2 + $0x24] sm:$0x1]  ;;  %v4958_v13 = vld [vmem:[#allocation3 + $0x8] sm:$0xff]  }
 0x1c0   :  { %v4182_v36 = vcombine.low %v2036_v17, %v2050_v61  ;;  %v849_v38 = vrot.slane %v848_v18, 4  ;;  %v862_v39 = vor.u32 %v861_v25, %v858_v20  ;;  %v2054_v48 = vrot.slane %v2052_v34, 4  ;;  %v799_v58 = vld [vmem:[#allocation2 + $0x2c] sm:$0x1]  ;;  %v1999_v57 = vld [vmem:[#allocation2 + $0x28] sm:$0xf] }
 0x1c1   :  { %v2057_v49 = vrot.slane %v2055_v45, 5  ;;  %v2066_v53 = vshrl.u32 %v1997_v27, 16  ;;  %v2069_v11 = vshll.u32 %v1997_v27, 16  ;;  %v2075_v35 = vshll.u32 %v1998_v33, 16  ;;  %v5520_v25 = vld [vmem:[#allocation2 + $0x2c] sm:$0x1] }
 0x1c2   :  { %4635 = vmatprep.mubr.bf16.mxu1 %v4182_v36  ;;  %v854_v5 = vsel %vm5376_vm8, %v849_v38, %v853_v30  ;;  %v863_v23 = vrot.slane %v862_v39, 4  ;;  %v2063_v56 = vrot.slane %v2061_v52, 5  ;;  %v870_v42 = vshrl.u32 %v766_v47, 16  ;;  %v2001_v61 = vld [vmem:[#allocation2 + $0x30] sm:$0xf] }
 0x1c3   :  { %v2058_v54 = vor.u32 %v2057_v49, %v2054_v48  ;;  %v2068_v22 = vrot.slane %v2066_v53, 4  ;;  %v2071_v41 = vrot.slane %v2069_v11, 5  ;;  %v2077_v60 = vrot.slane %v2075_v35, 5  ;;  %v4960_v38 = vld [vmem:[#allocation3 + $0x10] sm:$0xff]  }
 0x1c4   :  { %v868_v31 = vsel %vm5376_vm8, %v863_v23, %v867_v44  ;;  %v873_v0 = vshll.u32 %v766_v47, 16  ;;  %v872_v1 = vrot.slane %v870_v42, 4  ;;  %v879_v2 = vshll.u32 %v798_v24, 16  ;;  %v5525_v44 = vld [vmem:[#allocation2 + $0x34] sm:$0x1] }
 0x1c5   :  { %v4103_v7 = vcombine.low %v854_v5, %v868_v31  ;;  %v2059_v8 = vrot.slane %v2058_v54, 4  ;;  %v2072_v17 = vor.u32 %v2071_v41, %v2068_v22  ;;  %v884_v20 = vshrl.u32 %v767_v15, 16  ;;  %v705_v23 = vld [vmem:[#allocation2 + $0x3c] sm:$0x1]  ;;  %v5530_v11 = vld [vmem:[#allocation2 + $0x30] sm:$0xf] }
 0x1c6   :  { %v875_v19 = vrot.slane %v873_v0, 5  ;;  %v887_v18 = vshll.u32 %v767_v15, 16  ;;  %v881_v55 = vrot.slane %v879_v2, 5  ;;  %v893_v27 = vshll.u32 %v799_v58, 16  ;;  %v800_v22 = vld [vmem:[#allocation2 + $0x34] sm:$0x1] }
 0x1c7   :  { %4508 = vmatmul.mubr.bf16.vlgmr.msra.gmra.mrb[0].mxu0 %v4103_v7  ;;  %v2064_v26 = vsel %vm5376_vm8, %v2059_v8, %v2063_v56  ;;  %v2080_v30 = vshrl.u32 %v1999_v57, 16  ;;  %v2073_v33 = vrot.slane %v2072_v17, 4  ;;  %v886_v45 = vrot.slane %v884_v20, 4  ;;  %v4957_v56 = vld [vmem:[#allocation3 + $0x148] sm:$0xff]   ;;  %v5539_v7 = vld [vmem:[#allocation2 + $0x38] sm:$0xf] }
 0x1c8   :  { %v876_v34 = vor.u32 %v875_v19, %v872_v1  ;;  %v889_v36 = vrot.slane %v887_v18, 5  ;;  %4524 = vmatpush3.bf16.msra.mxu0 %v5253_v4  ;;  %v895_v39 = vrot.slane %v893_v27, 5  ;;  %v2083_v48 = vshll.u32 %v1999_v57, 16  ;;  %v4962_v1 = vld [vmem:[#allocation3 + $0x18] sm:$0xff]  }
 0x1c9   :  { %v2082_v47 = vrot.slane %v2080_v30, 4  ;;  %v2089_v49 = vshll.u32 %v5520_v25, 16  ;;  %4525 = vmatprep.subr.bf16.mxu0 %v4958_v13  ;;  %v2078_v52 = vsel %vm5376_vm8, %v2073_v33, %v2077_v60  ;;  %v2094_v5 = vshrl.u32 %v2001_v61, 16 }
 0x1ca   :  { %v877_v53 = vrot.slane %v876_v34, 4  ;;  %v890_v15 = vor.u32 %v889_v36, %v886_v45  ;;  %v4183_v35 = vcombine.low %v2064_v26, %v2078_v52  ;;  %v2085_v4 = vrot.slane %v2083_v48, 5 }
 0x1cb   :  { %v2091_v24 = vrot.slane %v2089_v49, 5  ;;  %v2097_v54 = vshll.u32 %v2001_v61, 16  ;;  %v2096_v31 = vrot.slane %v2094_v5, 4  ;;  %v2103_v41 = vshll.u32 %v5525_v44, 16 }
 0x1cc   :  { %v882_v58 = vsel %vm5376_vm8, %v877_v53, %v881_v55  ;;  %v891_v42 = vrot.slane %v890_v15, 4  ;;  %4526 = vmatpush3.bf16.msra.mxu0 %v4958_v13  ;;  %4636 = vmatmul.mubr.bf16.vlgmr.msra.gmra.mrb[16].mxu1 %v4183_v35  ;;  %v2086_v60 = vor.u32 %v2085_v4, %v2082_v47  ;;  %v706_v57 = vsel %vm5205_vm4, %v559_v59, %v705_v23  ;;  %v4959_v59 = vld [vmem:[#allocation3 + $0x150] sm:$0xff]   ;;  %v2003_v55 = vld [vmem:[#allocation2 + $0x38] sm:$0xf] }
 0x1cd   :  { %v2099_v0 = vrot.slane %v2097_v54, 5  ;;  %v898_v8 = vshrl.u32 %v5530_v11, 16  ;;  %4527 = vmatprep.subr.bf16.mxu0 %v4960_v38  ;;  %4652 = vmatpush3.bf16.msra.mxu1 %v5246_v63  ;;  %v2105_v13 = vrot.slane %v2103_v41, 5  ;;  %707 = vst [vmem:[#allocation2 + $0x3c] sm:$0x1] %v706_v57  ;;  %v901_v17 = vshll.u32 %v5530_v11, 16 }
 0x1ce   :  { %v896_v2 = vsel %vm5376_vm8, %v891_v42, %v895_v39  ;;  %v907_v19 = vshll.u32 %v800_v22, 16  ;;  %v2087_v20 = vrot.slane %v2086_v60, 4  ;;  %4653 = vmatprep.subr.bf16.mxu1 %v4957_v56  ;;  %v912_v63 = vshrl.u32 %v5539_v7, 16  ;;  %v4964_v39 = vld [vmem:[#allocation3 + $0x20] sm:$0xff]   ;;  %v4961_v23 = vld [vmem:[#allocation3 + $0x158] sm:$0xff]   ;;  %v4966_v60 = vld [vmem:[#allocation3 + $0x28] sm:$0xff]  }
 0x1cf   :  { %v4104_v9 = vcombine.low %v882_v58, %v896_v2  ;;  %v2100_v18 = vor.u32 %v2099_v0, %v2096_v31  ;;  %v900_v26 = vrot.slane %v898_v8, 4  ;;  %v903_v27 = vrot.slane %v901_v17, 5  ;;  %v711_v54 = vld [vmem:[#allocation2 + $0x44] sm:$0x1] }
 0x1d0   :  { %v5546_v61 = vrot.slane %v907_v19, 5  ;;  %v915_v30 = vshll.u32 %v5539_v7, 16  ;;  %4528 = vmatpush3.bf16.msra.mxu0 %v4960_v38  ;;  %v2092_v33 = vsel %vm5376_vm8, %v2087_v20, %v2091_v24  ;;  %v561_v45 = vshrl.u32 %v5483_v3, 16 }
 0x1d1   :  { %4511 = vmatprep.mubr.bf16.mxu0 %v4104_v9  ;;  %v2101_v34 = vrot.slane %v2100_v18, 4  ;;  %v564_v36 = vshll.u32 %v5483_v3, 16  ;;  %4529 = vmatprep.subr.bf16.mxu0 %v4962_v1  ;;  %v904_v47 = vor.u32 %v903_v27, %v900_v26  ;;  %v914_v48 = vrot.slane %v912_v63, 4  ;;  %v708_v3 = vld [vmem:[#allocation2 + $0x40] sm:$0xf] }
 0x1d2   :  { %4654 = vmatpush3.bf16.msra.mxu1 %v4957_v56  ;;  %v917_v49 = vrot.slane %v915_v30, 5  ;;  %v2108_v52 = vshrl.u32 %v2003_v55, 16  ;;  %v563_v38 = vrot.slane %v561_v45, 7  ;;  %v2111_v15 = vshll.u32 %v2003_v55, 16  ;;  %v714_v9 = vld [vmem:[#allocation2 + $0x58] sm:$0xf] }
 0x1d3   :  { %v2106_v53 = vsel %vm5376_vm8, %v2101_v34, %v2105_v13  ;;  %4655 = vmatprep.subr.bf16.mxu1 %v4959_v59  ;;  %v569_v5 = vshrl.u32 %v5491_v62, 16  ;;  %v905_v4 = vrot.slane %v904_v47, 4  ;;  %v308_v41 = vadd.f32 %v5399_v51, %v5489_v6  ;;  %v4963_v6 = vld [vmem:[#allocation3 + $0x160] sm:$0xff]  }
 0x1d4   :  { %v4184_v35 = vcombine.low %v2092_v33, %v2106_v53  ;;  %v918_v24 = vor.u32 %v917_v49, %v914_v48  ;;  %v2110_v22 = vrot.slane %v2108_v52, 4  ;;  %4530 = vmatpush3.bf16.msra.mxu0 %v4962_v1  ;;  %v801_v56 = vld [vmem:[#allocation2 + $0x3c] sm:$0x1]  ;;  %v566_v58 = vor.u32 %v564_v36, %v563_v38  ;;  %v4968_v33 = vld [vmem:[#allocation3 + $0x30] sm:$0xff]   ;;  %v5583_v47 = vld [vmem:[#allocation2 + $0x80] sm:$0xf] }
 0x1d5   :  { %v567_v42 = vrot.slane %v563_v38, 4  ;;  %v2113_v31 = vrot.slane %v2111_v15, 5  ;;  %4531 = vmatprep.subr.bf16.mxu0 %v4964_v39  ;;  %v921_v57 = vshll.u32 %v801_v56, 16  ;;  %v5559_v8 = vld [vmem:[#allocation2 + $0x3c] sm:$0x1]  ;;  %v287_v2 = vmul.f32 %v5381_v40, %v5338_v16  ;;  %v4965_v48 = vld [vmem:[#allocation3 + $0x168] sm:$0xff]  }
 0x1d6   :  { %4639 = vmatprep.mubr.bf16.mxu1 %v4184_v35  ;;  %v919_v0 = vrot.slane %v918_v24, 4  ;;  %4656 = vmatpush3.bf16.msra.mxu1 %v4959_v59  ;;  %v709_v1 = vsel %vm5439_vm10, %v566_v58, %v708_v3  ;;  %v571_v19 = vrot.slane %v569_v5, 7  ;;  %v910_v20 = vsel %vm5376_vm8, %v905_v4, %v5546_v61  ;;  %v717_v59 = vld [vmem:[#allocation2 + $0x5c] sm:$0x1]  ;;  %v720_v35 = vld [vmem:[#allocation2 + $0x60] sm:$0xf] }
 0x1d7   :  { %v712_v13 = vsel %vm5205_vm4, %v567_v42, %v711_v54  ;;  %v2114_v17 = vor.u32 %v2113_v31, %v2110_v22  ;;  %4657 = vmatprep.subr.bf16.mxu1 %v4961_v23  ;;  %v923_v18 = vrot.slane %v921_v57, 5  ;;  %710 = vst [vmem:[#allocation2 + $0x40] sm:$0xf] %v709_v1  ;;  %v572_v16 = vshll.u32 %v5491_v62, 16  ;;  %v4971_v15 = vld [vmem:[#allocation3 + $0x38] sm:$0xff]   ;;  %v4967_v58 = vld [vmem:[#allocation3 + $0x170] sm:$0xff]  }
 0x1d8   :  { %713 = vst [vmem:[#allocation2 + $0x44] sm:$0x1] %v712_v13  ;;  %v322_v26 = vmax.f32 %v5498_v32, 0.0  ;;  %4532 = vmatpush3.bf16.msra.mxu0 %v4964_v39  ;;  %v2117_v55 = vshll.u32 %v5559_v8, 16  ;;  %v575_v27 = vrot.slane %v571_v19, 4  ;;  %v323_v63 = vmax.f32 %v5512_v28, 0.0 }
 0x1d9   :  { %v324_v30 = vmax.f32 %v308_v41, 0.0  ;;  %4533 = vmatprep.subr.bf16.mxu0 %v4966_v60  ;;  %v924_v61 = vsel %vm5376_vm8, %v919_v0, %v923_v18  ;;  %v574_v34 = vor.u32 %v572_v16, %v571_v19  ;;  %v5577_v62 = vadd.f32 %v5399_v51, %v287_v2  ;;  %v723_v54 = vld [vmem:[#allocation2 + $0x64] sm:$0x1]  ;;  %v726_v22 = vld [vmem:[#allocation2 + $0x68] sm:$0xf] }
 0x1da   :  { %v4304_v45 = vpack.c.bf16 %v322_v26, %v322_v26  ;;  %4658 = vmatpush3.bf16.msra.mxu1 %v4961_v23  ;;  %v4105_v36 = vcombine.low %v910_v20, %v924_v61  ;;  %v5579_v32 = vrot.slane %v2114_v17, 4  ;;  %v718_v39 = vsel %vm5205_vm4, %v575_v27, %v717_v59  ;;  %v729_v13 = vld [vmem:[#allocation2 + $0x6c] sm:$0x1]  ;;  %v5602_v18 = vld [vmem:[#allocation3 + $0x80] sm:$0xff]   ;;  %v4970_v27 = vld [vmem:[#allocation3 + $0x178] sm:$0xff]  }
 0x1db   :  { %4659 = vmatprep.subr.bf16.mxu1 %v4963_v6  ;;  %v4305_v28 = vpack.c.bf16 %v323_v63, %v323_v63  ;;  %v715_v49 = vsel %vm5439_vm10, %v574_v34, %v714_v9  ;;  %719 = vst [vmem:[#allocation2 + $0x5c] sm:$0x1] %v718_v39  ;;  %v5589_v52 = vrot.slane %v935_v46, 5  ;;  %v4306_v38 = vpack.c.bf16 %v324_v30, %v324_v30 }
 0x1dc   :  { %v577_v53 = vshrl.u32 %v4304_v45, 16  ;;  %4534 = vmatpush3.bf16.msra.mxu0 %v4966_v60  ;;  %v5591_v5 = vrot.slane %v2117_v55, 5  ;;  %716 = vst [vmem:[#allocation2 + $0x58] sm:$0xf] %v715_v49  ;;  %v580_v23 = vshll.u32 %v4304_v45, 16  ;;  %v325_v43 = vmax.f32 %v5577_v62, 0.0 }
 0x1dd   :  { %4512 = vmatmul.mubr.bf16.gmra.mrb[4].mxu0 %v4105_v36  ;;  %v585_v4 = vshrl.u32 %v4305_v28, 16  ;;  %v588_v24 = vshll.u32 %v4305_v28, 16  ;;  %4535 = vmatprep.subr.bf16.mxu0 %v4968_v33  ;;  %v593_v56 = vshrl.u32 %v4306_v38, 16  ;;  %v2206_v46 = vshrl.u32 %v5583_v47, 16  ;;  %v732_v45 = vld [vmem:[#allocation2 + $0x70] sm:$0xf] }
 0x1de   :  { %v579_v3 = vrot.slane %v577_v53, 7  ;;  %4660 = vmatpush3.bf16.msra.mxu1 %v4963_v6  ;;  %v2005_v42 = vld [vmem:[#allocation2 + $0x40] sm:$0xf]  ;;  %v2120_v41 = vsel %vm5376_vm8, %v5579_v32, %v5591_v5  ;;  %v596_v0 = vshll.u32 %v4306_v38, 16  ;;  %v2209_v17 = vshll.u32 %v5583_v47, 16 }
 0x1df   :  { %v5595_v31 = vld [vmem:[#allocation2 + $0x44] sm:$0x1]  ;;  %v587_v60 = vrot.slane %v585_v4, 7  ;;  %4661 = vmatprep.subr.bf16.mxu1 %v4965_v48  ;;  %v2122_v57 = vshrl.u32 %v2005_v42, 16  ;;  %v2125_v2 = vshll.u32 %v2005_v42, 16  ;;  %v595_v20 = vrot.slane %v593_v56, 7 }
 0x1e0   :  { %v582_v1 = vor.u32 %v580_v23, %v579_v3  ;;  %4536 = vmatpush3.bf16.msra.mxu0 %v4968_v33  ;;  %v583_v19 = vrot.slane %v579_v3, 4  ;;  %v2131_v26 = vshll.u32 %v5595_v31, 16  ;;  %v4307_v62 = vpack.c.bf16 %v325_v43, %v325_v43 }
 0x1e1   :  { %v590_v9 = vor.u32 %v588_v24, %v587_v60  ;;  %v591_v6 = vrot.slane %v587_v60, 4  ;;  %4537 = vmatprep.subr.bf16.mxu0 %v4971_v15  ;;  %v2124_v16 = vrot.slane %v2122_v57, 4  ;;  %v2127_v59 = vrot.slane %v2125_v2, 5 }
 0x1e2   :  { %v721_v55 = vsel %vm5439_vm10, %v582_v1, %v720_v35  ;;  %4662 = vmatpush3.bf16.msra.mxu1 %v4965_v48  ;;  %v5607_v63 = vld [vmem:[#allocation2 + $0x5c] sm:$0x1]  ;;  %v724_v30 = vsel %vm5205_vm4, %v583_v19, %v723_v54  ;;  %v598_v48 = vor.u32 %v596_v0, %v595_v20  ;;  %v5620_v49 = vrot.slane %v2206_v46, 4  ;;  %v735_v35 = vld [vmem:[#allocation2 + $0x74] sm:$0x1] }
 0x1e3   :  { %6237 = vst [vmem:[#allocation10_spill] sm:$0xff] %v5607_v63  ;;  %722 = vst [vmem:[#allocation2 + $0x60] sm:$0xf] %v721_v55  ;;  %v5611_v33 = vld [vmem:[#allocation2 + $0x5c] sm:$0x1]  ;;  %v727_v61 = vsel %vm5439_vm10, %v590_v9, %v726_v22  ;;  %v730_v34 = vsel %vm5205_vm4, %v591_v6, %v729_v13  ;;  %4663 = vmatprep.subr.bf16.mxu1 %v4967_v58  ;;  %v2128_v36 = vor.u32 %v2127_v59, %v2124_v16 }
 0x1e4   :  { %v5617_v32 = vld [vmem:[#allocation2 + $0x58] sm:$0xf]  ;;  %v949_v39 = vshll.u32 %v5607_v63, 16  ;;  %725 = vst [vmem:[#allocation2 + $0x64] sm:$0x1] %v724_v30  ;;  %4538 = vmatpush3.bf16.msra.mxu0 %v4971_v15  ;;  %v2133_v24 = vrot.slane %v2131_v26, 5  ;;  %v733_v60 = vsel %vm5439_vm10, %v598_v48, %v732_v45  ;;  %v938_v19 = vsel %vm5376_vm8, %v5396_v50, %v5589_v52 }
 0x1e5   :  { %v2007_v28 = vld [vmem:[#allocation2 + $0x58] sm:$0xf]  ;;  %728 = vst [vmem:[#allocation2 + $0x68] sm:$0xf] %v727_v61  ;;  %731 = vst [vmem:[#allocation2 + $0x6c] sm:$0x1] %v730_v34  ;;  %4555 = vmatprep.subr.bf16.mxu0 %v5602_v18  ;;  %v289_v59 = vmul.f32 %v5335_v12, %v5381_v40 }
 0x1e6   :  { %v940_v53 = vshrl.u32 %v5617_v32, 16  ;;  %v943_v38 = vshll.u32 %v5617_v32, 16  ;;  %v2136_v5 = vshrl.u32 %v2007_v28, 16  ;;  %v2139_v23 = vshll.u32 %v2007_v28, 16  ;;  %4664 = vmatpush3.bf16.msra.mxu1 %v4967_v58  ;;  %v5626_v15 = vld [vmem:[#allocation3 + $0x180] sm:$0xff]  }
 0x1e7   :  { %v2129_v4 = vrot.slane %v2128_v36, 4  ;;  %v2145_v3 = vshll.u32 %v5611_v33, 16  ;;  %v599_v54 = vrot.slane %v595_v20, 4  ;;  %4665 = vmatprep.subr.bf16.mxu1 %v4970_v27  ;;  %v601_v57 = vshrl.u32 %v4307_v62, 16  ;;  %734 = vst [vmem:[#allocation2 + $0x70] sm:$0xf] %v733_v60 }
 0x1e8   :  { %v942_v22 = vrot.slane %v940_v53, 4  ;;  %v945_v56 = vrot.slane %v943_v38, 5  ;;  %v2138_v43 = vrot.slane %v2136_v5, 4  ;;  %v2141_v46 = vrot.slane %v2139_v23, 5  ;;  %v738_v34 = vld [vmem:[#allocation2 + $0x78] sm:$0xf] }
 0x1e9   :  { %v2134_v42 = vsel %vm5376_vm8, %v2129_v4, %v2133_v24  ;;  %v736_v0 = vsel %vm5205_vm4, %v599_v54, %v735_v35  ;;  %v951_v58 = vrot.slane %v949_v39, 5  ;;  %v5640_v20 = vrot.slane %v601_v57, 7 }
 0x1ea   :  { %v4185_v2 = vcombine.low %v2120_v41, %v2134_v42  ;;  %v946_v1 = vor.u32 %v945_v56, %v942_v22  ;;  %v2142_v13 = vor.u32 %v2141_v46, %v2138_v43  ;;  %737 = vst [vmem:[#allocation2 + $0x74] sm:$0x1] %v736_v0  ;;  %v2009_v9 = vld [vmem:[#allocation2 + $0x60] sm:$0xf]  ;;  %v604_v16 = vshll.u32 %v4307_v62, 16  ;;  %4666 = vmatpush3.bf16.msra.mxu1 %v4970_v27 }
 0x1eb   :  { %v5638_v6 = vld [vmem:[#allocation2 + $0x60] sm:$0xf]  ;;  %v5644_v26 = vld [vmem:[#allocation2 + $0x64] sm:$0x1]  ;;  %v2147_v55 = vrot.slane %v2145_v3, 5  ;;  %v2150_v30 = vshrl.u32 %v2009_v9, 16  ;;  %4683 = vmatprep.subr.bf16.mxu1 %v5626_v15  ;;  %v5654_v27 = vadd.f32 %v5399_v51, %v289_v59 }
 0x1ec   :  { %4640 = vmatmul.mubr.bf16.gmra.mrb[20].mxu1 %v4185_v2  ;;  %v947_v41 = vrot.slane %v946_v1, 4  ;;  %v2153_v61 = vshll.u32 %v2009_v9, 16  ;;  %v2143_v50 = vrot.slane %v2142_v13, 4  ;;  %v5647_v52 = vld [vmem:[#allocation2 + $0x68] sm:$0xf]  ;;  %v954_v62 = vshrl.u32 %v5638_v6, 16 }
 0x1ed   :  { %v5649_v45 = vld [vmem:[#allocation2 + $0x64] sm:$0x1]  ;;  %v606_v12 = vor.u32 %v604_v16, %v5640_v20  ;;  %v2152_v39 = vrot.slane %v2150_v30, 4  ;;  %v2159_v48 = vshll.u32 %v5644_v26, 16  ;;  %v5659_v53 = vld [vmem:[#allocation2 + $0x6c] sm:$0x1] }
 0x1ee   :  { %v952_v36 = vsel %vm5376_vm8, %v947_v41, %v951_v58  ;;  %v2155_v28 = vrot.slane %v2153_v61, 5  ;;  %v956_v5 = vrot.slane %v954_v62, 4  ;;  %v957_v23 = vshll.u32 %v5638_v6, 16  ;;  %v2011_v22 = vld [vmem:[#allocation2 + $0x68] sm:$0xf] }
 0x1ef   :  { %v4106_v38 = vcombine.low %v938_v19, %v952_v36  ;;  %v5664_v35 = vrot.slane %v2209_v17, 5  ;;  %v963_v24 = vshll.u32 %v5649_v45, 16  ;;  %v968_v3 = vshrl.u32 %v5647_v52, 16  ;;  %v2013_v42 = vld [vmem:[#allocation2 + $0x70] sm:$0xf] }
 0x1f0   :  { %v2156_v4 = vor.u32 %v2155_v28, %v2152_v39  ;;  %v971_v54 = vshll.u32 %v5647_v52, 16  ;;  %v2148_v56 = vsel %vm5376_vm8, %v2143_v50, %v2147_v55  ;;  %v959_v43 = vrot.slane %v957_v23, 5  ;;  %v5674_v58 = vld [vmem:[#allocation2 + $0x6c] sm:$0x1]  ;;  %v741_v30 = vld [vmem:[#allocation2 + $0x7c] sm:$0x1] }
 0x1f1   :  { %4515 = vmatprep.mubr.bf16.mxu0 %v4106_v38  ;;  %v977_v46 = vshll.u32 %v5659_v53, 16  ;;  %v739_v47 = vsel %vm5439_vm10, %v606_v12, %v738_v34  ;;  %v2161_v60 = vrot.slane %v2159_v48, 5  ;;  %v970_v0 = vrot.slane %v968_v3, 4  ;;  %v5678_v41 = vld [vmem:[#allocation2 + $0x74] sm:$0x1] }
 0x1f2   :  { %v2157_v17 = vrot.slane %v2156_v4, 4  ;;  %v973_v57 = vrot.slane %v971_v54, 5  ;;  %740 = vst [vmem:[#allocation2 + $0x78] sm:$0xf] %v739_v47  ;;  %v960_v2 = vor.u32 %v959_v43, %v956_v5  ;;  %v965_v1 = vrot.slane %v963_v24, 5 }
 0x1f3   :  { %v2164_v13 = vshrl.u32 %v2011_v22, 16  ;;  %v2167_v19 = vshll.u32 %v2011_v22, 16  ;;  %v979_v59 = vrot.slane %v977_v46, 5  ;;  %v2178_v55 = vshrl.u32 %v2013_v42, 16  ;;  %v5680_v61 = vld [vmem:[#allocation2 + $0x70] sm:$0xf] }
 0x1f4   :  { %v2162_v9 = vsel %vm5376_vm8, %v2157_v17, %v2161_v60  ;;  %v974_v16 = vor.u32 %v973_v57, %v970_v0  ;;  %v961_v50 = vrot.slane %v960_v2, 4  ;;  %v2173_v39 = vshll.u32 %v5674_v58, 16  ;;  %v5695_v17 = vld [vmem:[#allocation2 + $0x84] sm:$0x1]  ;;  %v5699_v57 = vld [vmem:[#allocation2 + $0x74] sm:$0x1] }
 0x1f5   :  { %v4186_v34 = vcombine.low %v2148_v56, %v2162_v9  ;;  %v2166_v62 = vrot.slane %v2164_v13, 4  ;;  %v2169_v12 = vrot.slane %v2167_v19, 5  ;;  %v2180_v28 = vrot.slane %v2178_v55, 4 }
 0x1f6   :  { %v975_v36 = vrot.slane %v974_v16, 4  ;;  %v2181_v48 = vshll.u32 %v2013_v42, 16  ;;  %v966_v38 = vsel %vm5376_vm8, %v961_v50, %v965_v1  ;;  %v2187_v23 = vshll.u32 %v5678_v41, 16 }
 0x1f7   :  { %4643 = vmatprep.mubr.bf16.mxu1 %v4186_v34  ;;  %v2170_v5 = vor.u32 %v2169_v12, %v2166_v62  ;;  %v607_v4 = vrot.slane %v5640_v20, 4  ;;  %v982_v54 = vshrl.u32 %v5680_v61, 16  ;;  %v985_v22 = vshll.u32 %v5680_v61, 16 }
 0x1f8   :  { %v980_v24 = vsel %vm5376_vm8, %v975_v36, %v979_v59  ;;  %v2183_v3 = vrot.slane %v2181_v48, 5  ;;  %v2212_v20 = vor.u32 %v5664_v35, %v5620_v49  ;;  %v2175_v60 = vrot.slane %v2173_v39, 5 }
 0x1f9   :  { %v4107_v56 = vcombine.low %v966_v38, %v980_v24  ;;  %v2171_v43 = vrot.slane %v2170_v5, 4  ;;  %v742_v46 = vsel %vm5205_vm4, %v607_v4, %v741_v30  ;;  %v5693_v42 = vld [vmem:[#allocation2 + $0x78] sm:$0xf]  ;;  %v984_v2 = vrot.slane %v982_v54, 4 }
 0x1fa   :  { %v2015_v47 = vld [vmem:[#allocation2 + $0x78] sm:$0xf]  ;;  %v2184_v0 = vor.u32 %v2183_v3, %v2180_v28  ;;  %743 = vst [vmem:[#allocation2 + $0x7c] sm:$0x1] %v742_v46  ;;  %v987_v1 = vrot.slane %v985_v22, 5  ;;  %v2189_v13 = vrot.slane %v2187_v23, 5  ;;  %v290_v28 = vmul.f32 %v5343_v21, %v5381_v40 }
 0x1fb   :  { %4516 = vmatmul.mubr.bf16.gmra.mrb[8].mxu0 %v4107_v56  ;;  %v996_v19 = vshrl.u32 %v5693_v42, 16  ;;  %v999_v9 = vshll.u32 %v5693_v42, 16  ;;  %v2192_v16 = vshrl.u32 %v2015_v47, 16  ;;  %v2176_v59 = vsel %vm5376_vm8, %v2171_v43, %v2175_v60 }
 0x1fc   :  { %v2185_v55 = vrot.slane %v2184_v0, 4  ;;  %v988_v30 = vor.u32 %v987_v1, %v984_v2  ;;  %v2195_v49 = vshll.u32 %v2015_v47, 16  ;;  %v991_v35 = vshll.u32 %v5699_v57, 16  ;;  %v5719_v0 = vld [vmem:[#allocation2 + $0x80] sm:$0xf] }
 0x1fd   :  { %v998_v34 = vrot.slane %v996_v19, 4  ;;  %v1001_v50 = vrot.slane %v999_v9, 5  ;;  %v2194_v62 = vrot.slane %v2192_v16, 4  ;;  %v2215_v39 = vshll.u32 %v5695_v17, 16 }
 0x1fe   :  { %v2190_v12 = vsel %vm5376_vm8, %v2185_v55, %v2189_v13  ;;  %v2197_v36 = vrot.slane %v2195_v49, 5  ;;  %v989_v38 = vrot.slane %v988_v30, 4  ;;  %v327_v23 = vmax.f32 %v5654_v27, 0.0  ;;  %v750_v13 = vld [vmem:[#allocation2 + $0x88] sm:$0xf] }
 0x1ff   :  { %v4187_v48 = vcombine.low %v2176_v59, %v2190_v12  ;;  %v1002_v5 = vor.u32 %v1001_v50, %v998_v34  ;;  %v2213_v24 = vrot.slane %v2212_v20, 4  ;;  %v312_v3 = vadd.f32 %v5399_v51, %v290_v28  ;;  %v753_v59 = vld [vmem:[#allocation2 + $0x8c] sm:$0x1] }
 0x200   :  { %v2198_v4 = vor.u32 %v2197_v36, %v2194_v62  ;;  %v993_v22 = vrot.slane %v991_v35, 5  ;;  %v2217_v43 = vrot.slane %v2215_v39, 5  ;;  %v4309_v46 = vpack.c.bf16 %v327_v23, %v327_v23  ;;  %v756_v23 = vld [vmem:[#allocation2 + $0x90] sm:$0xf] }
 0x201   :  { %4644 = vmatmul.mubr.bf16.gmra.mrb[24].mxu1 %v4187_v48  ;;  %v5713_v54 = vld [vmem:[#allocation2 + $0x7c] sm:$0x1]  ;;  %v1003_v47 = vrot.slane %v1002_v5, 4  ;;  %v328_v19 = vmax.f32 %v312_v3, 0.0  ;;  %v1010_v55 = vshrl.u32 %v5719_v0, 16  ;;  %v1013_v35 = vshll.u32 %v5719_v0, 16 }
 0x202   :  { %v5715_v56 = vld [vmem:[#allocation2 + $0x7c] sm:$0x1]  ;;  %v1005_v21 = vshll.u32 %v5713_v54, 16  ;;  %v2199_v40 = vrot.slane %v2198_v4, 4  ;;  %v994_v27 = vsel %vm5376_vm8, %v989_v38, %v993_v22  ;;  %v617_v51 = vshrl.u32 %v4309_v46, 16 }
 0x203   :  { %v2201_v60 = vshll.u32 %v5715_v56, 16  ;;  %v2218_v1 = vsel %vm5376_vm8, %v2213_v24, %v2217_v43  ;;  %v620_v16 = vshll.u32 %v4309_v46, 16  ;;  %v4310_v34 = vpack.c.bf16 %v328_v19, %v328_v19  ;;  %v759_v3 = vld [vmem:[#allocation2 + $0x94] sm:$0x1]  ;;  %v2463_v46 = vld [vmem:[#allocation2 + $0x38] sm:$0xe] }
 0x204   :  { %v1007_v20 = vrot.slane %v1005_v21, 5  ;;  %v619_v9 = vrot.slane %v617_v51, 7  ;;  %v1012_v4 = vrot.slane %v1010_v55, 4  ;;  %v1015_v24 = vrot.slane %v1013_v35, 5  ;;  %v2464_v21 = vld [vmem:[#allocation2 + $0x40] sm:$0xe] }
 0x205   :  { %v2203_v2 = vrot.slane %v2201_v60, 5  ;;  %v625_v39 = vshrl.u32 %v4310_v34, 16  ;;  %v628_v5 = vshll.u32 %v4310_v34, 16  ;;  %v4205_v10 = vrot.slane %v2464_v21, 9 }
 0x206   :  { %v1008_v30 = vsel %vm5376_vm8, %v1003_v47, %v1007_v20  ;;  %v622_v12 = vor.u32 %v620_v16, %v619_v9  ;;  %v623_v36 = vrot.slane %v619_v9, 4  ;;  %v5735_v47 = vld [vmem:[#allocation2 + $0x84] sm:$0x1]  ;;  %v1016_v51 = vor.u32 %v1015_v24, %v1012_v4  ;;  %v1424_v24 = vld [vmem:[#allocation2] sm:$0xe] }
 0x207   :  { %v2204_v49 = vsel %vm5376_vm8, %v2199_v40, %v2203_v2  ;;  %v4108_v50 = vcombine.low %v994_v27, %v1008_v30  ;;  %v627_v38 = vrot.slane %v625_v39, 7  ;;  %v4204_v2 = vrot.slane %v2463_v46, 9  ;;  %v5048_v27 = vld [vmem:[#allocation2 + $0x14] sm:$0x1] }
 0x208   :  { %v4188_v62 = vcombine.low %v2204_v49, %v2218_v1  ;;  %v751_v28 = vsel %vm5439_vm10, %v622_v12, %v750_v13  ;;  %v754_v48 = vsel %vm5205_vm4, %v623_v36, %v753_v59  ;;  %v2531_v1 = vrot.slane %v5559_v8, 5  ;;  %v2460_v59 = vld [vmem:[#allocation2 + $0x20] sm:$0xe] }
 0x209   :  { %4519 = vmatprep.mubr.bf16.mxu0 %v4108_v50  ;;  %752 = vst [vmem:[#allocation2 + $0x88] sm:$0xf] %v751_v28  ;;  %755 = vst [vmem:[#allocation2 + $0x8c] sm:$0x1] %v754_v48  ;;  %v630_v22 = vor.u32 %v628_v5, %v627_v38  ;;  %v631_v43 = vrot.slane %v627_v38, 4  ;;  %v1019_v13 = vshll.u32 %v5735_v47, 16 }
 0x20a   :  { %4647 = vmatprep.mubr.bf16.mxu1 %v4188_v62  ;;  %v2535_v19 = vrot.slane %v5595_v31, 5  ;;  %v5760_v8 = vsel %vm5743_vm13, %v4204_v2, %v2531_v1  ;;  %v1017_v35 = vrot.slane %v1016_v51, 4  ;;  %v2457_v50 = vld [vmem:[#allocation2 + $0x8] sm:$0xe]  ;;  %v5769_v48 = vld [vmem:[#allocation2 + $0x4] sm:$0x1] }
 0x20b   :  { %v757_v40 = vsel %vm5439_vm10, %v630_v22, %v756_v23  ;;  %v760_v60 = vsel %vm5205_vm4, %v631_v43, %v759_v3  ;;  %v5772_v5 = vld [vmem:[#allocation2 + $0xc] sm:$0x1]  ;;  %v1021_v3 = vrot.slane %v1019_v13, 5  ;;  %v4198_v21 = vrot.slane %v2457_v50, 9  ;;  %v2458_v1 = vld [vmem:[#allocation2 + $0x10] sm:$0xe] }
 0x20c   :  { %758 = vst [vmem:[#allocation2 + $0x90] sm:$0xf] %v757_v40  ;;  %761 = vst [vmem:[#allocation2 + $0x94] sm:$0x1] %v760_v60  ;;  %v5766_v62 = vsel %vm5743_vm13, %v4205_v10, %v2535_v19  ;;  %v5051_v23 = vld [vmem:[#allocation2 + $0x8] sm:$0xf] }
 0x20d   :  { %v1022_v10 = vsel %vm5376_vm8, %v1017_v35, %v1021_v3  ;;  %v1485_v35 = vrot.slane %v5048_v27, 5  ;;  %v6240_v63 = vrot.slane %v5769_v48, 5 }
 0x210   :  { %v5750_v14 = vld [vmem:[#allocation2 + $0x88] sm:$0xf]  ;;  %v5752_v9 = vld [vmem:[#allocation2 + $0x8c] sm:$0x1] }
 0x211   :  { %v2019_v16 = vld [vmem:[#allocation2 + $0x88] sm:$0xf]  ;;  %v1024_v55 = vshrl.u32 %v5750_v14, 16  ;;  %v1027_v30 = vshll.u32 %v5750_v14, 16  ;;  %v5762_v34 = vld [vmem:[#allocation2 + $0x8c] sm:$0x1] }
 0x212   :  { %v2220_v49 = vshrl.u32 %v2019_v16, 16  ;;  %v2223_v31 = vshll.u32 %v2019_v16, 16  ;;  %v1033_v39 = vshll.u32 %v5752_v9, 16  ;;  %v2229_v60 = vshll.u32 %v5762_v34, 16 }
 0x213   :  { %v1026_v12 = vrot.slane %v1024_v55, 4  ;;  %v1029_v36 = vrot.slane %v1027_v30, 5  ;;  %v2021_v43 = vld [vmem:[#allocation2 + $0x90] sm:$0xf]  ;;  %v5777_v46 = vld [vmem:[#allocation2 + $0x94] sm:$0x1] }
 0x214   :  { %v2222_v28 = vrot.slane %v2220_v49, 4  ;;  %v2225_v4 = vrot.slane %v2223_v31, 5  ;;  %v2234_v51 = vshrl.u32 %v2021_v43, 16  ;;  %v2237_v2 = vshll.u32 %v2021_v43, 16  ;;  %v5046_v55 = vld [vmem:[#allocation2 + $0xc] sm:$0x1] }
 0x215   :  { %v1030_v22 = vor.u32 %v1029_v36, %v1026_v12  ;;  %v1035_v16 = vrot.slane %v1033_v39, 5  ;;  %v2507_v30 = vrot.slane %v5046_v55, 5  ;;  %v2243_v12 = vshll.u32 %v5777_v46, 16  ;;  %v2459_v36 = vld [vmem:[#allocation2 + $0x18] sm:$0xe] }
 0x216   :  { %v2226_v40 = vor.u32 %v2225_v4, %v2222_v28  ;;  %v2236_v13 = vrot.slane %v2234_v51, 4  ;;  %v2239_v31 = vrot.slane %v2237_v2, 5  ;;  %v4199_v28 = vrot.slane %v2458_v1, 9  ;;  %v5047_v4 = vld [vmem:[#allocation2 + $0x14] sm:$0x1] }
 0x217   :  { %v1031_v19 = vrot.slane %v1030_v22, 4  ;;  %v2511_v43 = vrot.slane %v5047_v4, 5  ;;  %v2231_v39 = vrot.slane %v2229_v60, 5  ;;  %v2461_v55 = vld [vmem:[#allocation2 + $0x28] sm:$0xe]  ;;  %v2508_v29 = vsel %vm5743_vm13, %v4198_v21, %v2507_v30 }
 0x218   :  { %v2227_v49 = vrot.slane %v2226_v40, 4  ;;  %v2240_v22 = vor.u32 %v2239_v31, %v2236_v13  ;;  %v5049_v40 = vld [vmem:[#allocation2 + $0x1c] sm:$0x1]  ;;  %v5050_v2 = vld [vmem:[#allocation2] sm:$0xf]  ;;  %v4202_v21 = vrot.slane %v2461_v55, 9 }
 0x219   :  { %v1036_v50 = vsel %vm5376_vm8, %v1031_v19, %v1035_v16  ;;  %v1489_v51 = vrot.slane %v5049_v40, 5  ;;  %v4118_v38 = vcombine.low %v5050_v2, %v5051_v23  ;;  %v4200_v19 = vrot.slane %v2459_v36, 9  ;;  %v2462_v1 = vld [vmem:[#allocation2 + $0x30] sm:$0xe]  ;;  %v1425_v16 = vld [vmem:[#allocation2 + $0x8] sm:$0xe] }
 0x21a   :  { %v4109_v3 = vcombine.low %v1022_v10, %v1036_v50  ;;  %v2232_v4 = vsel %vm5376_vm8, %v2227_v49, %v2231_v39  ;;  %v2241_v27 = vrot.slane %v2240_v22, 4  ;;  %v2245_v10 = vrot.slane %v2243_v12, 5  ;;  %v5052_v60 = vld [vmem:[#allocation2 + $0x1c] sm:$0x1]  ;;  %v1426_v31 = vld [vmem:[#allocation2 + $0x10] sm:$0xe] }
 0x21b   :  { %v2515_v13 = vrot.slane %v5052_v60, 5  ;;  %v2512_v50 = vsel %vm5743_vm13, %v4199_v28, %v2511_v43  ;;  %v4201_v23 = vrot.slane %v2460_v59, 9  ;;  %v5053_v40 = vld [vmem:[#allocation2 + $0x24] sm:$0x1]  ;;  %v1427_v30 = vld [vmem:[#allocation2 + $0x18] sm:$0xe] }
 0x21c   :  { %4520 = vmatmul.mubr.bf16.gmra.mrb[12].mxu0 %v4109_v3  ;;  %v2519_v2 = vrot.slane %v5053_v40, 5  ;;  %v2246_v36 = vsel %vm5376_vm8, %v2241_v27, %v2245_v10  ;;  %v2523_v3 = vrot.slane %v5520_v25, 5  ;;  %v4134_v49 = vrot.slane %v1424_v24, 9  ;;  %v5054_v55 = vld [vmem:[#allocation2 + $0x10] sm:$0xf] }
 0x21d   :  { %4539 = vmatprep.mubr.bf16.mxu0 %v4118_v38  ;;  %v4189_v39 = vcombine.low %v2232_v4, %v2246_v36  ;;  %v4203_v12 = vrot.slane %v2462_v1, 9  ;;  %v2527_v22 = vrot.slane %v5525_v44, 5  ;;  %v4135_v60 = vrot.slane %v1425_v16, 9  ;;  %v5055_v27 = vld [vmem:[#allocation2 + $0x18] sm:$0xf] }
 0x21e   :  { %v4214_v38 = vcombine.low %v2508_v29, %v2512_v50  ;;  %v5799_v59 = vsel %vm5743_vm13, %v4134_v49, %v6240_v63  ;;  %v4136_v28 = vrot.slane %v1426_v31, 9  ;;  %v4137_v43 = vrot.slane %v1427_v30, 9  ;;  %v5056_v25 = vld [vmem:[#allocation2 + $0x20] sm:$0xf]  ;;  %v5057_v24 = vld [vmem:[#allocation2 + $0x28] sm:$0xf] }
 0x21f   :  { %4648 = vmatmul.mubr.bf16.gmra.mrb[28].mxu1 %v4189_v39  ;;  %v4119_v10 = vcombine.low %v5054_v55, %v5055_v27  ;;  %v4120_v4 = vcombine.low %v5056_v25, %v5057_v24  ;;  %v6241_v1 = vrot.slane %v5772_v5, 5  ;;  %v2516_v44 = vsel %vm5743_vm13, %v4200_v19, %v2515_v13  ;;  %v4977_v63 = vld [vmem:[#allocation3 + $0x88] sm:$0xff]   ;;  %v1434_v40 = vld [vmem:[#allocation2 + $0x60] sm:$0xe]  ;;  %v1436_v49 = vld [vmem:[#allocation2 + $0x70] sm:$0xe] }
 0x220   :  { %4667 = vmatprep.mubr.bf16.mxu1 %v4214_v38  ;;  %v5813_v16 = vsel %vm5743_vm13, %v4136_v28, %v1485_v35  ;;  %v5817_v31 = vsel %vm5743_vm13, %v4137_v43, %v1489_v51  ;;  %v2520_v5 = vsel %vm5743_vm13, %v4201_v23, %v2519_v2  ;;  %v2524_v50 = vsel %vm5743_vm13, %v4202_v21, %v2523_v3  ;;  %v2465_v35 = vld [vmem:[#allocation2 + $0x58] sm:$0xe]  ;;  %v2466_v30 = vld [vmem:[#allocation2 + $0x60] sm:$0xe]  ;;  %v4976_v51 = vld [vmem:[#allocation3 + $0x188] sm:$0xff]  }
 0x221   :  { %v5805_v29 = vsel %vm5743_vm13, %v4135_v60, %v6241_v1  ;;  %v2528_v19 = vsel %vm5743_vm13, %v4203_v12, %v2527_v22  ;;  %v4151_v13 = vcombine.low %v5813_v16, %v5817_v31  ;;  %v1435_v36 = vld [vmem:[#allocation2 + $0x68] sm:$0xe]  ;;  %v4215_v23 = vcombine.low %v2516_v44, %v2520_v5  ;;  %v4980_v21 = vld [vmem:[#allocation3 + $0x90] sm:$0xff]   ;;  %v1437_v22 = vld [vmem:[#allocation2 + $0x78] sm:$0xe] }
 0x222   :  { %v4150_v48 = vcombine.low %v5799_v59, %v5805_v29  ;;  %v4216_v2 = vcombine.low %v2524_v50, %v2528_v19  ;;  %v5058_v3 = vld [vmem:[#allocation2 + $0x50] sm:$0xf]  ;;  %v4144_v12 = vrot.slane %v1434_v40, 9  ;;  %v1438_v60 = vld [vmem:[#allocation2 + $0x80] sm:$0xe]  ;;  %v4206_v38 = vrot.slane %v2465_v35, 9 }
 0x223   :  { %v4122_v39 = vcombine.low %v5058_v3, %v5617_v32  ;;  %v2539_v28 = vrot.slane %v5611_v33, 5  ;;  %v4207_v43 = vrot.slane %v2466_v30, 9  ;;  %v1517_v55 = vrot.slane %v5649_v45, 5  ;;  %v4983_v45 = vld [vmem:[#allocation3 + $0x98] sm:$0xff]   ;;  %v4978_v5 = vld [vmem:[#allocation3 + $0x190] sm:$0xff]   ;;  %v5001_v29 = vld [vmem:[#allocation3 + $0xc8] sm:$0xff]  }
 0x224   :  { %4540 = vmatmul.mubr.bf16.vlgmr.msra.gmra.mrb[0].mxu0 %v4119_v10  ;;  %v2543_v27 = vrot.slane %v5644_v26, 5  ;;  %v4145_v10 = vrot.slane %v1435_v36, 9  ;;  %v1521_v25 = vrot.slane %v5659_v53, 5  ;;  %v4146_v24 = vrot.slane %v1436_v49, 9  ;;  %v2467_v19 = vld [vmem:[#allocation2 + $0x68] sm:$0xe] }
 0x225   :  { %4543 = vmatprep.mubr.bf16.mxu0 %v4120_v4  ;;  %4556 = vmatpush3.bf16.msra.mxu0 %v5602_v18  ;;  %v1439_v18 = vld [vmem:[#allocation2 + $0x88] sm:$0xe]  ;;  %v5835_v32 = vsel %vm5743_vm13, %v4144_v12, %v1517_v55  ;;  %v1525_v4 = vrot.slane %v5699_v57, 5  ;;  %v4147_v1 = vrot.slane %v1437_v22, 9  ;;  %v1529_v33 = vrot.slane %v5713_v54, 5  ;;  %v5003_v31 = vld [vmem:[#allocation3 + $0xd0] sm:$0xff]  }
 0x226   :  { %4557 = vmatprep.subr.bf16.mxu0 %v4977_v63  ;;  %v5842_v26 = vsel %vm5743_vm13, %v4145_v10, %v1521_v25  ;;  %v4148_v53 = vrot.slane %v1438_v60, 9  ;;  %v1533_v44 = vrot.slane %v5735_v47, 5  ;;  %v1537_v50 = vrot.slane %v5752_v9, 5  ;;  %v2468_v36 = vld [vmem:[#allocation2 + $0x70] sm:$0xe] }
 0x227   :  { %4668 = vmatmul.mubr.bf16.vlgmr.msra.gmra.mrb[16].mxu1 %v4215_v23  ;;  %v4155_v57 = vcombine.low %v5835_v32, %v5842_v26  ;;  %v5849_v54 = vsel %vm5743_vm13, %v4146_v24, %v1525_v4  ;;  %v6242_v47 = vcombine.low %v5530_v11, %v5539_v7  ;;  %v2540_v30 = vsel %vm5743_vm13, %v4206_v38, %v2539_v28  ;;  %v2469_v7 = vld [vmem:[#allocation2 + $0x78] sm:$0xe]  ;;  %v2470_v49 = vld [vmem:[#allocation2 + $0x80] sm:$0xe]  ;;  %v4992_v25 = vld [vmem:[#allocation3 + $0xb0] sm:$0xff]  }
 0x228   :  { %4684 = vmatpush3.bf16.msra.mxu1 %v5626_v15  ;;  %4671 = vmatprep.mubr.bf16.mxu1 %v4216_v2  ;;  %v5853_v15 = vsel %vm5743_vm13, %v4147_v1, %v1529_v33  ;;  %v5863_v35 = vsel %vm5743_vm13, %v4148_v53, %v1533_v44  ;;  %v2544_v9 = vsel %vm5743_vm13, %v4207_v43, %v2543_v27  ;;  %v4982_v2 = vld [vmem:[#allocation3 + $0x198] sm:$0xff]   ;;  %v4208_v3 = vrot.slane %v2467_v19, 9  ;;  %v4984_v27 = vld [vmem:[#allocation3 + $0x1a0] sm:$0xff]   ;;  %v1429_v53 = vld [vmem:[#allocation2 + $0x28] sm:$0xe] }
 0x229   :  { %4558 = vmatpush3.bf16.msra.mxu0 %v4977_v63  ;;  %v4149_v63 = vrot.slane %v1439_v18, 9  ;;  %4685 = vmatprep.subr.bf16.mxu1 %v4976_v51  ;;  %v4156_v40 = vcombine.low %v5849_v54, %v5853_v15  ;;  %v2547_v12 = vrot.slane %v5674_v58, 5  ;;  %v4209_v22 = vrot.slane %v2468_v36, 9  ;;  %v4989_v18 = vld [vmem:[#allocation3 + $0xa8] sm:$0xff]   ;;  %v1433_v59 = vld [vmem:[#allocation2 + $0x58] sm:$0xe] }
 0x22a   :  { %4559 = vmatprep.subr.bf16.mxu0 %v4980_v21  ;;  %v2551_v60 = vrot.slane %v5678_v41, 5  ;;  %v6243_v38 = vcombine.low %v5760_v8, %v5766_v62  ;;  %v2555_v28 = vrot.slane %v5715_v56, 5  ;;  %v4211_v43 = vrot.slane %v2470_v49, 9  ;;  %v2471_v41 = vld [vmem:[#allocation2 + $0x88] sm:$0xe]  ;;  %v5015_v32 = vld [vmem:[#allocation3 + $0xf0] sm:$0xff]  }
 0x22b   :  { %v5871_v11 = vsel %vm5743_vm13, %v4149_v63, %v1537_v50  ;;  %v2559_v55 = vrot.slane %v5695_v17, 5  ;;  %v4124_v58 = vcombine.low %v5680_v61, %v5693_v42  ;;  %v6244_v8 = vcombine.low %v5638_v6, %v5647_v52  ;;  %v2472_v62 = vld [vmem:[#allocation2 + $0x90] sm:$0xe]  ;;  %v4988_v52 = vld [vmem:[#allocation3 + $0x1a8] sm:$0xff]   ;;  %v4995_v63 = vld [vmem:[#allocation3 + $0xb8] sm:$0xff]  }
 0x22c   :  { %4544 = vmatmul.mubr.bf16.gmra.mrb[4].mxu0 %v6242_v47  ;;  %4686 = vmatpush3.bf16.msra.mxu1 %v4976_v51  ;;  %v4157_v23 = vcombine.low %v5863_v35, %v5871_v11  ;;  %v4210_v51 = vrot.slane %v2469_v7, 9  ;;  %v2548_v56 = vsel %vm5743_vm13, %v4208_v3, %v2547_v12  ;;  %v2552_v17 = vsel %vm5743_vm13, %v4209_v22, %v2551_v60  ;;  %v5059_v47 = vld [vmem:[#allocation2 + $0x24] sm:$0x1]  ;;  %v1430_v49 = vld [vmem:[#allocation2 + $0x30] sm:$0xe] }
 0x22d   :  { %4547 = vmatprep.mubr.bf16.mxu0 %v4122_v39  ;;  %4560 = vmatpush3.bf16.msra.mxu0 %v4980_v21  ;;  %v4986_v21 = vld [vmem:[#allocation3 + $0xa0] sm:$0xff]   ;;  %v4218_v39 = vcombine.low %v2540_v30, %v2544_v9  ;;  %v2560_v61 = vsel %vm5743_vm13, %v4211_v43, %v2559_v55  ;;  %v4212_v42 = vrot.slane %v2471_v41, 9  ;;  %v4219_v6 = vcombine.low %v2548_v56, %v2552_v17  ;;  %v5060_v9 = vld [vmem:[#allocation2 + $0x2c] sm:$0x1]  ;;  %v1432_v12 = vld [vmem:[#allocation2 + $0x50] sm:$0xe] }
 0x22e   :  { %4561 = vmatprep.subr.bf16.mxu0 %v4983_v45  ;;  %4687 = vmatprep.subr.bf16.mxu1 %v4978_v5  ;;  %v2556_v10 = vsel %vm5743_vm13, %v4210_v51, %v2555_v28  ;;  %v2563_v24 = vrot.slane %v5762_v34, 5  ;;  %v4213_v4 = vrot.slane %v2472_v62, 9  ;;  %v2567_v1 = vrot.slane %v5777_v46, 5  ;;  %v4997_v7 = vld [vmem:[#allocation3 + $0xc0] sm:$0xff]   ;;  %v5062_v43 = vld [vmem:[#allocation2 + $0x3c] sm:$0x1] }
 0x22f   :  { %4672 = vmatmul.mubr.bf16.gmra.mrb[20].mxu1 %v6243_v38  ;;  %v4220_v33 = vcombine.low %v2556_v10, %v2560_v61  ;;  %v4125_v44 = vcombine.low %v5719_v0, %v5750_v14  ;;  %v1493_v19 = vrot.slane %v5059_v47, 5  ;;  %v4139_v30 = vrot.slane %v1429_v53, 9  ;;  %v4994_v14 = vld [vmem:[#allocation3 + $0x1b8] sm:$0xff]   ;;  %v4996_v22 = vld [vmem:[#allocation3 + $0x1c0] sm:$0xff]   ;;  %v5061_v38 = vld [vmem:[#allocation2 + $0x34] sm:$0x1] }
 0x230   :  { %4688 = vmatpush3.bf16.msra.mxu1 %v4978_v5  ;;  %4675 = vmatprep.mubr.bf16.mxu1 %v4218_v39  ;;  %v4990_v5 = vld [vmem:[#allocation3 + $0x1b0] sm:$0xff]   ;;  %v2564_v34 = vsel %vm5743_vm13, %v4212_v42, %v2563_v24  ;;  %v2568_v46 = vsel %vm5743_vm13, %v4213_v4, %v2567_v1  ;;  %v1497_v36 = vrot.slane %v5060_v9, 5  ;;  %v1431_v39 = vld [vmem:[#allocation2 + $0x38] sm:$0xe]  ;;  %v1501_v51 = vrot.slane %v5061_v38, 5  ;;  %v5000_v10 = vld [vmem:[#allocation3 + $0x1c8] sm:$0xff]  }
 0x231   :  { %4562 = vmatpush3.bf16.msra.mxu0 %v4983_v45  ;;  %4689 = vmatprep.subr.bf16.mxu1 %v4982_v2  ;;  %v1428_v45 = vld [vmem:[#allocation2 + $0x20] sm:$0xe]  ;;  %v4221_v0 = vcombine.low %v2564_v34, %v2568_v46  ;;  %v4141_v28 = vrot.slane %v1431_v39, 9  ;;  %v1505_v55 = vrot.slane %v5062_v43, 5  ;;  %v4143_v41 = vrot.slane %v1433_v59, 9  ;;  %v5002_v53 = vld [vmem:[#allocation3 + $0x1d0] sm:$0xff]  }
 0x232   :  { %4563 = vmatprep.subr.bf16.mxu0 %v4986_v21  ;;  %v4138_v50 = vrot.slane %v1428_v45, 9  ;;  %v1498_v3 = vsel %vm5743_vm13, %v4139_v30, %v1497_v36  ;;  %v3022_v17 = vld [vmem:[#allocation2 + $0x10] sm:$0xf]  ;;  %v4998_v62 = vld [vmem:[#allocation2 + $0x20] ss:$8 sps:$4 sm:$0xff]  }
 0x233   :  { %v1506_v16 = vsel %vm5743_vm13, %v4141_v28, %v1505_v55  ;;  %v3058_v24 = vshll.u32 %v3022_v17, 16  ;;  %v3026_v4 = vld [vmem:[#allocation2 + $0x20] sm:$0xf]  ;;  %v3028_v45 = vld [vmem:[#allocation2 + $0x28] sm:$0xf] }
 0x234   :  { %4548 = vmatmul.mubr.bf16.gmra.mrb[8].mxu0 %v6244_v8  ;;  %4690 = vmatpush3.bf16.msra.mxu1 %v4982_v2  ;;  %v4993_v2 = vld [vmem:[#allocation2 + $0x10] ss:$8 sps:$4 sm:$0xff]   ;;  %v3086_v47 = vshll.u32 %v3026_v4, 16  ;;  %v3097_v30 = vshrl.u32 %v3028_v45, 16  ;;  %v3100_v9 = vshll.u32 %v3028_v45, 16  ;;  %v5013_v28 = vld [vmem:[#allocation3 + $0xe8] sm:$0xff]  }
 0x235   :  { %4551 = vmatprep.mubr.bf16.mxu0 %v4124_v58  ;;  %4564 = vmatpush3.bf16.msra.mxu0 %v4986_v21  ;;  %v1494_v21 = vsel %vm5743_vm13, %v4138_v50, %v1493_v19  ;;  %v6245_v8 = vld [vmem:[#allocation10_spill] sm:$0xff]  ;;  %v3060_v46 = vrot.slane %v3058_v24, 5  ;;  %v3083_v50 = vshrl.u32 %v3026_v4, 16  ;;  %v5004_v36 = vld [vmem:[#allocation2 + $0x40] ss:$8 sps:$4 sm:$0xff]  }
 0x236   :  { %4565 = vmatprep.subr.bf16.mxu0 %v4989_v18  ;;  %4691 = vmatprep.subr.bf16.mxu1 %v4984_v27  ;;  %v4152_v60 = vcombine.low %v1494_v21, %v1498_v3  ;;  %v1513_v56 = vrot.slane %v6245_v8, 5  ;;  %v5006_v19 = vld [vmem:[#allocation3 + $0x1d8] sm:$0xff]   ;;  %v5005_v3 = vld [vmem:[#allocation2 + $0x60] ss:$8 sps:$4 sm:$0xff]   ;;  %v5936_v8 = vld [vmem:[#allocation2 + $0x2c] sm:$0x1] }
 0x237   :  { %4676 = vmatmul.mubr.bf16.gmra.mrb[24].mxu1 %v4219_v6  ;;  %v3085_v59 = vrot.slane %v3083_v50, 4  ;;  %v5008_v55 = vld [vmem:[#allocation3 + $0x1e0] sm:$0xff]   ;;  %v3106_v15 = vshll.u32 %v5936_v8, 16  ;;  %v5014_v50 = vld [vmem:[#allocation3 + $0x1f0] sm:$0xff]   ;;  %v5970_v35 = vld [vmem:[#allocation2 + $0x4c] sm:$0x1] }
 0x238   :  { %4692 = vmatpush3.bf16.msra.mxu1 %v4984_v27  ;;  %4679 = vmatprep.mubr.bf16.mxu1 %v4220_v33  ;;  %v5063_v27 = vld [vmem:[#allocation2 + $0x54] sm:$0x1]  ;;  %v1514_v6 = vsel %vm5743_vm13, %v4143_v41, %v1513_v56  ;;  %v5007_v33 = vld [vmem:[#allocation3 + $0xd8] sm:$0xff]   ;;  %v5011_v4 = vld [vmem:[#allocation2 + $0x80] ss:$8 sps:$4 sm:$0xff]  }
 0x239   :  { %4566 = vmatpush3.bf16.msra.mxu0 %v4989_v18  ;;  %4693 = vmatprep.subr.bf16.mxu1 %v4988_v52  ;;  %v4142_v18 = vrot.slane %v1432_v12, 9  ;;  %v1509_v58 = vrot.slane %v5063_v27, 5  ;;  %v5926_v12 = vld [vmem:[#allocation2 + $0x24] sm:$0x1] }
 0x23a   :  { %4567 = vmatprep.subr.bf16.mxu0 %v4992_v25 }
 0x23b   :  { %v1510_v42 = vsel %vm5743_vm13, %v4142_v18, %v1509_v58  ;;  %v3092_v58 = vshll.u32 %v5926_v12, 16 }
 0x23c   :  { %4552 = vmatmul.mubr.bf16.gmra.mrb[12].mxu0 %v4125_v44  ;;  %4694 = vmatpush3.bf16.msra.mxu1 %v4988_v52  ;;  %v3024_v52 = vld [vmem:[#allocation2 + $0x18] sm:$0xf]  ;;  %v4154_v44 = vcombine.low %v1510_v42, %v1514_v6  ;;  %v3034_v42 = vld [vmem:[#allocation2 + $0x40] sm:$0xf]  ;;  %v3036_v6 = vld [vmem:[#allocation2 + $0x48] sm:$0xf] }
 0x23d   :  { %4568 = vmatpush3.bf16.msra.mxu0 %v4992_v25  ;;  %4571 = vmatprep.mubr.bf16.mxu0 %v4150_v48  ;;  %v4140_v48 = vrot.slane %v1430_v49, 9  ;;  %v3055_v25 = vshrl.u32 %v3022_v17, 16  ;;  %v5924_v49 = vld [vmem:[#allocation2 + $0x1c] sm:$0x1]  ;;  %v5945_v54 = vrot.slane %v3092_v58, 5 }
 0x23e   :  { %4569 = vmatprep.subr.bf16.mxu0 %v4995_v63  ;;  %4695 = vmatprep.subr.bf16.mxu1 %v4990_v5  ;;  %v3078_v27 = vshll.u32 %v5924_v49, 16 }
 0x23f   :  { %4680 = vmatmul.mubr.bf16.gmra.mrb[28].mxu1 %v4221_v0  ;;  %v1502_v61 = vsel %vm5743_vm13, %v4140_v48, %v1501_v51  ;;  %v3057_v34 = vrot.slane %v3055_v25, 4  ;;  %v5009_v0 = vld [vmem:[#allocation3 + $0xe0] sm:$0xff]   ;;  %v3099_v48 = vrot.slane %v3097_v30, 4  ;;  %v3156_v30 = vshll.u32 %v3036_v6, 16 }
 0x240   :  { %4696 = vmatpush3.bf16.msra.mxu1 %v4990_v5  ;;  %4699 = vmatprep.mubr.bf16.mxu1 %v4993_v2  ;;  %v4153_v1 = vcombine.low %v1502_v61, %v1506_v16  ;;  %v3072_v5 = vshll.u32 %v3024_v52, 16  ;;  %v5012_v61 = vld [vmem:[#allocation3 + $0x1e8] sm:$0xff]   ;;  %v3080_v24 = vrot.slane %v3078_v27, 5  ;;  %v5018_v27 = vld [vmem:[#allocation3 + $0x1f8] sm:$0xff]  }
 0x241   :  { %4570 = vmatpush3.bf16.msra.mxu0 %v4995_v63  ;;  %4697 = vmatprep.subr.bf16.mxu1 %v4994_v14  ;;  %v3069_v63 = vshrl.u32 %v3024_v52, 16  ;;  %v3061_v39 = vor.u32 %v3060_v46, %v3057_v34  ;;  %v3038_v52 = vld [vmem:[#allocation2 + $0x60] sm:$0xf]  ;;  %v3139_v34 = vshrl.u32 %v3034_v42, 16  ;;  %v3142_v46 = vshll.u32 %v3034_v42, 16 }
 0x242   :  { %4587 = vmatprep.subr.bf16.mxu0 %v4997_v7  ;;  %v3074_v21 = vrot.slane %v3072_v5, 5 }
 0x243   :  { %v3071_v2 = vrot.slane %v3069_v63, 4  ;;  %v5934_v41 = vrot.slane %v3061_v39, 4  ;;  %v5952_v63 = vld [vmem:[#allocation2 + $0x3c] sm:$0x1]  ;;  %v3141_v11 = vrot.slane %v3139_v34, 4 }
 0x244   :  { %4572 = vmatmul.mubr.bf16.vlgmr.msra.gmra.mrb[0].mxu0 %v4151_v13  ;;  %4698 = vmatpush3.bf16.msra.mxu1 %v4994_v14  ;;  %v4999_v13 = vld [vmem:[#allocation2 + $0x30] ss:$8 sps:$4 sm:$0xff]  }
 0x245   :  { %4575 = vmatprep.mubr.bf16.mxu0 %v4152_v60  ;;  %4588 = vmatpush3.bf16.msra.mxu0 %v4997_v7  ;;  %v3030_v14 = vld [vmem:[#allocation2 + $0x30] sm:$0xf]  ;;  %v5922_v7 = vld [vmem:[#allocation2 + $0x14] sm:$0x1]  ;;  %v3032_v60 = vld [vmem:[#allocation2 + $0x38] sm:$0xf]  ;;  %v3075_v18 = vor.u32 %v3074_v21, %v3071_v2 }
 0x246   :  { %4589 = vmatprep.subr.bf16.mxu0 %v5001_v29  ;;  %4715 = vmatprep.subr.bf16.mxu1 %v4996_v22  ;;  %v3111_v38 = vshrl.u32 %v3030_v14, 16  ;;  %v3114_v51 = vshll.u32 %v3030_v14, 16  ;;  %v3064_v43 = vshll.u32 %v5922_v7, 16  ;;  %v3125_v17 = vshrl.u32 %v3032_v60, 16 }
 0x247   :  { %4700 = vmatmul.mubr.bf16.vlgmr.msra.gmra.mrb[16].mxu1 %v4998_v62  ;;  %v3128_v62 = vshll.u32 %v3032_v60, 16  ;;  %v3076_v25 = vrot.slane %v3075_v18, 4  ;;  %v3108_v14 = vrot.slane %v3106_v15, 5 }
 0x248   :  { %4716 = vmatpush3.bf16.msra.mxu1 %v4996_v22  ;;  %4703 = vmatprep.mubr.bf16.mxu1 %v4999_v13  ;;  %v3102_v22 = vrot.slane %v3100_v9, 5  ;;  %v3116_v13 = vrot.slane %v3114_v51, 5  ;;  %v5941_v26 = vrot.slane %v3064_v43, 5  ;;  %v3127_v45 = vrot.slane %v3125_v17, 4  ;;  %v5016_v51 = vld [vmem:[#allocation2 + $0x90] ss:$8 sps:$4 sm:$0xff]  }
 0x249   :  { %4590 = vmatpush3.bf16.msra.mxu0 %v5001_v29  ;;  %4717 = vmatprep.subr.bf16.mxu1 %v5000_v10  ;;  %v3088_v29 = vrot.slane %v3086_v47, 5  ;;  %v5019_v47 = vld [vmem:[#allocation3 + $0xf8] sm:$0xff]   ;;  %v3167_v9 = vshrl.u32 %v3038_v52, 16  ;;  %v3081_v39 = vsel %vm5376_vm8, %v3076_v25, %v3080_v24  ;;  %v3158_v43 = vrot.slane %v3156_v30, 5  ;;  %v3042_v17 = vld [vmem:[#allocation2 + $0x70] sm:$0xf] }
 0x24a   :  { %4591 = vmatprep.subr.bf16.mxu0 %v5003_v31  ;;  %v3103_v16 = vor.u32 %v3102_v22, %v3099_v48  ;;  %v3134_v48 = vshll.u32 %v5952_v63, 16  ;;  %v5964_v22 = vld [vmem:[#allocation2 + $0x44] sm:$0x1]  ;;  %v3195_v15 = vshrl.u32 %v3042_v17, 16 }
 0x24b   :  { %v3089_v56 = vor.u32 %v3088_v29, %v3085_v59 }
 0x24c   :  { %4576 = vmatmul.mubr.bf16.gmra.mrb[4].mxu0 %v4153_v1  ;;  %4718 = vmatpush3.bf16.msra.mxu1 %v5000_v10  ;;  %v5010_v10 = vld [vmem:[#allocation2 + $0x70] ss:$8 sps:$4 sm:$0xff]   ;;  %v3067_v1 = vsel %vm5376_vm8, %v5934_v41, %v5941_v26  ;;  %v3148_v26 = vshll.u32 %v5964_v22, 16 }
 0x24d   :  { %4579 = vmatprep.mubr.bf16.mxu0 %v4154_v44  ;;  %4592 = vmatpush3.bf16.msra.mxu0 %v5003_v31  ;;  %v3113_v31 = vrot.slane %v3111_v38, 4  ;;  %v3104_v44 = vrot.slane %v3103_v16, 4 }
 0x24e   :  { %4593 = vmatprep.subr.bf16.mxu0 %v5007_v33  ;;  %4719 = vmatprep.subr.bf16.mxu1 %v5002_v53 }
 0x24f   :  { %4704 = vmatmul.mubr.bf16.gmra.mrb[20].mxu1 %v5004_v36  ;;  %v3117_v5 = vor.u32 %v3116_v13, %v3113_v31  ;;  %v3170_v36 = vshll.u32 %v3038_v52, 16  ;;  %v3109_v60 = vsel %vm5376_vm8, %v3104_v44, %v3108_v14  ;;  %v3162_v31 = vshll.u32 %v5970_v35, 16  ;;  %v3044_v13 = vld [vmem:[#allocation2 + $0x78] sm:$0xf]  ;;  %v5979_v52 = vld [vmem:[#allocation2 + $0x6c] sm:$0x1] }
 0x250   :  { %4720 = vmatpush3.bf16.msra.mxu1 %v5002_v53  ;;  %4707 = vmatprep.mubr.bf16.mxu1 %v5005_v3  ;;  %v3130_v53 = vrot.slane %v3128_v62, 5  ;;  %v4246_v62 = vcombine.low %v3067_v1, %v3081_v39  ;;  %v5020_v1 = vld [vmem:[#allocation3 + $0x200] sm:$0xff]   ;;  %v3209_v44 = vshrl.u32 %v3044_v13, 16 }
 0x251   :  { %4594 = vmatpush3.bf16.msra.mxu0 %v5007_v33  ;;  %4721 = vmatprep.subr.bf16.mxu1 %v5006_v19  ;;  %v3090_v33 = vrot.slane %v3089_v56, 4  ;;  %v5968_v38 = vrot.slane %v3117_v5, 4  ;;  %v3172_v18 = vrot.slane %v3170_v36, 5  ;;  %v3212_v5 = vshll.u32 %v3044_v13, 16  ;;  %v5995_v13 = vld [vmem:[#allocation2 + $0x7c] sm:$0x1] }
 0x252   :  { %4595 = vmatprep.subr.bf16.mxu0 %v5009_v0  ;;  %v3131_v29 = vor.u32 %v3130_v53, %v3127_v45  ;;  %v3198_v53 = vshll.u32 %v3042_v17, 16 }
 0x253   :  { %v3095_v59 = vsel %vm5376_vm8, %v3090_v33, %v5945_v54  ;;  %v5022_v33 = vld [vmem:[#allocation2 + $0x28] ss:$8 sps:$4 sm:$0xff]  }
 0x254   :  { %4580 = vmatmul.mubr.bf16.gmra.mrb[8].mxu0 %v4155_v57  ;;  %4722 = vmatpush3.bf16.msra.mxu1 %v5006_v19  ;;  %v5943_v57 = vld [vmem:[#allocation2 + $0x34] sm:$0x1]  ;;  %v3153_v19 = vshrl.u32 %v3036_v6, 16  ;;  %v3132_v16 = vrot.slane %v3131_v29, 4  ;;  %v5977_v6 = vld [vmem:[#allocation2 + $0x64] sm:$0x1] }
 0x255   :  { %4583 = vmatprep.mubr.bf16.mxu0 %v4156_v40  ;;  %4596 = vmatpush3.bf16.msra.mxu0 %v5009_v0  ;;  %v3040_v40 = vld [vmem:[#allocation2 + $0x68] sm:$0xf]  ;;  %v3120_v2 = vshll.u32 %v5943_v57, 16  ;;  %v3211_v29 = vrot.slane %v3209_v44, 4 }
 0x256   :  { %4597 = vmatprep.subr.bf16.mxu0 %v5013_v28  ;;  %4723 = vmatprep.subr.bf16.mxu1 %v5008_v55  ;;  %v5017_v0 = vld [vmem:[#allocation2 + $0x8] ss:$8 sps:$4 sm:$0xff]   ;;  %v3181_v21 = vshrl.u32 %v3040_v40, 16  ;;  %v3184_v3 = vshll.u32 %v3040_v40, 16  ;;  %v3046_v40 = vld [vmem:[#allocation2 + $0x80] sm:$0xf] }
 0x257   :  { %4708 = vmatmul.mubr.bf16.gmra.mrb[24].mxu1 %v5010_v10  ;;  %v3122_v58 = vrot.slane %v3120_v2, 5  ;;  %v5021_v10 = vld [vmem:[#allocation2 + $0x18] ss:$8 sps:$4 sm:$0xff]   ;;  %v3226_v30 = vshll.u32 %v3046_v40, 16 }
 0x258   :  { %4724 = vmatpush3.bf16.msra.mxu1 %v5008_v55  ;;  %4711 = vmatprep.mubr.bf16.mxu1 %v5011_v4  ;;  %v3169_v55 = vrot.slane %v3167_v9, 4  ;;  %v3183_v41 = vrot.slane %v3181_v21, 4  ;;  %v3186_v56 = vrot.slane %v3184_v3, 5  ;;  %v3048_v4 = vld [vmem:[#allocation2 + $0x88] sm:$0xf]  ;;  %v3197_v21 = vrot.slane %v3195_v15, 4 }
 0x259   :  { %4598 = vmatpush3.bf16.msra.mxu0 %v5013_v28  ;;  %4725 = vmatprep.subr.bf16.mxu1 %v5012_v61  ;;  %v3155_v28 = vrot.slane %v3153_v19, 4  ;;  %v3123_v42 = vsel %vm5376_vm8, %v5968_v38, %v3122_v58  ;;  %v3223_v19 = vshrl.u32 %v3046_v40, 16  ;;  %v3237_v9 = vshrl.u32 %v3048_v4, 16  ;;  %v5023_v3 = vld [vmem:[#allocation3 + $0x208] sm:$0xff]   ;;  %v5024_v58 = vld [vmem:[#allocation3 + $0x210] sm:$0xff]  }
 0x25a   :  { %4599 = vmatprep.subr.bf16.mxu0 %v5015_v32  ;;  %v3173_v54 = vor.u32 %v3172_v18, %v3169_v55  ;;  %v3187_v45 = vor.u32 %v3186_v56, %v3183_v41  ;;  %v3240_v36 = vshll.u32 %v3048_v4, 16  ;;  %v3150_v38 = vrot.slane %v3148_v26, 5  ;;  %v5025_v41 = vld [vmem:[#allocation2 + $0x38] ss:$8 sps:$4 sm:$0xff]   ;;  %v5999_v26 = vld [vmem:[#allocation2 + $0x8c] sm:$0x1] }
 0x25b   :  { %v3159_v24 = vor.u32 %v3158_v43, %v3155_v28  ;;  %v3225_v28 = vrot.slane %v3223_v19, 4  ;;  %v3228_v43 = vrot.slane %v3226_v30, 5  ;;  %v3239_v55 = vrot.slane %v3237_v9, 4 }
 0x25c   :  { %4584 = vmatmul.mubr.bf16.gmra.mrb[12].mxu0 %v4157_v23  ;;  %v3144_v23 = vrot.slane %v3142_v46, 5  ;;  %4726 = vmatpush3.bf16.msra.mxu1 %v5012_v61  ;;  %v4247_v61 = vcombine.low %v3095_v59, %v3109_v60  ;;  %v3164_v46 = vrot.slane %v3162_v31, 5  ;;  %v3174_v2 = vrot.slane %v3173_v54, 4 }
 0x25d   :  { %4600 = vmatpush3.bf16.msra.mxu0 %v5015_v32  ;;  %4603 = vmatprep.mubr.bf16.mxu0 %v5017_v0  ;;  %v3136_v32 = vrot.slane %v3134_v48, 5  ;;  %v3160_v14 = vrot.slane %v3159_v24, 4  ;;  %v3188_v39 = vrot.slane %v3187_v45, 4  ;;  %v3200_v59 = vrot.slane %v3198_v53, 5 }
 0x25e   :  { %4601 = vmatprep.subr.bf16.mxu0 %v5019_v47  ;;  %4727 = vmatprep.subr.bf16.mxu1 %v5014_v50  ;;  %v3145_v25 = vor.u32 %v3144_v23, %v3141_v11  ;;  %v3214_v48 = vrot.slane %v3212_v5, 5  ;;  %v3242_v18 = vrot.slane %v3240_v36, 5  ;;  %v3229_v4 = vor.u32 %v3228_v43, %v3225_v28  ;;  %v5027_v5 = vld [vmem:[#allocation3 + $0x218] sm:$0xff]  }
 0x25f   :  { %4712 = vmatmul.mubr.bf16.gmra.mrb[28].mxu1 %v5016_v51  ;;  %v3137_v34 = vsel %vm5376_vm8, %v3132_v16, %v3136_v32  ;;  %v3050_v51 = vld [vmem:[#allocation2 + $0x90] sm:$0xf]  ;;  %v3165_v17 = vsel %vm5376_vm8, %v3160_v14, %v3164_v46  ;;  %v5997_v32 = vld [vmem:[#allocation2 + $0x84] sm:$0x1]  ;;  %v3218_v45 = vshll.u32 %v5995_v13, 16 }
 0x260   :  { %4728 = vmatpush3.bf16.msra.mxu1 %v5014_v50  ;;  %4731 = vmatprep.mubr.bf16.mxu1 %v4246_v62  ;;  %v3176_v50 = vshll.u32 %v5977_v6, 16  ;;  %v3146_v0 = vrot.slane %v3145_v25, 4  ;;  %v4248_v60 = vcombine.low %v3123_v42, %v3137_v34  ;;  %v5989_v62 = vld [vmem:[#allocation2 + $0x74] sm:$0x1]  ;;  %v3215_v42 = vor.u32 %v3214_v48, %v3211_v29 }
 0x261   :  { %4602 = vmatpush3.bf16.msra.mxu0 %v5019_v47  ;;  %4729 = vmatprep.subr.bf16.mxu1 %v5018_v27  ;;  %v3190_v47 = vshll.u32 %v5979_v52, 16  ;;  %v3251_v25 = vshrl.u32 %v3050_v51, 16  ;;  %v3254_v24 = vshll.u32 %v3050_v51, 16  ;;  %v3204_v40 = vshll.u32 %v5989_v62, 16 }
 0x262   :  { %v3178_v11 = vrot.slane %v3176_v50, 5  ;;  %v3151_v56 = vsel %vm5376_vm8, %v3146_v0, %v3150_v38  ;;  %v3232_v53 = vshll.u32 %v5997_v32, 16  ;;  %v3216_v46 = vrot.slane %v3215_v42, 4  ;;  %v6009_v38 = vld [vmem:[#allocation2 + $0x9c] sm:$0x1] }
 0x263   :  { %v3192_v23 = vrot.slane %v3190_v47, 5  ;;  %v3246_v50 = vshll.u32 %v5999_v26, 16  ;;  %v3253_v47 = vrot.slane %v3251_v25, 4  ;;  %v3256_v19 = vrot.slane %v3254_v24, 5 }
 0x264   :  { %4604 = vmatmul.mubr.bf16.vlgmr.msra.gmra.mrb[0].mxu0 %v5021_v10  ;;  %4730 = vmatpush3.bf16.msra.mxu1 %v5018_v27  ;;  %v3052_v27 = vld [vmem:[#allocation2 + $0x98] sm:$0xf]  ;;  %v3179_v16 = vsel %vm5376_vm8, %v3174_v2, %v3178_v11  ;;  %v3206_v36 = vrot.slane %v3204_v40, 5  ;;  %v3230_v0 = vrot.slane %v3229_v4, 4  ;;  %v5028_v2 = vld [vmem:[#allocation3 + $0x220] sm:$0xff]   ;;  %v3234_v29 = vrot.slane %v3232_v53, 5 }
 0x265   :  { %4607 = vmatprep.mubr.bf16.mxu0 %v5022_v33  ;;  %4747 = vmatprep.subr.bf16.mxu1 %v5020_v1  ;;  %v5026_v10 = vld [vmem:[#allocation2 + $0x58] ss:$8 sps:$4 sm:$0xff]   ;;  %v3193_v31 = vsel %vm5376_vm8, %v3188_v39, %v3192_v23  ;;  %v3265_v54 = vshrl.u32 %v3052_v27, 16  ;;  %v3268_v15 = vshll.u32 %v3052_v27, 16  ;;  %v4249_v33 = vcombine.low %v3151_v56, %v3165_v17  ;;  %v3488_v27 = vld [vmem:[#allocation2 + $0x10] sm:$0xe] }
 0x266   :  { %v4250_v44 = vcombine.low %v3179_v16, %v3193_v31  ;;  %v5030_v39 = vld [vmem:[#allocation2 + $0x78] ss:$8 sps:$4 sm:$0xff]   ;;  %v3248_v48 = vrot.slane %v3246_v50, 5  ;;  %v3257_v23 = vor.u32 %v3256_v19, %v3253_v47  ;;  %v3274_v28 = vshll.u32 %v6009_v38, 16  ;;  %v5031_v56 = vld [vmem:[#allocation3 + $0x228] sm:$0xff]   ;;  %v5032_v40 = vld [vmem:[#allocation3 + $0x230] sm:$0xff]  }
 0x267   :  { %4732 = vmatmul.mubr.bf16.vlgmr.msra.gmra.mrb[16].mxu1 %v4247_v61  ;;  %v3201_v61 = vor.u32 %v3200_v59, %v3197_v21  ;;  %v3267_v30 = vrot.slane %v3265_v54, 4  ;;  %v3270_v9 = vrot.slane %v3268_v15, 5  ;;  %v5029_v21 = vld [vmem:[#allocation2 + $0x68] ss:$8 sps:$4 sm:$0xff]   ;;  %v3235_v43 = vsel %vm5376_vm8, %v3230_v0, %v3234_v29 }
 0x268   :  { %4748 = vmatpush3.bf16.msra.mxu1 %v5020_v1  ;;  %4735 = vmatprep.mubr.bf16.mxu1 %v4248_v60  ;;  %v3243_v1 = vor.u32 %v3242_v18, %v3239_v55  ;;  %v6007_v60 = vld [vmem:[#allocation2 + $0x94] sm:$0x1]  ;;  %v3276_v31 = vrot.slane %v3274_v28, 5  ;;  %v3538_v42 = vrot.slane %v5922_v7, 5  ;;  %v3542_v24 = vrot.slane %v5924_v49, 5 }
 0x269   :  { %4749 = vmatprep.subr.bf16.mxu1 %v5023_v3  ;;  %v3202_v34 = vrot.slane %v3201_v61, 4  ;;  %v3271_v51 = vor.u32 %v3270_v9, %v3267_v30  ;;  %v3260_v18 = vshll.u32 %v6007_v60, 16  ;;  %v4262_v61 = vrot.slane %v3488_v27, 9  ;;  %v5033_v54 = vld [vmem:[#allocation2 + $0x88] ss:$8 sps:$4 sm:$0xff]  }
 0x26a   :  { %v3244_v14 = vrot.slane %v3243_v1, 4  ;;  %v3492_v53 = vld [vmem:[#allocation2 + $0x30] sm:$0xe]  ;;  %v3546_v47 = vrot.slane %v5926_v12, 5  ;;  %v3550_v19 = vrot.slane %v5936_v8, 5  ;;  %v3554_v9 = vrot.slane %v5943_v57, 5 }
 0x26b   :  { %v3207_v59 = vsel %vm5376_vm8, %v3202_v34, %v3206_v36  ;;  %v3272_v16 = vrot.slane %v3271_v51, 4  ;;  %v3262_v15 = vrot.slane %v3260_v18, 5  ;;  %v3539_v7 = vsel %vm5743_vm13, %v4262_v61, %v3538_v42  ;;  %v5034_v34 = vld [vmem:[#allocation3 + $0x238] sm:$0xff]   ;;  %v3494_v12 = vld [vmem:[#allocation2 + $0x40] sm:$0xe] }
 0x26c   :  { %4608 = vmatmul.mubr.bf16.gmra.mrb[4].mxu0 %v5025_v41  ;;  %4750 = vmatpush3.bf16.msra.mxu1 %v5023_v3  ;;  %v3220_v3 = vrot.slane %v3218_v45, 5  ;;  %v3249_v55 = vsel %vm5376_vm8, %v3244_v14, %v3248_v48  ;;  %v3491_v45 = vld [vmem:[#allocation2 + $0x28] sm:$0xe]  ;;  %v4266_v30 = vrot.slane %v3492_v53, 9  ;;  %v3558_v0 = vrot.slane %v5952_v63, 5 }
 0x26d   :  { %4611 = vmatprep.mubr.bf16.mxu0 %v5026_v10  ;;  %4751 = vmatprep.subr.bf16.mxu1 %v5024_v58  ;;  %v4252_v17 = vcombine.low %v3235_v43, %v3249_v55  ;;  %v3258_v10 = vrot.slane %v3257_v23, 4  ;;  %v3277_v1 = vsel %vm5376_vm8, %v3272_v16, %v3276_v31  ;;  %v4265_v37 = vrot.slane %v3491_v45, 9  ;;  %v3495_v57 = vld [vmem:[#allocation2 + $0x48] sm:$0xe] }
 0x26e   :  { %v3221_v11 = vsel %vm5376_vm8, %v3216_v46, %v3220_v3  ;;  %v3555_v8 = vsel %vm5743_vm13, %v4266_v30, %v3554_v9  ;;  %v3496_v3 = vld [vmem:[#allocation2 + $0x60] sm:$0xe]  ;;  %v3497_v63 = vld [vmem:[#allocation2 + $0x68] sm:$0xe]  ;;  %v3562_v48 = vrot.slane %v5964_v22, 5  ;;  %v3566_v23 = vrot.slane %v5970_v35, 5 }
 0x26f   :  { %4736 = vmatmul.mubr.bf16.gmra.mrb[20].mxu1 %v4249_v33  ;;  %v4251_v41 = vcombine.low %v3207_v59, %v3221_v11  ;;  %v3263_v4 = vsel %vm5376_vm8, %v3258_v10, %v3262_v15  ;;  %v3490_v33 = vld [vmem:[#allocation2 + $0x20] sm:$0xe]  ;;  %v4268_v59 = vrot.slane %v3494_v12, 9  ;;  %v4269_v11 = vrot.slane %v3495_v57, 9 }
 0x270   :  { %4752 = vmatpush3.bf16.msra.mxu1 %v5024_v58  ;;  %4739 = vmatprep.mubr.bf16.mxu1 %v4250_v44  ;;  %v3489_v58 = vld [vmem:[#allocation2 + $0x18] sm:$0xe]  ;;  %v4264_v46 = vrot.slane %v3490_v33, 9  ;;  %v4270_v51 = vrot.slane %v3496_v3, 9  ;;  %v3570_v28 = vrot.slane %v5977_v6, 5  ;;  %v4271_v43 = vrot.slane %v3497_v63, 9 }
 0x271   :  { %4753 = vmatprep.subr.bf16.mxu1 %v5027_v5  ;;  %v4263_v25 = vrot.slane %v3489_v58, 9  ;;  %v3493_v44 = vld [vmem:[#allocation2 + $0x38] sm:$0xe]  ;;  %v3574_v55 = vrot.slane %v5979_v52, 5  ;;  %v3563_v18 = vsel %vm5743_vm13, %v4268_v59, %v3562_v48  ;;  %v3567_v27 = vsel %vm5743_vm13, %v4269_v11, %v3566_v23  ;;  %v3498_v58 = vld [vmem:[#allocation2 + $0x70] sm:$0xe] }
 0x272   :  { %v4267_v36 = vrot.slane %v3493_v44, 9  ;;  %v3547_v14 = vsel %vm5743_vm13, %v4264_v46, %v3546_v47  ;;  %v3571_v22 = vsel %vm5743_vm13, %v4270_v51, %v3570_v28  ;;  %v3501_v6 = vld [vmem:[#allocation2 + $0x88] sm:$0xe]  ;;  %v4272_v10 = vrot.slane %v3498_v58, 9 }
 0x273   :  { %v3543_v49 = vsel %vm5743_vm13, %v4263_v25, %v3542_v24  ;;  %v3575_v35 = vsel %vm5743_vm13, %v4271_v43, %v3574_v55  ;;  %v3578_v16 = vrot.slane %v5989_v62, 5  ;;  %v3582_v61 = vrot.slane %v5995_v13, 5 }
 0x274   :  { %4612 = vmatmul.mubr.bf16.gmra.mrb[8].mxu0 %v5029_v21  ;;  %4754 = vmatpush3.bf16.msra.mxu1 %v5027_v5  ;;  %v4253_v5 = vcombine.low %v3263_v4, %v3277_v1  ;;  %v4278_v50 = vcombine.low %v3539_v7, %v3543_v49  ;;  %v3559_v21 = vsel %vm5743_vm13, %v4267_v36, %v3558_v0  ;;  %v3586_v25 = vrot.slane %v5997_v32, 5  ;;  %v3502_v4 = vld [vmem:[#allocation2 + $0x90] sm:$0xe]  ;;  %v3503_v1 = vld [vmem:[#allocation2 + $0x98] sm:$0xe] }
 0x275   :  { %4615 = vmatprep.mubr.bf16.mxu0 %v5030_v39  ;;  %4755 = vmatprep.subr.bf16.mxu1 %v5028_v2  ;;  %v4280_v29 = vcombine.low %v3555_v8, %v3559_v21  ;;  %v4282_v52 = vcombine.low %v3571_v22, %v3575_v35  ;;  %v4275_v24 = vrot.slane %v3501_v6, 9  ;;  %v3579_v15 = vsel %vm5743_vm13, %v4272_v10, %v3578_v16 }
 0x276   :  { %v4276_v32 = vrot.slane %v3502_v4, 9  ;;  %v4277_v49 = vrot.slane %v3503_v1, 9  ;;  %v3598_v45 = vrot.slane %v6009_v38, 5 }
 0x277   :  { %4740 = vmatmul.mubr.bf16.gmra.mrb[24].mxu1 %v4251_v41  ;;  %v3499_v41 = vld [vmem:[#allocation2 + $0x78] sm:$0xe] }
 0x278   :  { %4756 = vmatpush3.bf16.msra.mxu1 %v5028_v2  ;;  %4743 = vmatprep.mubr.bf16.mxu1 %v4252_v17  ;;  %v3551_v2 = vsel %vm5743_vm13, %v4265_v37, %v3550_v19  ;;  %v4281_v17 = vcombine.low %v3563_v18, %v3567_v27  ;;  %v4273_v31 = vrot.slane %v3499_v41, 9  ;;  %v3599_v44 = vsel %vm5743_vm13, %v4277_v49, %v3598_v45 }
 0x279   :  { %4757 = vmatprep.subr.bf16.mxu1 %v5031_v56  ;;  %v4279_v39 = vcombine.low %v3547_v14, %v3551_v2 }
 0x27c   :  { %4616 = vmatmul.mubr.bf16.gmra.mrb[12].mxu0 %v5033_v54  ;;  %4758 = vmatpush3.bf16.msra.mxu1 %v5031_v56  ;;  %v3500_v56 = vld [vmem:[#allocation2 + $0x80] sm:$0xe]  ;;  %v3590_v54 = vrot.slane %v5999_v26, 5  ;;  %v3594_v26 = vrot.slane %v6007_v60, 5 }
 0x27d   :  { %4759 = vmatprep.subr.bf16.mxu1 %v5032_v40  ;;  %v4274_v42 = vrot.slane %v3500_v56, 9 }
 0x27e   :  { %v3591_v13 = vsel %vm5743_vm13, %v4275_v24, %v3590_v54  ;;  %v3595_v53 = vsel %vm5743_vm13, %v4276_v32, %v3594_v26 }
 0x27f   :  { %4744 = vmatmul.mubr.bf16.gmra.mrb[28].mxu1 %v4253_v5  ;;  %v3587_v62 = vsel %vm5743_vm13, %v4274_v42, %v3586_v25  ;;  %v4285_v5 = vcombine.low %v3595_v53, %v3599_v44 }
 0x280   :  { %4760 = vmatpush3.bf16.msra.mxu1 %v5032_v40  ;;  %4763 = vmatprep.mubr.bf16.mxu1 %v4278_v50  ;;  %v3583_v40 = vsel %vm5743_vm13, %v4273_v31, %v3582_v61  ;;  %v4284_v7 = vcombine.low %v3587_v62, %v3591_v13 }
 0x281   :  { %4761 = vmatprep.subr.bf16.mxu1 %v5034_v34  ;;  %v4283_v33 = vcombine.low %v3579_v15, %v3583_v40 }
 0x284   :  { %4762 = vmatpush3.bf16.msra.mxu1 %v5034_v34  ;;  %v5116_v34 = vmov 0.0  }
 0x285   :  { %4779 = vmatprep.subr.bf16.mxu0 %v5116_v34  ;;  %4795 = vmatprep.mubr.msk.bf16.mxu0 %vm5117_vm14, %v5116_v34 }
 0x287   :  { %4764 = vmatmul.mubr.bf16.vlgmr.msra.gmra.mrb[16].mxu1 %v4279_v39 }
 0x288   :  { %4767 = vmatprep.mubr.bf16.mxu1 %v4280_v29 }
 0x28f   :  { %4768 = vmatmul.mubr.bf16.gmra.mrb[20].mxu1 %v4281_v17 }
 0x290   :  { %4771 = vmatprep.mubr.bf16.mxu1 %v4282_v52 }
 0x297   :  { %4772 = vmatmul.mubr.bf16.gmra.mrb[24].mxu1 %v4283_v33 }
 0x298   :  { %4775 = vmatprep.mubr.bf16.mxu1 %v4284_v7 }
 0x29f   :  { %4776 = vmatmul.mubr.bf16.gmra.mrb[28].mxu1 %v4285_v5 }
 0x337   :  { %v4605_v46 = vpop.f32.mrb[0].mxu0 }
 0x338   :  { %v1912_v50 = vpop.f32.mrb[1].mxu0 }
 0x339   :  { %v4606_v47 = vpop.f32.mrb[2].mxu0 }
 0x33a   :  { %v1915_v60 = vpop.f32.mrb[3].mxu0 }
 0x33f   :  { %v4609_v37 = vpop.f32.mrb[4].mxu0 }
 0x340   :  { %v1928_v19 = vpop.f32.mrb[5].mxu0 }
 0x341   :  { %v4610_v38 = vpop.f32.mrb[6].mxu0 }
 0x342   :  { %v1931_v30 = vpop.f32.mrb[7].mxu0 }
 0x347   :  { %v4613_v9 = vpop.f32.mrb[8].mxu0 }
 0x348   :  { %v1944_v36 = vpop.f32.mrb[9].mxu0 }
 0x349   :  { %v4614_v0 = vpop.f32.mrb[10].mxu0 }
 0x34a   :  { %v1947_v14 = vpop.f32.mrb[11].mxu0 }
 0x34f   :  { %v4617_v2 = vpop.f32.mrb[12].mxu0 }
 0x350   :  { %v6072_v20 = vpop.f32.mrb[13].mxu0 }
 0x351   :  { %v6074_v12 = vpop.f32.mrb[14].mxu0 }
 0x352   :  { %v6076_v8 = vpop.f32.mrb[15].mxu0 }
 0x35a   :  { %v4765_v21 = vpop.f32.mrb[16].mxu1 }
 0x35b   :  { %v6078_v57 = vadd.f32 %v4765_v21, %v4605_v46  ;;  %v3731_v3 = vpop.f32.mrb[17].mxu1 }
 0x35c   :  { %v6080_v63 = vadd.f32 %v3731_v3, %v1912_v50  ;;  %v4766_v39 = vpop.f32.mrb[18].mxu1 }
 0x35d   :  { %v6082_v59 = vadd.f32 %v4766_v39, %v4606_v47  ;;  %v3734_v29 = vpop.f32.mrb[19].mxu1  ;;  %v3835_v28 = vmul.f32 %v6078_v57, %v6078_v57 }
 0x35e   :  { %v6084_v48 = vadd.f32 %v3734_v29, %v1915_v60  ;;  %v3833_v11 = vmul.f32 %v6080_v63, %v6080_v63 }
 0x35f   :  { %v3836_v22 = vmul.f32 %v6082_v59, %v6082_v59 }
 0x360   :  { %v3812_v23 = vadd.f32 %v6084_v48, %v6080_v63  ;;  %v3834_v51 = vmul.f32 %v6084_v48, %v6084_v48 }
 0x362   :  { %v3813_v43 = vadd.f32 %v6078_v57, %v3812_v23  ;;  %v3849_v55 = vadd.f32 %v3834_v51, %v3833_v11  ;;  %v4769_v18 = vpop.f32.mrb[20].mxu1 }
 0x363   :  { %v6095_v27 = vadd.f32 %v4769_v18, %v4609_v37  ;;  %v3747_v58 = vpop.f32.mrb[21].mxu1 }
 0x364   :  { %v3850_v35 = vadd.f32 %v3849_v55, %v3835_v28  ;;  %v6099_v41 = vadd.f32 %v3747_v58, %v1928_v19  ;;  %v3814_v56 = vadd.f32 %v6082_v59, %v3813_v43  ;;  %v4770_v6 = vpop.f32.mrb[22].mxu1 }
 0x365   :  { %v6103_v17 = vadd.f32 %v4770_v6, %v4610_v38  ;;  %v3750_v10 = vpop.f32.mrb[23].mxu1  ;;  %v3839_v54 = vmul.f32 %v6095_v27, %v6095_v27 }
 0x366   :  { %v3815_v52 = vadd.f32 %v6099_v41, %v3814_v56  ;;  %v3837_v16 = vmul.f32 %v6099_v41, %v6099_v41  ;;  %v3851_v31 = vadd.f32 %v3850_v35, %v3836_v22  ;;  %v6108_v61 = vadd.f32 %v3750_v10, %v1931_v30 }
 0x367   :  { %v3840_v1 = vmul.f32 %v6103_v17, %v6103_v17 }
 0x368   :  { %v3852_v42 = vadd.f32 %v3851_v31, %v3837_v16  ;;  %v3816_v25 = vadd.f32 %v6108_v61, %v3815_v52  ;;  %v3838_v24 = vmul.f32 %v6108_v61, %v6108_v61 }
 0x36a   :  { %v3817_v15 = vadd.f32 %v6095_v27, %v3816_v25  ;;  %v3853_v40 = vadd.f32 %v3852_v42, %v3838_v24  ;;  %v4773_v4 = vpop.f32.mrb[24].mxu1 }
 0x36b   :  { %v6116_v62 = vadd.f32 %v4773_v4, %v4613_v9  ;;  %v3763_v13 = vpop.f32.mrb[25].mxu1 }
 0x36c   :  { %v3854_v33 = vadd.f32 %v3853_v40, %v3839_v54  ;;  %v6120_v32 = vadd.f32 %v3763_v13, %v1944_v36  ;;  %v3818_v7 = vadd.f32 %v6103_v17, %v3817_v15  ;;  %v4774_v26 = vpop.f32.mrb[26].mxu1 }
 0x36d   :  { %v6123_v49 = vadd.f32 %v4774_v26, %v4614_v0  ;;  %v3766_v45 = vpop.f32.mrb[27].mxu1  ;;  %v3843_v37 = vmul.f32 %v6116_v62, %v6116_v62 }
 0x36e   :  { %v3819_v53 = vadd.f32 %v6120_v32, %v3818_v7  ;;  %v3841_v44 = vmul.f32 %v6120_v32, %v6120_v32  ;;  %v3855_v5 = vadd.f32 %v3854_v33, %v3840_v1  ;;  %v6128_v46 = vadd.f32 %v3766_v45, %v1947_v14  ;;  %v3810_v45 = vld [vmem:[%s6220_s6] sm:$0x1] }
 0x36f   :  { %v3844_v0 = vmul.f32 %v6123_v49, %v6123_v49 }
 0x370   :  { %v3856_v50 = vadd.f32 %v3855_v5, %v3841_v44  ;;  %v3820_v47 = vadd.f32 %v6128_v46, %v3819_v53  ;;  %v3842_v60 = vmul.f32 %v6128_v46, %v6128_v46  ;;  %v3811_v5 = vld [vmem:[%s6221_s7] sm:$0x1] }
 0x372   :  { %v3821_v19 = vadd.f32 %v6116_v62, %v3820_v47  ;;  %v3857_v38 = vadd.f32 %v3856_v50, %v3842_v60  ;;  %v4777_v30 = vpop.f32.mrb[28].mxu1  ;;  %v6246_v47 = vld [vmem:[#allocation9_spill] sm:$0xff] }
 0x373   :  { %v6136_v9 = vadd.f32 %v4777_v30, %v4617_v2  ;;  %v3779_v36 = vpop.f32.mrb[29].mxu1 }
 0x374   :  { %v3858_v14 = vadd.f32 %v3857_v38, %v3843_v37  ;;  %v4812_v21 = vadd.f32 %v3779_v36, %v6072_v20  ;;  %v3822_v3 = vadd.f32 %v6123_v49, %v3821_v19  ;;  %v4778_v39 = vpop.f32.mrb[30].mxu1 }
 0x375   :  { %v6143_v29 = vadd.f32 %v4778_v39, %v6074_v12  ;;  %v3782_v11 = vpop.f32.mrb[31].mxu1  ;;  %v3847_v58 = vmul.f32 %v6136_v9, %v6136_v9 }
 0x376   :  { %v3823_v23 = vadd.f32 %v4812_v21, %v3822_v3  ;;  %v3845_v51 = vmul.f32 %v4812_v21, %v4812_v21  ;;  %v3859_v28 = vadd.f32 %v3858_v14, %v3844_v0  ;;  %v4814_v2 = vadd.f32 %v3782_v11, %v6076_v8 }
 0x377   :  { %v3848_v35 = vmul.f32 %v6143_v29, %v6143_v29 }
 0x378   :  { %v3860_v43 = vadd.f32 %v3859_v28, %v3845_v51  ;;  %v3824_v55 = vadd.f32 %v4814_v2, %v3823_v23  ;;  %v3846_v18 = vmul.f32 %v4814_v2, %v4814_v2 }
 0x37a   :  { %v3825_v20 = vadd.f32 %v6136_v9, %v3824_v55  ;;  %v3861_v22 = vadd.f32 %v3860_v43, %v3846_v18 }
 0x37c   :  { %v3826_v12 = vadd.f32 %v6143_v29, %v3825_v20  ;;  %v3862_v56 = vadd.f32 %v3861_v22, %v3847_v58 }
 0x37e   :  { %v3827_v6 = vrot.slane %v3826_v12, 4  ;;  %v3863_v10 = vadd.f32 %v3862_v56, %v3848_v35 }
 0x380   :  { %v3828_v52 = vadd.f32 %v3827_v6, %v3826_v12  ;;  %v3864_v16 = vrot.slane %v3863_v10, 4 }
 0x382   :  { %v3829_v8 = vrot.slane %v3828_v52, 2  ;;  %v3865_v31 = vadd.f32 %v3864_v16, %v3863_v10 }
 0x384   :  { %v3830_v42 = vadd.f32 %v3829_v8, %v3828_v52  ;;  %v3866_v25 = vrot.slane %v3865_v31, 2 }
 0x386   :  { %v3831_v24 = vrot.slane %v3830_v42, 1  ;;  %v3867_v54 = vadd.f32 %v3866_v25, %v3865_v31 }
 0x388   :  { %v3832_v15 = vadd.f32 %v3831_v24, %v3830_v42  ;;  %v3868_v40 = vrot.slane %v3867_v54, 1 }
 0x38a   :  { %v3869_v4 = vadd.f32 %v3868_v40, %v3867_v54  ;;  %v3870_v13 = vmul.f32 0.0078125, %v3832_v15 }
 0x38c   :  { %v3871_v1 = vmul.f32 0.0078125, %v3869_v4  ;;  %v3872_v33 = vmul.f32 %v3870_v13, %v3870_v13 }
 0x38e   :  { %v3873_v7 = vsub.f32 %v3871_v1, %v3872_v33 }
 0x390   :  { %v3874_v26 = vadd.f32 1e-05, %v3873_v7 }
 0x392   :  { %5038 = vrsqrt.f32 %v3874_v26 }
 0x39c   :  { %v5039_v53 = vpop.eup %5038 }
 0x39d   :  { %v3876_v44 = vmul.f32 %v5039_v53, %v3810_v45 }
 0x39f   :  { %v3877_v50 = vmul.f32 %v3876_v44, %v3870_v13  ;;  %v3883_v60 = vrot.slane %v3876_v44, %v6246_v47 }
 0x3a1   :  { %v3878_v37 = vsub.f32 %v3811_v5, %v3877_v50  ;;  %v3898_v19 = vmul.f32 %v4814_v2, %v3883_v60  ;;  %v3885_v38 = vmul.f32 %v6080_v63, %v3883_v60  ;;  %v3886_v30 = vmul.f32 %v6084_v48, %v3883_v60 }
 0x3a2   :  { %v3887_v36 = vmul.f32 %v6078_v57, %v3883_v60  ;;  %v3888_v0 = vmul.f32 %v6082_v59, %v3883_v60  ;;  %v3889_v14 = vmul.f32 %v6099_v41, %v3883_v60  ;;  %v3890_v3 = vmul.f32 %v6108_v61, %v3883_v60 }
 0x3a3   :  { %v3905_v39 = vrot.slane %v3878_v37, %v6246_v47  ;;  %v3891_v11 = vmul.f32 %v6095_v27, %v3883_v60  ;;  %v3892_v23 = vmul.f32 %v6103_v17, %v3883_v60  ;;  %v3893_v51 = vmul.f32 %v6120_v32, %v3883_v60 }
 0x3a4   :  { %v3894_v63 = vmul.f32 %v6128_v46, %v3883_v60  ;;  %v3895_v48 = vmul.f32 %v6116_v62, %v3883_v60  ;;  %v3896_v57 = vmul.f32 %v6123_v49, %v3883_v60  ;;  %v3897_v28 = vmul.f32 %v4812_v21, %v3883_v60 }
 0x3a5   :  { %v3920_v59 = vadd.f32 %v3905_v39, %v3898_v19  ;;  %v3907_v2 = vadd.f32 %v3905_v39, %v3885_v38  ;;  %v3908_v41 = vadd.f32 %v3905_v39, %v3886_v30  ;;  %v3909_v43 = vadd.f32 %v3905_v39, %v3887_v36 }
 0x3a6   :  { %v3910_v61 = vadd.f32 %v3905_v39, %v3888_v0  ;;  %v3911_v55 = vadd.f32 %v3905_v39, %v3889_v14  ;;  %v3912_v18 = vadd.f32 %v3905_v39, %v3890_v3  ;;  %v3913_v58 = vadd.f32 %v3905_v39, %v3891_v11 }
 0x3a7   :  { %v3936_v27 = vmax.f32 %v3920_v59, 0.0  ;;  %v3923_v20 = vmax.f32 %v3907_v2, 0.0  ;;  %v3924_v17 = vmax.f32 %v3908_v41, 0.0  ;;  %v3925_v22 = vmax.f32 %v3909_v43, 0.0  ;;  %v3997_v41 = vld [vmem:[%s6222_s8 + $0x8] sm:$0xff] }
 0x3a8   :  { %v3926_v32 = vmax.f32 %v3910_v61, 0.0  ;;  %v3927_v35 = vmax.f32 %v3911_v55, 0.0  ;;  %v3928_v46 = vmax.f32 %v3912_v18, 0.0  ;;  %v3914_v12 = vadd.f32 %v3905_v39, %v3892_v23  ;;  %v3998_v18 = vld [vmem:[%s6223_s9] sm:$0xff] }
 0x3a9   :  { %v3939_v62 = vpack.c.bf16 %v3924_v17, %v3923_v20  ;;  %v3929_v56 = vmax.f32 %v3913_v58, 0.0  ;;  %v3915_v49 = vadd.f32 %v3905_v39, %v3893_v51  ;;  %v3916_v21 = vadd.f32 %v3905_v39, %v3894_v63  ;;  %v3999_v20 = vld [vmem:[%s6223_s9 + $0x8] sm:$0xff]  ;;  %s5118_s9 = smov [#allocation6]  }
 0x3aa   :  { %v3940_v6 = vpack.c.bf16 %v3926_v32, %v3925_v22  ;;  %v3941_v10 = vpack.c.bf16 %v3928_v46, %v3927_v35  ;;  %v3930_v52 = vmax.f32 %v3914_v12, 0.0  ;;  %v3917_v16 = vadd.f32 %v3905_v39, %v3895_v48  ;;  %v4052_v46 = vld [vmem:[%s6214_s0] sm:$0xff]  ;;  %s4065_s27 = sshll.u32 %s5118_s9, 4  ;;  %s4066_s27 = int_to_ptr.vmem [resolvable:$true] %s4065_s27 }
 0x3ab   :  { %4780 = vmatpush3.bf16.xpose.msra.mxu0 %v3939_v62  ;;  %v3931_v8 = vmax.f32 %v3915_v49, 0.0  ;;  %v3932_v31 = vmax.f32 %v3916_v21, 0.0  ;;  %v3918_v42 = vadd.f32 %v3905_v39, %v3896_v57  ;;  %v3919_v25 = vadd.f32 %v3905_v39, %v3897_v28  ;;  %v3996_v28 = vld [vmem:[%s6222_s8] sm:$0xff]  ;;  %v4053_v21 = vld [vmem:[%s6214_s0 + $0x8] sm:$0xff]  ;;  %s5086_s28 = scalar_lea.vmem %s4066_s27, 256  ;;  %p5091_p9 = scmp.lt.s32.totalorder %s4066_s27, %s4066_s27 }
 0x3ac   :  { %4781 = vmatprep.subr.bf16.mxu0 %v5116_v34  ;;  %v3942_v24 = vpack.c.bf16 %v3930_v52, %v3929_v56  ;;  %v3933_v54 = vmax.f32 %v3917_v16, 0.0  ;;  %v3899_v15 = vmul.f32 %v6136_v9, %v3883_v60  ;;  %v3900_v40 = vmul.f32 %v6143_v29, %v3883_v60  ;;  %v5035_v9 = vld [vmem:[%s6217_s3] sm:$0xff]   ;;  %p5087_p8 = scmp.ne.s32.totalorder %s4066_s27, %s5086_s28  ;;  %p5092_p10 = scmp.lt.s32.totalorder %s5086_s28, %s5086_s28 }
 0x3ad   :  { %v3943_v4 = vpack.c.bf16 %v3932_v31, %v3931_v8  ;;  %v3934_v13 = vmax.f32 %v3918_v42, 0.0  ;;  %v3935_v1 = vmax.f32 %v3919_v25, 0.0 }
 0x3ae   :  { %v3921_v33 = vadd.f32 %v3905_v39, %v3899_v15  ;;  %v3922_v7 = vadd.f32 %v3905_v39, %v3900_v40  ;;  %p5093_p11 = por %p5092_p10, %p5091_p9 }
 0x3af   :  { %v3944_v26 = vpack.c.bf16 %v3934_v13, %v3933_v54  ;;  %v3945_v45 = vpack.c.bf16 %v3936_v27, %v3935_v1 }
 0x3b0   :  { %v3937_v53 = vmax.f32 %v3921_v33, 0.0  ;;  %v3938_v44 = vmax.f32 %v3922_v7, 0.0  ;;  %p5094_p12 = pnand %p5093_p11, %p5087_p8 }
 0x3b2   :  { %v3946_v5 = vpack.c.bf16 %v3938_v44, %v3937_v53 }
 0x3b3   :  { %4782 = vmatpush3.bf16.xpose.msra.mxu0 %v3940_v6 }
 0x3b4   :  { %4783 = vmatprep.subr.bf16.mxu0 %v5116_v34 }
 0x3bb   :  { %4784 = vmatpush3.bf16.xpose.msra.mxu0 %v3941_v10 }
 0x3bc   :  { %4785 = vmatprep.subr.bf16.mxu0 %v5116_v34 }
 0x3c3   :  { %4786 = vmatpush3.bf16.xpose.msra.mxu0 %v3942_v24 }
 0x3c4   :  { %4787 = vmatprep.subr.bf16.mxu0 %v5116_v34 }
 0x3cb   :  { %4788 = vmatpush3.bf16.xpose.msra.mxu0 %v3943_v4 }
 0x3cc   :  { %4789 = vmatprep.subr.bf16.mxu0 %v5116_v34 }
 0x3d3   :  { %4790 = vmatpush3.bf16.xpose.msra.mxu0 %v3944_v26 }
 0x3d4   :  { %4791 = vmatprep.subr.bf16.mxu0 %v5116_v34 }
 0x3db   :  { %4792 = vmatpush3.bf16.xpose.msra.mxu0 %v3945_v45 }
 0x3dc   :  { %4793 = vmatprep.subr.bf16.mxu0 %v5116_v34 }
 0x3e3   :  { %4794 = vmatpush3.bf16.xpose.msra.mxu0 %v3946_v5 }
 0x3ea   :  { %4796 = vmatmul.mubr.bf16.vlgmr.msra.gmra.mrb[16].mxu0 %v5035_v9 }
 0x4bd   :  { %v3989_v29 = vpop.f32.mrb[16].mxu0 }
 0x4be   :  { %4000 = vadd.xlane.f32.xlu0 %v3989_v29  ;;  %v4797_v50 = vpop.f32.mrb[17].mxu0  ;;  %v4004_v37 = vmul.f32 %v3989_v29, %v3989_v29 }
 0x4bf   :  { %v3992_v47 = vpop.f32.mrb[18].mxu0 }
 0x4c0   :  { %4002 = vadd.xlane.f32.xlu1 %v3992_v47  ;;  %v4798_v60 = vpop.f32.mrb[19].mxu0  ;;  %v4005_v19 = vmul.f32 %v3992_v47, %v3992_v47 }
 0x4c4   :  { %4006 = vadd.xlane.f32.xlu1 %v4004_v37 }
 0x4c8   :  { %4008 = vadd.xlane.f32.xlu1 %v4005_v19 }
 0x54b   :  { %v4001_v38 = vpop.xlane.xlu0 %4000 }
 0x54c   :  { %v4010_v36 = vmul.f32 0.0078125, %v4001_v38 }
 0x54d   :  { %v4003_v30 = vpop.xlane.xlu1 %4002 }
 0x54e   :  { %v4014_v0 = vmul.f32 %v4010_v36, %v4010_v36  ;;  %v4011_v14 = vmul.f32 0.0078125, %v4003_v30 }
 0x550   :  { %v4015_v23 = vmul.f32 %v4011_v14, %v4011_v14 }
 0x551   :  { %v4007_v34 = vpop.xlane.xlu1 %4006 }
 0x552   :  { %v4012_v3 = vmul.f32 0.0078125, %v4007_v34 }
 0x554   :  { %v4016_v39 = vsub.f32 %v4012_v3, %v4014_v0 }
 0x555   :  { %v4009_v11 = vpop.xlane.xlu1 %4008 }
 0x556   :  { %v4018_v51 = vadd.f32 1e-05, %v4016_v39  ;;  %v4013_v63 = vmul.f32 0.0078125, %v4009_v11 }
 0x558   :  { %5040 = vrsqrt.f32 %v4018_v51  ;;  %v4017_v48 = vsub.f32 %v4013_v63, %v4015_v23 }
 0x55a   :  { %v4019_v57 = vadd.f32 1e-05, %v4017_v48 }
 0x55c   :  { %5042 = vrsqrt.f32 %v4019_v57 }
 0x562   :  { %v5041_v59 = vpop.eup %5040 }
 0x563   :  { %v4022_v2 = vmul.f32 %v5041_v59, %v3996_v28 }
 0x565   :  { %4030 = vperm.xlu1 %4936, %v4022_v2   ;;  %v4024_v55 = vmul.f32 %v4022_v2, %v4010_v36 }
 0x566   :  { %v5043_v43 = vpop.eup %5042 }
 0x567   :  { %v4023_v61 = vmul.f32 %v5043_v43, %v3997_v41  ;;  %v4026_v58 = vsub.f32 %v3998_v18, %v4024_v55 }
 0x569   :  { %4035 = vperm.xlu1 %4936, %v4023_v61   ;;  %v4025_v27 = vmul.f32 %v4023_v61, %v4011_v14 }
 0x56b   :  { %v4027_v17 = vsub.f32 %v3999_v20, %v4025_v27 }
 0x56d   :  { %4042 = vperm.xlu1 %4936, %v4026_v58  }
 0x571   :  { %4047 = vperm.xlu1 %4936, %v4027_v17  }
 0x5e4   :  { %v4031_v22 = vpop.permute.xlu1 %4030 }
 0x5e5   :  { %v4038_v35 = vmul.f32 %v4031_v22, %v3989_v29 }
 0x5e8   :  { %v4036_v32 = vpop.permute.xlu1 %4035 }
 0x5e9   :  { %v4039_v56 = vmul.f32 %v4036_v32, %v3992_v47 }
 0x5ec   :  { %v4043_v12 = vpop.permute.xlu1 %4042 }
 0x5ed   :  { %v4050_v62 = vadd.f32 %v4043_v12, %v4038_v35 }
 0x5ef   :  { %v4054_v49 = vadd.f32 %v4052_v46, %v4050_v62 }
 0x5f0   :  { %v4048_v6 = vpop.permute.xlu1 %4047 }
 0x5f1   :  { %v4056_v10 = vmax.f32 %v4054_v49, 0.0  ;;  %v4051_v52 = vadd.f32 %v4048_v6, %v4039_v56 }
 0x5f3   :  { %4058 = vst [vmem:[#allocation6] sm:$0xff] %v4056_v10  ;;  %v4055_v16 = vadd.f32 %v4053_v21, %v4051_v52 }
 0x5f5   :  { %v4057_v8 = vmax.f32 %v4055_v16, 0.0 }
 0x5f7   :  { %4059 = vst [vmem:[#allocation6 + $0x8] sm:$0xff] %v4057_v8 }
 0x5f8   :  { %5097 = shalt.err (!%p5094_p12)
}
 0x5f9   :  { %s5098_s0 = scalar_lea.hbm %s6224_s10, 256 }
 0x5fa   :  { %p5099_p13 = scmp.ne.s32.totalorder %s6224_s10, %s5098_s0  ;;  %p5102_p0 = scmp.lt.u32.totalorder %s5098_s0, %s6224_s10 }
 0x5fc   :  { %p5104_p1 = pnand %p5102_p0, %p5099_p13 }
 0x5fe   :  { %5107 = shalt.err (!%p5104_p1)
}
 0x5ff   :  { %s5119_s13 = smov 128   ;;  %s5120_s14 = smov 8  }
 0x600   :  { %4071 = dma.vmem_to_hbm [thread:$0]  %s4066_s27, 256, %s6224_s10, [#allocation5], %s5119_s13, %s5119_s13, %s5120_s14  }
 0x601   :  { %5110 = dma.done.wait [#allocation5], 256  }
 0x602   :  { %5111 = vsyncadd [#allocation5], 4294967040 }
 0x603   :  { %4075 = vsyncpa [#allocation4], 1 }
 0x604   :  { %4076 = vsyncpa [#allocation5], 1 }

</bundles_post_ra>
